<compile_context>
chip_gen: v7x
topology: tpu7x:2x2x1
jax: 0.10.0
libtpu: 0.0.40
codegen_flags: <defaults>
</compile_context>

<pallas_src>
import jax
import jax.numpy as jnp
from jax.experimental import pallas as pl
from jax.experimental.pallas import tpu as pltpu

IMG_SHAPE = (1, 28, 28)
IMG_SIZE = IMG_SHAPE[0] * IMG_SHAPE[1] * IMG_SHAPE[2]   # 784
LATENT_DIM = 100
NUM_CLASSES = 10
BN_EPS = 0.8            # nn.BatchNorm1d(n, 0.8) -> second positional arg is eps

IN_DIM = LATENT_DIM + NUM_CLASSES   # 110
PAD_IN = 128                        # lane-aligned input feature dim
PAD_OUT = 896                       # 7 * 128, lane-aligned output feature dim
HIDDEN = (128, 256, 512, 1024)


# ----------------------------- in-kernel math ------------------------------

def _gelu(x):
    # tanh-approx GELU: ~5 VALU ops + 1 EUP tanh per element.
    # Deviates from nn.GELU()'s exact erf by <= ~3e-4 absolute (fine for a GAN).
    c = 0.7978845608028654  # sqrt(2/pi)
    return 0.5 * x * (1.0 + jnp.tanh(c * (x + 0.044715 * x * x * x)))


def _batchnorm_train(x, gamma, beta):
    # BatchNorm1d, training mode, biased batch variance. Single fused pass
    # (sum / sum-of-squares); E[x^2]-mean^2 cancellation is benign only
    # because eps=0.8 is large -- switch to two-pass if reused with eps~1e-5.
    inv_b = 1.0 / x.shape[0]
    mean = jnp.sum(x, axis=0, keepdims=True) * inv_b
    var = jnp.sum(x * x, axis=0, keepdims=True) * inv_b - mean * mean
    return (x - mean) * jax.lax.rsqrt(var + BN_EPS) * gamma + beta


# ------------------------------- the kernel --------------------------------

def generator_kernel(x_ref, lab_ref,
                     w1n_ref, w1c_ref, b1_ref,
                     w2_ref, b2_ref, g2_ref, be2_ref,
                     w3_ref, b3_ref, g3_ref, be3_ref,
                     w4_ref, b4_ref, g4_ref, be4_ref,
                     w5_ref, b5_ref,
                     out_ref):
    bf16 = jnp.bfloat16
    B = x_ref.shape[0]

    x = x_ref[...].astype(bf16)                                 # (B, 128) padded noise

    # Embedding + concat fused: one_hot(labels) @ (emb @ W1[100:110]) was folded
    # into w1c at pack time, so the label path is a single lane-dense matmul.
    lbl = lab_ref[...]                                          # (B, 1) int32
    col = jax.lax.broadcasted_iota(jnp.int32, (B, PAD_IN), 1)   # (B, 128)
    onehot = jnp.where(col == lbl, 1.0, 0.0).astype(bf16)       # (B, 128)

    # Linear(110 -> 128) + GELU   (noise part + label part, both K=128 matmuls)
    h = (jnp.dot(x, w1n_ref[...], preferred_element_type=jnp.float32)
         + jnp.dot(onehot, w1c_ref[...], preferred_element_type=jnp.float32)
         + b1_ref[...])
    h = _gelu(h)

    # Linear(128 -> 256) + BatchNorm1d(256, eps=0.8) + GELU
    h = jnp.dot(h.astype(bf16), w2_ref[...],
                preferred_element_type=jnp.float32) + b2_ref[...]
    h = _gelu(_batchnorm_train(h, g2_ref[...], be2_ref[...]))

    # Linear(256 -> 512) + BatchNorm1d(512, eps=0.8) + GELU
    h = jnp.dot(h.astype(bf16), w3_ref[...],
                preferred_element_type=jnp.float32) + b3_ref[...]
    h = _gelu(_batchnorm_train(h, g3_ref[...], be3_ref[...]))

    # Linear(512 -> 1024) + BatchNorm1d(1024, eps=0.8) + GELU
    h = jnp.dot(h.astype(bf16), w4_ref[...],
                preferred_element_type=jnp.float32) + b4_ref[...]
    h = _gelu(_batchnorm_train(h, g4_ref[...], be4_ref[...]))

    # Linear(1024 -> 896) + Tanh      (output zero-padded from 784)
    y = jnp.dot(h.astype(bf16), w5_ref[...],
                preferred_element_type=jnp.float32) + b5_ref[...]
    out_ref[...] = jnp.tanh(y)


# ------------------------------ JAX wrapper ---------------------------------

def init_params(key):
    """Deterministic parameter init with the same shapes as the PyTorch module."""
    ks = jax.random.split(key, 16)
    dims = [IN_DIM, 128, 256, 512, 1024, IMG_SIZE]

    def linear(kw, kb, fan_in, fan_out):
        bound = 1.0 / jnp.sqrt(fan_in)
        w = jax.random.uniform(kw, (fan_in, fan_out), jnp.float32, -bound, bound)
        b = jax.random.uniform(kb, (1, fan_out), jnp.float32, -bound, bound)
        return w, b

    p = {}
    p["emb"] = jax.random.normal(ks[0], (NUM_CLASSES, NUM_CLASSES), jnp.float32)
    p["w1"], p["b1"] = linear(ks[1], ks[2], dims[0], dims[1])
    p["w2"], p["b2"] = linear(ks[3], ks[4], dims[1], dims[2])
    p["w3"], p["b3"] = linear(ks[5], ks[6], dims[2], dims[3])
    p["w4"], p["b4"] = linear(ks[7], ks[8], dims[3], dims[4])
    p["w5"], p["b5"] = linear(ks[9], ks[10], dims[4], dims[5])
    # BatchNorm affine params (PyTorch default init: weight=1, bias=0)
    for name, n in (("2", 256), ("3", 512), ("4", 1024)):
        p["g" + name] = jnp.ones((1, n), jnp.float32)
        p["be" + name] = jnp.zeros((1, n), jnp.float32)
    return p


def pack_params(params):
    """ONE-TIME packing (call at init, not per forward):
       - fold the embedding table into a (128,128) class-weight matrix for layer 1,
       - zero-pad w1/w5/b5 for lane alignment,
       - cast weight matrices to bf16 (f32 MXU accumulation in the kernel)."""
    bf16 = jnp.bfloat16
    w1 = params["w1"]                                   # (110, 128)
    # Noise part of layer 1: rows 0:100 of w1, zero-padded to 128 rows.
    w1n = jnp.zeros((PAD_IN, HIDDEN[0]), jnp.float32).at[:LATENT_DIM, :].set(
        w1[:LATENT_DIM, :])
    # Label part of layer 1: emb @ w1[100:110], placed in rows 0:10 of a
    # (128,128) matrix so one_hot(label) @ w1c == emb[label] @ w1[100:110].
    w1c = jnp.zeros((PAD_IN, HIDDEN[0]), jnp.float32).at[:NUM_CLASSES, :].set(
        params["emb"] @ w1[LATENT_DIM:IN_DIM, :])
    # w5/b5: 784 -> 896 zero columns (sliced away after the kernel)
    w5p = jnp.zeros((HIDDEN[3], PAD_OUT), jnp.float32).at[:, :IMG_SIZE].set(params["w5"])
    b5p = jnp.zeros((1, PAD_OUT), jnp.float32).at[:, :IMG_SIZE].set(params["b5"])
    return (
        w1n.astype(bf16), w1c.astype(bf16), params["b1"],
        params["w2"].astype(bf16), params["b2"], params["g2"], params["be2"],
        params["w3"].astype(bf16), params["b3"], params["g3"], params["be3"],
        params["w4"].astype(bf16), params["b4"], params["g4"], params["be4"],
        w5p.astype(bf16), b5p,
    )


def generator_forward(noise, labels, packed):
    """noise: (B, 100) f32, labels: (B,) int, packed: pack_params(...) output
       -> (B, 1, 28, 28) f32."""
    B = noise.shape[0]
    # Lane padding of the noise (110->128 input dim lives inside the kernel via
    # the one-hot label matmul; only the 100->128 zero pad remains here).
    x = jnp.concatenate(
        [noise, jnp.zeros((B, PAD_IN - LATENT_DIM), noise.dtype)], axis=1)   # (B, 128)
    lab = labels.astype(jnp.int32).reshape(B, 1)

    kernel_inputs = (x, lab) + tuple(packed)
    vmem_spec = pl.BlockSpec(memory_space=pltpu.MemorySpace.VMEM)

    # Scoped-VMEM limit derived from actual buffer sizes (not a blanket 32 MiB);
    # floor of 16 MiB (<= default everywhere), cap well under v7x's 64 MiB.
    param_bytes = sum(int(a.size) * a.dtype.itemsize for a in packed)
    io_bytes = B * (PAD_IN * 4 + 4 + PAD_OUT * 4)
    act_bytes = B * 3 * HIDDEN[3] * 4          # rough peak live activations
    vmem_limit = int(1.5 * (param_bytes + io_bytes + act_bytes)) + (8 << 20)
    vmem_limit = min(max(vmem_limit, 16 << 20), 48 << 20)

    # Advisory cost estimate for XLA scheduling around the custom call.
    flops = 2 * B * (2 * PAD_IN * HIDDEN[0] + HIDDEN[0] * HIDDEN[1]
                     + HIDDEN[1] * HIDDEN[2] + HIDDEN[2] * HIDDEN[3]
                     + HIDDEN[3] * PAD_OUT)
    transcendentals = B * (sum(HIDDEN) + PAD_OUT)

    out_flat = pl.pallas_call(
        generator_kernel,
        out_shape=jax.ShapeDtypeStruct((B, PAD_OUT), jnp.float32),
        in_specs=[vmem_spec] * len(kernel_inputs),
        out_specs=vmem_spec,
        compiler_params=pltpu.CompilerParams(vmem_limit_bytes=vmem_limit),
        cost_estimate=pl.CostEstimate(
            flops=flops,
            transcendentals=transcendentals,
            bytes_accessed=param_bytes + io_bytes),
    )(*kernel_inputs)

    return out_flat[:, :IMG_SIZE].reshape(B, *IMG_SHAPE)


if __name__ == "__main__":
    key = jax.random.PRNGKey(0)
    k_params, k_noise, k_labels = jax.random.split(key, 3)

    B = 8  # small batch (>1 so training-mode BatchNorm statistics are defined)
    params = init_params(k_params)
    packed = pack_params(params)          # packed ONCE, reused every forward call
    noise = jax.random.normal(k_noise, (B, LATENT_DIM), jnp.float32)
    labels = jax.random.randint(k_labels, (B,), 0, NUM_CLASSES, jnp.int32)

    fwd = jax.jit(generator_forward)
    imgs = fwd(noise, labels, packed)
    jax.block_until_ready(imgs)

    assert imgs.shape == (B, 1, 28, 28)
    assert imgs.dtype == jnp.float32
    assert bool(jnp.all(jnp.isfinite(imgs)))
    assert bool(jnp.all(jnp.abs(imgs) <= 1.0))   # tanh output range
    print("KERNEL_OK")
</pallas_src>

<mosaic_0001>
module attributes {stable_mosaic.version = 11 : i64} {
  func.func @generator_kernel(%arg0: memref<8x128xf32, #tpu.memory_space<vmem>>, %arg1: memref<8x1xi32, #tpu.memory_space<vmem>>, %arg2: memref<128x128xbf16, #tpu.memory_space<vmem>>, %arg3: memref<128x128xbf16, #tpu.memory_space<vmem>>, %arg4: memref<1x128xf32, #tpu.memory_space<vmem>>, %arg5: memref<128x256xbf16, #tpu.memory_space<vmem>>, %arg6: memref<1x256xf32, #tpu.memory_space<vmem>>, %arg7: memref<1x256xf32, #tpu.memory_space<vmem>>, %arg8: memref<1x256xf32, #tpu.memory_space<vmem>>, %arg9: memref<256x512xbf16, #tpu.memory_space<vmem>>, %arg10: memref<1x512xf32, #tpu.memory_space<vmem>>, %arg11: memref<1x512xf32, #tpu.memory_space<vmem>>, %arg12: memref<1x512xf32, #tpu.memory_space<vmem>>, %arg13: memref<512x1024xbf16, #tpu.memory_space<vmem>>, %arg14: memref<1x1024xf32, #tpu.memory_space<vmem>>, %arg15: memref<1x1024xf32, #tpu.memory_space<vmem>>, %arg16: memref<1x1024xf32, #tpu.memory_space<vmem>>, %arg17: memref<1024x896xbf16, #tpu.memory_space<vmem>>, %arg18: memref<1x896xf32, #tpu.memory_space<vmem>>, %arg19: memref<8x896xf32, #tpu.memory_space<vmem>>) attributes {dimension_semantics = [], scalar_prefetch = 0 : i64, scratch_operands = 0 : i64, tpu.core_type = #tpu.core_type<tc>} {
    %c0 = arith.constant 0 : index
    %c0_0 = arith.constant 0 : index
    %0 = vector.load %arg0[%c0, %c0_0] : memref<8x128xf32, #tpu.memory_space<vmem>>, vector<8x128xf32>
    %1 = arith.truncf %0 : vector<8x128xf32> to vector<8x128xbf16>
    %c0_1 = arith.constant 0 : index
    %c0_2 = arith.constant 0 : index
    %2 = vector.load %arg1[%c0_1, %c0_2] : memref<8x1xi32, #tpu.memory_space<vmem>>, vector<8x1xi32>
    %3 = tpu.iota {dimensions = array<i32: 1>} : vector<8x128xi32>
    %4 = vector.broadcast %2 : vector<8x1xi32> to vector<8x128xi32>
    %5 = arith.cmpi eq, %3, %4 : vector<8x128xi32>
    %cst = arith.constant 1.000000e+00 : f32
    %cst_3 = arith.constant 0.000000e+00 : f32
    %6 = vector.broadcast %cst : f32 to vector<8x128xf32>
    %7 = vector.broadcast %cst_3 : f32 to vector<8x128xf32>
    %8 = arith.select %5, %6, %7 : vector<8x128xi1>, vector<8x128xf32>
    %9 = arith.truncf %8 : vector<8x128xf32> to vector<8x128xbf16>
    %c0_4 = arith.constant 0 : index
    %c0_5 = arith.constant 0 : index
    %10 = vector.load %arg2[%c0_4, %c0_5] : memref<128x128xbf16, #tpu.memory_space<vmem>>, vector<128x128xbf16>
    %cst_6 = arith.constant dense<0.000000e+00> : vector<8x128xf32>
    %11 = tpu.matmul %1, %10, %cst_6 {dimension_numbers = #tpu.dot_dimension_numbers<[1], [0], [0], [1], [0, 0, 1, 1], [], []>} : vector<8x128xbf16>, vector<128x128xbf16>, vector<8x128xf32> -> vector<8x128xf32>
    %c0_7 = arith.constant 0 : index
    %c0_8 = arith.constant 0 : index
    %12 = vector.load %arg3[%c0_7, %c0_8] : memref<128x128xbf16, #tpu.memory_space<vmem>>, vector<128x128xbf16>
    %cst_9 = arith.constant dense<0.000000e+00> : vector<8x128xf32>
    %13 = tpu.matmul %9, %12, %cst_9 {dimension_numbers = #tpu.dot_dimension_numbers<[1], [0], [0], [1], [0, 0, 1, 1], [], []>} : vector<8x128xbf16>, vector<128x128xbf16>, vector<8x128xf32> -> vector<8x128xf32>
    %14 = arith.addf %11, %13 : vector<8x128xf32>
    %c0_10 = arith.constant 0 : index
    %c0_11 = arith.constant 0 : index
    %15 = vector.load %arg4[%c0_10, %c0_11] : memref<1x128xf32, #tpu.memory_space<vmem>>, vector<1x128xf32>
    %16 = vector.broadcast %15 : vector<1x128xf32> to vector<8x128xf32>
    %17 = arith.addf %14, %16 : vector<8x128xf32>
    %cst_12 = arith.constant 5.000000e-01 : f32
    %18 = vector.broadcast %cst_12 : f32 to vector<8x128xf32>
    %19 = arith.mulf %18, %17 : vector<8x128xf32>
    %cst_13 = arith.constant 4.471500e-02 : f32
    %20 = vector.broadcast %cst_13 : f32 to vector<8x128xf32>
    %21 = arith.mulf %20, %17 : vector<8x128xf32>
    %22 = arith.mulf %21, %17 : vector<8x128xf32>
    %23 = arith.mulf %22, %17 : vector<8x128xf32>
    %24 = arith.addf %17, %23 : vector<8x128xf32>
    %cst_14 = arith.constant 0.797884583 : f32
    %25 = vector.broadcast %cst_14 : f32 to vector<8x128xf32>
    %26 = arith.mulf %25, %24 : vector<8x128xf32>
    %27 = math.tanh %26 : vector<8x128xf32>
    %cst_15 = arith.constant 1.000000e+00 : f32
    %28 = vector.broadcast %cst_15 : f32 to vector<8x128xf32>
    %29 = arith.addf %28, %27 : vector<8x128xf32>
    %30 = arith.mulf %19, %29 : vector<8x128xf32>
    %31 = arith.truncf %30 : vector<8x128xf32> to vector<8x128xbf16>
    %c0_16 = arith.constant 0 : index
    %c0_17 = arith.constant 0 : index
    %32 = vector.load %arg5[%c0_16, %c0_17] : memref<128x256xbf16, #tpu.memory_space<vmem>>, vector<128x256xbf16>
    %cst_18 = arith.constant dense<0.000000e+00> : vector<8x256xf32>
    %33 = tpu.matmul %31, %32, %cst_18 {dimension_numbers = #tpu.dot_dimension_numbers<[1], [0], [0], [1], [0, 0, 1, 1], [], []>} : vector<8x128xbf16>, vector<128x256xbf16>, vector<8x256xf32> -> vector<8x256xf32>
    %c0_19 = arith.constant 0 : index
    %c0_20 = arith.constant 0 : index
    %34 = vector.load %arg6[%c0_19, %c0_20] : memref<1x256xf32, #tpu.memory_space<vmem>>, vector<1x256xf32>
    %35 = vector.broadcast %34 : vector<1x256xf32> to vector<8x256xf32>
    %36 = arith.addf %33, %35 : vector<8x256xf32>
    %c0_21 = arith.constant 0 : index
    %c0_22 = arith.constant 0 : index
    %37 = vector.load %arg7[%c0_21, %c0_22] : memref<1x256xf32, #tpu.memory_space<vmem>>, vector<1x256xf32>
    %c0_23 = arith.constant 0 : index
    %c0_24 = arith.constant 0 : index
    %38 = vector.load %arg8[%c0_23, %c0_24] : memref<1x256xf32, #tpu.memory_space<vmem>>, vector<1x256xf32>
    %cst_25 = arith.constant dense<0.000000e+00> : vector<256xf32>
    %39 = vector.multi_reduction <add>, %36, %cst_25 [0] : vector<8x256xf32> to vector<256xf32>
    %40 = vector.shape_cast %39 : vector<256xf32> to vector<1x256xf32>
    %cst_26 = arith.constant 1.250000e-01 : f32
    %41 = vector.broadcast %cst_26 : f32 to vector<1x256xf32>
    %42 = arith.mulf %40, %41 : vector<1x256xf32>
    %43 = arith.mulf %36, %36 : vector<8x256xf32>
    %cst_27 = arith.constant dense<0.000000e+00> : vector<256xf32>
    %44 = vector.multi_reduction <add>, %43, %cst_27 [0] : vector<8x256xf32> to vector<256xf32>
    %45 = vector.shape_cast %44 : vector<256xf32> to vector<1x256xf32>
    %cst_28 = arith.constant 1.250000e-01 : f32
    %46 = vector.broadcast %cst_28 : f32 to vector<1x256xf32>
    %47 = arith.mulf %45, %46 : vector<1x256xf32>
    %48 = arith.mulf %42, %42 : vector<1x256xf32>
    %49 = arith.subf %47, %48 : vector<1x256xf32>
    %50 = vector.broadcast %42 : vector<1x256xf32> to vector<8x256xf32>
    %51 = arith.subf %36, %50 : vector<8x256xf32>
    %cst_29 = arith.constant 8.000000e-01 : f32
    %52 = vector.broadcast %cst_29 : f32 to vector<1x256xf32>
    %53 = arith.addf %49, %52 : vector<1x256xf32>
    %54 = math.rsqrt %53 : vector<1x256xf32>
    %55 = vector.broadcast %54 : vector<1x256xf32> to vector<8x256xf32>
    %56 = arith.mulf %51, %55 : vector<8x256xf32>
    %57 = vector.broadcast %37 : vector<1x256xf32> to vector<8x256xf32>
    %58 = arith.mulf %56, %57 : vector<8x256xf32>
    %59 = vector.broadcast %38 : vector<1x256xf32> to vector<8x256xf32>
    %60 = arith.addf %58, %59 : vector<8x256xf32>
    %cst_30 = arith.constant 5.000000e-01 : f32
    %61 = vector.broadcast %cst_30 : f32 to vector<8x256xf32>
    %62 = arith.mulf %61, %60 : vector<8x256xf32>
    %cst_31 = arith.constant 4.471500e-02 : f32
    %63 = vector.broadcast %cst_31 : f32 to vector<8x256xf32>
    %64 = arith.mulf %63, %60 : vector<8x256xf32>
    %65 = arith.mulf %64, %60 : vector<8x256xf32>
    %66 = arith.mulf %65, %60 : vector<8x256xf32>
    %67 = arith.addf %60, %66 : vector<8x256xf32>
    %cst_32 = arith.constant 0.797884583 : f32
    %68 = vector.broadcast %cst_32 : f32 to vector<8x256xf32>
    %69 = arith.mulf %68, %67 : vector<8x256xf32>
    %70 = math.tanh %69 : vector<8x256xf32>
    %cst_33 = arith.constant 1.000000e+00 : f32
    %71 = vector.broadcast %cst_33 : f32 to vector<8x256xf32>
    %72 = arith.addf %71, %70 : vector<8x256xf32>
    %73 = arith.mulf %62, %72 : vector<8x256xf32>
    %74 = arith.truncf %73 : vector<8x256xf32> to vector<8x256xbf16>
    %c0_34 = arith.constant 0 : index
    %c0_35 = arith.constant 0 : index
    %75 = vector.load %arg9[%c0_34, %c0_35] : memref<256x512xbf16, #tpu.memory_space<vmem>>, vector<256x512xbf16>
    %cst_36 = arith.constant dense<0.000000e+00> : vector<8x512xf32>
    %76 = tpu.matmul %74, %75, %cst_36 {dimension_numbers = #tpu.dot_dimension_numbers<[1], [0], [0], [1], [0, 0, 1, 1], [], []>} : vector<8x256xbf16>, vector<256x512xbf16>, vector<8x512xf32> -> vector<8x512xf32>
    %c0_37 = arith.constant 0 : index
    %c0_38 = arith.constant 0 : index
    %77 = vector.load %arg10[%c0_37, %c0_38] : memref<1x512xf32, #tpu.memory_space<vmem>>, vector<1x512xf32>
    %78 = vector.broadcast %77 : vector<1x512xf32> to vector<8x512xf32>
    %79 = arith.addf %76, %78 : vector<8x512xf32>
    %c0_39 = arith.constant 0 : index
    %c0_40 = arith.constant 0 : index
    %80 = vector.load %arg11[%c0_39, %c0_40] : memref<1x512xf32, #tpu.memory_space<vmem>>, vector<1x512xf32>
    %c0_41 = arith.constant 0 : index
    %c0_42 = arith.constant 0 : index
    %81 = vector.load %arg12[%c0_41, %c0_42] : memref<1x512xf32, #tpu.memory_space<vmem>>, vector<1x512xf32>
    %cst_43 = arith.constant dense<0.000000e+00> : vector<512xf32>
    %82 = vector.multi_reduction <add>, %79, %cst_43 [0] : vector<8x512xf32> to vector<512xf32>
    %83 = vector.shape_cast %82 : vector<512xf32> to vector<1x512xf32>
    %cst_44 = arith.constant 1.250000e-01 : f32
    %84 = vector.broadcast %cst_44 : f32 to vector<1x512xf32>
    %85 = arith.mulf %83, %84 : vector<1x512xf32>
    %86 = arith.mulf %79, %79 : vector<8x512xf32>
    %cst_45 = arith.constant dense<0.000000e+00> : vector<512xf32>
    %87 = vector.multi_reduction <add>, %86, %cst_45 [0] : vector<8x512xf32> to vector<512xf32>
    %88 = vector.shape_cast %87 : vector<512xf32> to vector<1x512xf32>
    %cst_46 = arith.constant 1.250000e-01 : f32
    %89 = vector.broadcast %cst_46 : f32 to vector<1x512xf32>
    %90 = arith.mulf %88, %89 : vector<1x512xf32>
    %91 = arith.mulf %85, %85 : vector<1x512xf32>
    %92 = arith.subf %90, %91 : vector<1x512xf32>
    %93 = vector.broadcast %85 : vector<1x512xf32> to vector<8x512xf32>
    %94 = arith.subf %79, %93 : vector<8x512xf32>
    %cst_47 = arith.constant 8.000000e-01 : f32
    %95 = vector.broadcast %cst_47 : f32 to vector<1x512xf32>
    %96 = arith.addf %92, %95 : vector<1x512xf32>
    %97 = math.rsqrt %96 : vector<1x512xf32>
    %98 = vector.broadcast %97 : vector<1x512xf32> to vector<8x512xf32>
    %99 = arith.mulf %94, %98 : vector<8x512xf32>
    %100 = vector.broadcast %80 : vector<1x512xf32> to vector<8x512xf32>
    %101 = arith.mulf %99, %100 : vector<8x512xf32>
    %102 = vector.broadcast %81 : vector<1x512xf32> to vector<8x512xf32>
    %103 = arith.addf %101, %102 : vector<8x512xf32>
    %cst_48 = arith.constant 5.000000e-01 : f32
    %104 = vector.broadcast %cst_48 : f32 to vector<8x512xf32>
    %105 = arith.mulf %104, %103 : vector<8x512xf32>
    %cst_49 = arith.constant 4.471500e-02 : f32
    %106 = vector.broadcast %cst_49 : f32 to vector<8x512xf32>
    %107 = arith.mulf %106, %103 : vector<8x512xf32>
    %108 = arith.mulf %107, %103 : vector<8x512xf32>
    %109 = arith.mulf %108, %103 : vector<8x512xf32>
    %110 = arith.addf %103, %109 : vector<8x512xf32>
    %cst_50 = arith.constant 0.797884583 : f32
    %111 = vector.broadcast %cst_50 : f32 to vector<8x512xf32>
    %112 = arith.mulf %111, %110 : vector<8x512xf32>
    %113 = math.tanh %112 : vector<8x512xf32>
    %cst_51 = arith.constant 1.000000e+00 : f32
    %114 = vector.broadcast %cst_51 : f32 to vector<8x512xf32>
    %115 = arith.addf %114, %113 : vector<8x512xf32>
    %116 = arith.mulf %105, %115 : vector<8x512xf32>
    %117 = arith.truncf %116 : vector<8x512xf32> to vector<8x512xbf16>
    %c0_52 = arith.constant 0 : index
    %c0_53 = arith.constant 0 : index
    %118 = vector.load %arg13[%c0_52, %c0_53] : memref<512x1024xbf16, #tpu.memory_space<vmem>>, vector<512x1024xbf16>
    %cst_54 = arith.constant dense<0.000000e+00> : vector<8x1024xf32>
    %119 = tpu.matmul %117, %118, %cst_54 {dimension_numbers = #tpu.dot_dimension_numbers<[1], [0], [0], [1], [0, 0, 1, 1], [], []>} : vector<8x512xbf16>, vector<512x1024xbf16>, vector<8x1024xf32> -> vector<8x1024xf32>
    %c0_55 = arith.constant 0 : index
    %c0_56 = arith.constant 0 : index
    %120 = vector.load %arg14[%c0_55, %c0_56] : memref<1x1024xf32, #tpu.memory_space<vmem>>, vector<1x1024xf32>
    %121 = vector.broadcast %120 : vector<1x1024xf32> to vector<8x1024xf32>
    %122 = arith.addf %119, %121 : vector<8x1024xf32>
    %c0_57 = arith.constant 0 : index
    %c0_58 = arith.constant 0 : index
    %123 = vector.load %arg15[%c0_57, %c0_58] : memref<1x1024xf32, #tpu.memory_space<vmem>>, vector<1x1024xf32>
    %c0_59 = arith.constant 0 : index
    %c0_60 = arith.constant 0 : index
    %124 = vector.load %arg16[%c0_59, %c0_60] : memref<1x1024xf32, #tpu.memory_space<vmem>>, vector<1x1024xf32>
    %cst_61 = arith.constant dense<0.000000e+00> : vector<1024xf32>
    %125 = vector.multi_reduction <add>, %122, %cst_61 [0] : vector<8x1024xf32> to vector<1024xf32>
    %126 = vector.shape_cast %125 : vector<1024xf32> to vector<1x1024xf32>
    %cst_62 = arith.constant 1.250000e-01 : f32
    %127 = vector.broadcast %cst_62 : f32 to vector<1x1024xf32>
    %128 = arith.mulf %126, %127 : vector<1x1024xf32>
    %129 = arith.mulf %122, %122 : vector<8x1024xf32>
    %cst_63 = arith.constant dense<0.000000e+00> : vector<1024xf32>
    %130 = vector.multi_reduction <add>, %129, %cst_63 [0] : vector<8x1024xf32> to vector<1024xf32>
    %131 = vector.shape_cast %130 : vector<1024xf32> to vector<1x1024xf32>
    %cst_64 = arith.constant 1.250000e-01 : f32
    %132 = vector.broadcast %cst_64 : f32 to vector<1x1024xf32>
    %133 = arith.mulf %131, %132 : vector<1x1024xf32>
    %134 = arith.mulf %128, %128 : vector<1x1024xf32>
    %135 = arith.subf %133, %134 : vector<1x1024xf32>
    %136 = vector.broadcast %128 : vector<1x1024xf32> to vector<8x1024xf32>
    %137 = arith.subf %122, %136 : vector<8x1024xf32>
    %cst_65 = arith.constant 8.000000e-01 : f32
    %138 = vector.broadcast %cst_65 : f32 to vector<1x1024xf32>
    %139 = arith.addf %135, %138 : vector<1x1024xf32>
    %140 = math.rsqrt %139 : vector<1x1024xf32>
    %141 = vector.broadcast %140 : vector<1x1024xf32> to vector<8x1024xf32>
    %142 = arith.mulf %137, %141 : vector<8x1024xf32>
    %143 = vector.broadcast %123 : vector<1x1024xf32> to vector<8x1024xf32>
    %144 = arith.mulf %142, %143 : vector<8x1024xf32>
    %145 = vector.broadcast %124 : vector<1x1024xf32> to vector<8x1024xf32>
    %146 = arith.addf %144, %145 : vector<8x1024xf32>
    %cst_66 = arith.constant 5.000000e-01 : f32
    %147 = vector.broadcast %cst_66 : f32 to vector<8x1024xf32>
    %148 = arith.mulf %147, %146 : vector<8x1024xf32>
    %cst_67 = arith.constant 4.471500e-02 : f32
    %149 = vector.broadcast %cst_67 : f32 to vector<8x1024xf32>
    %150 = arith.mulf %149, %146 : vector<8x1024xf32>
    %151 = arith.mulf %150, %146 : vector<8x1024xf32>
    %152 = arith.mulf %151, %146 : vector<8x1024xf32>
    %153 = arith.addf %146, %152 : vector<8x1024xf32>
    %cst_68 = arith.constant 0.797884583 : f32
    %154 = vector.broadcast %cst_68 : f32 to vector<8x1024xf32>
    %155 = arith.mulf %154, %153 : vector<8x1024xf32>
    %156 = math.tanh %155 : vector<8x1024xf32>
    %cst_69 = arith.constant 1.000000e+00 : f32
    %157 = vector.broadcast %cst_69 : f32 to vector<8x1024xf32>
    %158 = arith.addf %157, %156 : vector<8x1024xf32>
    %159 = arith.mulf %148, %158 : vector<8x1024xf32>
    %160 = arith.truncf %159 : vector<8x1024xf32> to vector<8x1024xbf16>
    %c0_70 = arith.constant 0 : index
    %c0_71 = arith.constant 0 : index
    %161 = vector.load %arg17[%c0_70, %c0_71] : memref<1024x896xbf16, #tpu.memory_space<vmem>>, vector<1024x896xbf16>
    %cst_72 = arith.constant dense<0.000000e+00> : vector<8x896xf32>
    %162 = tpu.matmul %160, %161, %cst_72 {dimension_numbers = #tpu.dot_dimension_numbers<[1], [0], [0], [1], [0, 0, 1, 1], [], []>} : vector<8x1024xbf16>, vector<1024x896xbf16>, vector<8x896xf32> -> vector<8x896xf32>
    %c0_73 = arith.constant 0 : index
    %c0_74 = arith.constant 0 : index
    %163 = vector.load %arg18[%c0_73, %c0_74] : memref<1x896xf32, #tpu.memory_space<vmem>>, vector<1x896xf32>
    %164 = vector.broadcast %163 : vector<1x896xf32> to vector<8x896xf32>
    %165 = arith.addf %162, %164 : vector<8x896xf32>
    %166 = math.tanh %165 : vector<8x896xf32>
    %c0_75 = arith.constant 0 : index
    %c0_76 = arith.constant 0 : index
    %167 = vector.load %arg19[%c0_75, %c0_76] : memref<8x896xf32, #tpu.memory_space<vmem>>, vector<8x896xf32>
    tpu.vector_store %arg19[%c0_75, %c0_76], %166 {strides = array<i32>} : memref<8x896xf32, #tpu.memory_space<vmem>>, vector<8x896xf32>,
    return
  }
}

</mosaic_0001>

<bundles_post_ra>
// kernel: generator_forward.1
= control target key start
LH: loop header
LB: loop body
LE: loop exit
PB: predicated region body
PF: predicated region fallthrough
CT: control target
= control target key end

     0   :  { %s10246_s0 = inlined_call_operand.vmem [shape: f32[8,128], index: 0, kind: input, shape index: {}]   ;;  %s10247_s1 = inlined_call_operand.vmem [shape: s32[8,1], index: 1, kind: input, shape index: {}]   ;;  %s10248_s2 = inlined_call_operand.hbm [shape: bf16[128,128], index: 2, kind: input, shape index: {}]   ;;  %s10249_s3 = inlined_call_operand.hbm [shape: bf16[128,128], index: 3, kind: input, shape index: {}]   ;;  %s10250_s4 = inlined_call_operand.hbm [shape: f32[1,128], index: 4, kind: input, shape index: {}]   ;;  %s10251_s5 = inlined_call_operand.hbm [shape: bf16[128,256], index: 5, kind: input, shape index: {}]   ;;  %s10252_s6 = inlined_call_operand.hbm [shape: f32[1,256], index: 6, kind: input, shape index: {}]   ;;  %s10253_s7 = inlined_call_operand.hbm [shape: f32[1,256], index: 7, kind: input, shape index: {}]   ;;  %s10254_s8 = inlined_call_operand.hbm [shape: f32[1,256], index: 8, kind: input, shape index: {}]   ;;  %s10255_s9 = inlined_call_operand.hbm [shape: bf16[256,512], index: 9, kind: input, shape index: {}]   ;;  %s10256_s10 = inlined_call_operand.hbm [shape: f32[1,512], index: 10, kind: input, shape index: {}]   ;;  %s10257_s11 = inlined_call_operand.hbm [shape: f32[1,512], index: 11, kind: input, shape index: {}]   ;;  %s10258_s12 = inlined_call_operand.hbm [shape: f32[1,512], index: 12, kind: input, shape index: {}]   ;;  %s10259_s13 = inlined_call_operand.hbm [shape: bf16[512,1024], index: 13, kind: input, shape index: {}]   ;;  %s10260_s14 = inlined_call_operand.hbm [shape: f32[1,1024], index: 14, kind: input, shape index: {}]   ;;  %s10261_s15 = inlined_call_operand.hbm [shape: f32[1,1024], index: 15, kind: input, shape index: {}]   ;;  %s10262_s16 = inlined_call_operand.hbm [shape: f32[1,1024], index: 16, kind: input, shape index: {}]   ;;  %s10263_s17 = inlined_call_operand.hbm [shape: bf16[1024,896], index: 17, kind: input, shape index: {}]   ;;  %s10264_s18 = inlined_call_operand.hbm [shape: f32[1,896], index: 18, kind: input, shape index: {}]   ;;  %s10265_s19 = inlined_call_operand.vmem [shape: f32[8,896], index: 19, kind: output, shape index: {}]  }
   0x1   :  { %10271 = sst [smem:[#allocation37_spill]] %s10246_s0 }
   0x2   :  { %10272 = sst [smem:[#allocation38_spill]] %s10247_s1 }
   0x3   :  { %10273 = sst [smem:[#allocation39_spill]] %s10248_s2 }
   0x4   :  { %10274 = sst [smem:[#allocation40_spill]] %s10249_s3 }
   0x5   :  { %10275 = sst [smem:[#allocation41_spill]] %s10265_s19 }
   0x6   :  { %24 = vsyncpa [#allocation3], 0 }
   0x7   :  { %25 = vsyncpa [#allocation5], 0 }
   0x8   :  { %26 = vsyncpa [#allocation8], 0 }
   0x9   :  { %27 = vsyncpa [#allocation11], 0 }
   0xa   :  { %28 = vsyncpa [#allocation14], 0 }
   0xb   :  { %29 = vsyncpa [#allocation17], 0 }
   0xc   :  { %30 = vsyncpa [#allocation20], 0 }
   0xd   :  { %31 = vsyncpa [#allocation23], 0 }
   0xe   :  { %32 = vsyncpa [#allocation26], 0  ;;  %s9486_s0 = smov [#allocation4]   ;;  %s9487_s20 = smov [#allocation7]  }
   0xf   :  { %s54_s30 = sshll.u32 %s9486_s0, 4  ;;  %s76_s21 = sshll.u32 %s9487_s20, 4  ;;  %s55_s30 = int_to_ptr.vmem [resolvable:$true] %s54_s30  ;;  %s9617_s21 = int_to_ptr.vmem [resolvable:$true] %s76_s21 }
  0x10   :  { %s10276_s2 = sld [smem:[#allocation40_spill]] }
  0x16   :  { %s9094_s23 = scalar_lea.hbm %s10276_s2, 1024 }
  0x17   :  { %p9095_p0 = scmp.ne.s32.totalorder %s10276_s2, %s9094_s23  ;;  %p9098_p1 = scmp.lt.u32.totalorder %s9094_s23, %s10276_s2 }
  0x19   :  { %p9100_p2 = pnand %p9098_p1, %p9095_p0 }
  0x1b   :  { %9103 = shalt.err (!%p9100_p2)
}
  0x1c   :  { %s9104_s27 = scalar_lea.vmem %s55_s30, 1024  ;;  %p9109_p4 = scmp.lt.s32.totalorder %s55_s30, %s55_s30 }
  0x1d   :  { %p9105_p3 = scmp.ne.s32.totalorder %s55_s30, %s9104_s27  ;;  %p9110_p5 = scmp.lt.s32.totalorder %s9104_s27, %s9104_s27 }
  0x1f   :  { %p9111_p6 = por %p9110_p5, %p9109_p4 }
  0x21   :  { %p9112_p7 = pnand %p9111_p6, %p9105_p3 }
  0x23   :  { %9115 = shalt.err (!%p9112_p7)
}
  0x24   :  { %s10268_s28 = smov 64   ;;  %s10269_s29 = smov 4  }
  0x25   :  { %60 = dma.hbm_to_vmem [thread:$0]  %s10276_s2, 1024, %s55_s30, [#allocation5], %s10268_s28, %s10268_s28, %s10269_s29  }
  0x26   :  { %s9116_s23 = scalar_lea.hbm %s10251_s5, 2048 }
  0x27   :  { %p9117_p8 = scmp.ne.s32.totalorder %s10251_s5, %s9116_s23  ;;  %p9120_p9 = scmp.lt.u32.totalorder %s9116_s23, %s10251_s5 }
  0x29   :  { %p9122_p10 = pnand %p9120_p9, %p9117_p8 }
  0x2b   :  { %9125 = shalt.err (!%p9122_p10)
}
  0x2c   :  { %s9126_s27 = scalar_lea.vmem %s9617_s21, 2048  ;;  %p9131_p12 = scmp.lt.s32.totalorder %s9617_s21, %s9617_s21 }
  0x2d   :  { %p9127_p11 = scmp.ne.s32.totalorder %s9617_s21, %s9126_s27  ;;  %p9132_p13 = scmp.lt.s32.totalorder %s9126_s27, %s9126_s27 }
  0x2f   :  { %p9133_p0 = por %p9132_p13, %p9131_p12 }
  0x31   :  { %p9134_p1 = pnand %p9133_p0, %p9127_p11 }
  0x33   :  { %9137 = shalt.err (!%p9134_p1)
}
  0x34   :  { %s9490_s30 = smov 128   ;;  %s9491_s2 = smov 8  }
  0x35   :  { %82 = dma.hbm_to_vmem [thread:$0]  %s10251_s5, 2048, %s9617_s21, [#allocation8], %s9490_s30, %s9490_s30, %s9491_s2  }
  0x36   :  { %s9492_s1 = smov [#allocation10]   ;;  %s9493_s23 = smov [#allocation13]  }
  0x37   :  { %s99_s22 = sshll.u32 %s9492_s1, 4  ;;  %s118_s24 = sshll.u32 %s9493_s23, 4  ;;  %s100_s22 = int_to_ptr.vmem [resolvable:$true] %s99_s22  ;;  %s9651_s24 = int_to_ptr.vmem [resolvable:$true] %s118_s24 }
  0x38   :  { %s9138_s26 = scalar_lea.hbm %s10253_s7, 32 }
  0x39   :  { %p9139_p2 = scmp.ne.s32.totalorder %s10253_s7, %s9138_s26  ;;  %p9142_p3 = scmp.lt.u32.totalorder %s9138_s26, %s10253_s7 }
  0x3b   :  { %p9144_p4 = pnand %p9142_p3, %p9139_p2 }
  0x3d   :  { %9147 = shalt.err (!%p9144_p4)
}
  0x3e   :  { %s9148_s5 = scalar_lea.vmem %s100_s22, 32  ;;  %p9153_p6 = scmp.lt.s32.totalorder %s100_s22, %s100_s22 }
  0x3f   :  { %p9149_p5 = scmp.ne.s32.totalorder %s100_s22, %s9148_s5  ;;  %p9154_p7 = scmp.lt.s32.totalorder %s9148_s5, %s9148_s5 }
  0x41   :  { %p9155_p8 = por %p9154_p7, %p9153_p6 }
  0x43   :  { %p9156_p9 = pnand %p9155_p8, %p9149_p5 }
  0x45   :  { %9159 = shalt.err (!%p9156_p9)
}
  0x46   :  { %102 = dma.hbm_to_vmem [thread:$0]  %s10253_s7, 32, %s100_s22, [#allocation11]  }
  0x47   :  { %s9160_s0 = scalar_lea.hbm %s10255_s9, 8192 }
  0x48   :  { %p9161_p10 = scmp.ne.s32.totalorder %s10255_s9, %s9160_s0  ;;  %p9164_p11 = scmp.lt.u32.totalorder %s9160_s0, %s10255_s9 }
  0x4a   :  { %p9166_p12 = pnand %p9164_p11, %p9161_p10 }
  0x4c   :  { %9169 = shalt.err (!%p9166_p12)
}
  0x4d   :  { %s9170_s23 = scalar_lea.vmem %s9651_s24, 8192  ;;  %p9175_p0 = scmp.lt.s32.totalorder %s9651_s24, %s9651_s24 }
  0x4e   :  { %p9171_p13 = scmp.ne.s32.totalorder %s9651_s24, %s9170_s23  ;;  %p9176_p1 = scmp.lt.s32.totalorder %s9170_s23, %s9170_s23 }
  0x50   :  { %p9177_p2 = por %p9176_p1, %p9175_p0 }
  0x52   :  { %p9178_p3 = pnand %p9177_p2, %p9171_p13 }
  0x54   :  { %9181 = shalt.err (!%p9178_p3)
}
  0x55   :  { %s9494_s7 = smov 256   ;;  %s9495_s22 = smov 16  }
  0x56   :  { %124 = dma.hbm_to_vmem [thread:$0]  %s10255_s9, 8192, %s9651_s24, [#allocation14], %s9494_s7, %s9494_s7, %s9495_s22  }
  0x57   :  { %s9496_s26 = smov [#allocation16]   ;;  %s9497_s5 = smov [#allocation19]  }
  0x58   :  { %s141_s27 = sshll.u32 %s9496_s26, 4  ;;  %s160_s21 = sshll.u32 %s9497_s5, 4  ;;  %s142_s27 = int_to_ptr.vmem [resolvable:$true] %s141_s27  ;;  %s9682_s21 = int_to_ptr.vmem [resolvable:$true] %s160_s21 }
  0x59   :  { %s9182_s28 = scalar_lea.hbm %s10257_s11, 64 }
  0x5a   :  { %p9183_p4 = scmp.ne.s32.totalorder %s10257_s11, %s9182_s28  ;;  %p9186_p5 = scmp.lt.u32.totalorder %s9182_s28, %s10257_s11 }
  0x5c   :  { %p9188_p6 = pnand %p9186_p5, %p9183_p4 }
  0x5e   :  { %9191 = shalt.err (!%p9188_p6)
}
  0x5f   :  { %s9192_s9 = scalar_lea.vmem %s142_s27, 64  ;;  %p9197_p8 = scmp.lt.s32.totalorder %s142_s27, %s142_s27 }
  0x60   :  { %p9193_p7 = scmp.ne.s32.totalorder %s142_s27, %s9192_s9  ;;  %p9198_p9 = scmp.lt.s32.totalorder %s9192_s9, %s9192_s9 }
  0x62   :  { %p9199_p10 = por %p9198_p9, %p9197_p8 }
  0x64   :  { %p9200_p11 = pnand %p9199_p10, %p9193_p7 }
  0x66   :  { %9203 = shalt.err (!%p9200_p11)
}
  0x67   :  { %144 = dma.hbm_to_vmem [thread:$0]  %s10257_s11, 64, %s142_s27, [#allocation17]  }
  0x68   :  { %s9204_s22 = scalar_lea.hbm %s10259_s13, 32768 }
  0x69   :  { %p9205_p12 = scmp.ne.s32.totalorder %s10259_s13, %s9204_s22  ;;  %p9208_p13 = scmp.lt.u32.totalorder %s9204_s22, %s10259_s13 }
  0x6b   :  { %p9210_p0 = pnand %p9208_p13, %p9205_p12 }
  0x6d   :  { %9213 = shalt.err (!%p9210_p0)
}
  0x6e   :  { %s9214_s30 = scalar_lea.vmem %s9682_s21, 32768  ;;  %p9219_p2 = scmp.lt.s32.totalorder %s9682_s21, %s9682_s21 }
  0x6f   :  { %p9215_p1 = scmp.ne.s32.totalorder %s9682_s21, %s9214_s30  ;;  %p9220_p3 = scmp.lt.s32.totalorder %s9214_s30, %s9214_s30 }
  0x71   :  { %p9221_p4 = por %p9220_p3, %p9219_p2 }
  0x73   :  { %p9222_p5 = pnand %p9221_p4, %p9215_p1 }
  0x75   :  { %9225 = shalt.err (!%p9222_p5)
}
  0x76   :  { %s9498_s11 = smov 512   ;;  %s9499_s27 = smov 32  }
  0x77   :  { %166 = dma.hbm_to_vmem [thread:$0]  %s10259_s13, 32768, %s9682_s21, [#allocation20], %s9498_s11, %s9498_s11, %s9499_s27  }
  0x78   :  { %s9500_s0 = smov [#allocation22]   ;;  %s9501_s19 = smov [#allocation25]  }
  0x79   :  { %s183_s20 = sshll.u32 %s9500_s0, 4  ;;  %s202_s29 = sshll.u32 %s9501_s19, 4  ;;  %s184_s20 = int_to_ptr.vmem [resolvable:$true] %s183_s20  ;;  %s9713_s29 = int_to_ptr.vmem [resolvable:$true] %s202_s29 }
  0x7a   :  { %s9226_s1 = scalar_lea.hbm %s10261_s15, 128 }
  0x7b   :  { %p9227_p6 = scmp.ne.s32.totalorder %s10261_s15, %s9226_s1  ;;  %p9230_p7 = scmp.lt.u32.totalorder %s9226_s1, %s10261_s15 }
  0x7d   :  { %p9232_p8 = pnand %p9230_p7, %p9227_p6 }
  0x7f   :  { %9235 = shalt.err (!%p9232_p8)
}
  0x80   :  { %s9236_s13 = scalar_lea.vmem %s184_s20, 128  ;;  %p9241_p10 = scmp.lt.s32.totalorder %s184_s20, %s184_s20 }
  0x81   :  { %p9237_p9 = scmp.ne.s32.totalorder %s184_s20, %s9236_s13  ;;  %p9242_p11 = scmp.lt.s32.totalorder %s9236_s13, %s9236_s13 }
  0x83   :  { %p9243_p12 = por %p9242_p11, %p9241_p10 }
  0x85   :  { %p9244_p13 = pnand %p9243_p12, %p9237_p9 }
  0x87   :  { %9247 = shalt.err (!%p9244_p13)
}
  0x88   :  { %186 = dma.hbm_to_vmem [thread:$0]  %s10261_s15, 128, %s184_s20, [#allocation23]  }
  0x89   :  { %s9248_s30 = scalar_lea.hbm %s10263_s17, 57344 }
  0x8a   :  { %p9249_p0 = scmp.ne.s32.totalorder %s10263_s17, %s9248_s30  ;;  %p9252_p1 = scmp.lt.u32.totalorder %s9248_s30, %s10263_s17 }
  0x8c   :  { %p9254_p2 = pnand %p9252_p1, %p9249_p0 }
  0x8e   :  { %9257 = shalt.err (!%p9254_p2)
}
  0x8f   :  { %s9258_s0 = scalar_lea.vmem %s9713_s29, 57344  ;;  %p9263_p4 = scmp.lt.s32.totalorder %s9713_s29, %s9713_s29 }
  0x90   :  { %p9259_p3 = scmp.ne.s32.totalorder %s9713_s29, %s9258_s0  ;;  %p9264_p5 = scmp.lt.s32.totalorder %s9258_s0, %s9258_s0 }
  0x92   :  { %p9265_p6 = por %p9264_p5, %p9263_p4 }
  0x94   :  { %p9266_p7 = pnand %p9265_p6, %p9259_p3 }
  0x96   :  { %9269 = shalt.err (!%p9266_p7)
}
  0x97   :  { %s9502_s15 = smov 448   ;;  %s9503_s20 = smov 28  }
  0x98   :  { %208 = dma.hbm_to_vmem [thread:$0]  %s10263_s17, 57344, %s9713_s29, [#allocation26], %s9502_s15, %s9502_s15, %s9503_s20  }
  0x99   :  { %s9504_s24 = smov [#allocation2]   ;;  %s9505_s23 = smov [#allocation6]  }
  0x9a   :  { %s42_s1 = sshll.u32 %s9504_s24, 4  ;;  %s67_s7 = sshll.u32 %s9505_s23, 4  ;;  %s43_s1 = int_to_ptr.vmem [resolvable:$true] %s42_s1  ;;  %s68_s7 = int_to_ptr.vmem [resolvable:$true] %s67_s7 }
  0x9b   :  { %s10277_s13 = sld [smem:[#allocation39_spill]] }
  0xa1   :  { %s9270_s21 = scalar_lea.hbm %s10277_s13, 1024 }
  0xa2   :  { %p9271_p8 = scmp.ne.s32.totalorder %s10277_s13, %s9270_s21  ;;  %p9274_p9 = scmp.lt.u32.totalorder %s9270_s21, %s10277_s13 }
  0xa4   :  { %p9276_p10 = pnand %p9274_p9, %p9271_p8 }
  0xa6   :  { %9279 = shalt.err (!%p9276_p10)
}
  0xa7   :  { %s9280_s17 = scalar_lea.vmem %s43_s1, 1024  ;;  %p9285_p12 = scmp.lt.s32.totalorder %s43_s1, %s43_s1 }
  0xa8   :  { %p9281_p11 = scmp.ne.s32.totalorder %s43_s1, %s9280_s17  ;;  %p9286_p13 = scmp.lt.s32.totalorder %s9280_s17, %s9280_s17 }
  0xaa   :  { %p9287_p0 = por %p9286_p13, %p9285_p12 }
  0xac   :  { %p9288_p1 = pnand %p9287_p0, %p9281_p11 }
  0xae   :  { %9291 = shalt.err (!%p9288_p1)
}
  0xaf   :  { %s10278_s29 = smov 4   ;;  %s10279_s11 = smov 64  }
  0xb0   :  { %48 = dma.hbm_to_vmem [thread:$0]  %s10277_s13, 1024, %s43_s1, [#allocation3], %s10279_s11, %s10279_s11, %s10278_s29  }
  0xb1   :  { %s9292_s15 = scalar_lea.hbm %s10250_s4, 16 }
  0xb2   :  { %p9293_p2 = scmp.ne.s32.totalorder %s10250_s4, %s9292_s15  ;;  %p9296_p3 = scmp.lt.u32.totalorder %s9292_s15, %s10250_s4 }
  0xb4   :  { %p9298_p4 = pnand %p9296_p3, %p9293_p2 }
  0xb6   :  { %9301 = shalt.err (!%p9298_p4)
}
  0xb7   :  { %s9302_s23 = scalar_lea.vmem %s68_s7, 16  ;;  %s9306_s22 = scalar_lea.vmem %s68_s7, 32 }
  0xb8   :  { %p9303_p5 = scmp.ne.s32.totalorder %s68_s7, %s9302_s23  ;;  %p9307_p6 = scmp.lt.s32.totalorder %s68_s7, %s68_s7 }
  0xb9   :  { %p9308_p7 = scmp.lt.s32.totalorder %s9306_s22, %s9302_s23 }
  0xbb   :  { %p9309_p8 = por %p9308_p7, %p9307_p6 }
  0xbd   :  { %p9310_p9 = pnand %p9309_p8, %p9303_p5 }
  0xbf   :  { %9313 = shalt.err (!%p9310_p9)
}
  0xc0   :  { %70 = dma.hbm_to_vmem [thread:$0]  %s10250_s4, 16, %s68_s7, [#allocation5]  }
  0xc1   :  { %s9506_s13 = smov [#allocation9]   ;;  %s9507_s3 = smov [#allocation12]  }
  0xc2   :  { %s89_s21 = sshll.u32 %s9506_s13, 4  ;;  %s109_s26 = sshll.u32 %s9507_s3, 4  ;;  %s90_s21 = int_to_ptr.vmem [resolvable:$true] %s89_s21  ;;  %s110_s26 = int_to_ptr.vmem [resolvable:$true] %s109_s26 }
  0xc3   :  { %s9314_s17 = scalar_lea.hbm %s10252_s6, 32 }
  0xc4   :  { %p9315_p10 = scmp.ne.s32.totalorder %s10252_s6, %s9314_s17  ;;  %p9318_p11 = scmp.lt.u32.totalorder %s9314_s17, %s10252_s6 }
  0xc6   :  { %p9320_p12 = pnand %p9318_p11, %p9315_p10 }
  0xc8   :  { %9323 = shalt.err (!%p9320_p12)
}
  0xc9   :  { %s9324_s4 = scalar_lea.vmem %s90_s21, 32  ;;  %p9329_p0 = scmp.lt.s32.totalorder %s90_s21, %s90_s21 }
  0xca   :  { %p9325_p13 = scmp.ne.s32.totalorder %s90_s21, %s9324_s4  ;;  %p9330_p1 = scmp.lt.s32.totalorder %s9324_s4, %s9324_s4 }
  0xcc   :  { %p9331_p2 = por %p9330_p1, %p9329_p0 }
  0xce   :  { %p9332_p3 = pnand %p9331_p2, %p9325_p13 }
  0xd0   :  { %9335 = shalt.err (!%p9332_p3)
}
  0xd1   :  { %92 = dma.hbm_to_vmem [thread:$0]  %s10252_s6, 32, %s90_s21, [#allocation8]  }
  0xd2   :  { %s9336_s20 = scalar_lea.hbm %s10254_s8, 32 }
  0xd3   :  { %p9337_p4 = scmp.ne.s32.totalorder %s10254_s8, %s9336_s20  ;;  %p9340_p5 = scmp.lt.u32.totalorder %s9336_s20, %s10254_s8 }
  0xd5   :  { %p9342_p6 = pnand %p9340_p5, %p9337_p4 }
  0xd7   :  { %9345 = shalt.err (!%p9342_p6)
}
  0xd8   :  { %s9346_s22 = scalar_lea.vmem %s110_s26, 32  ;;  %p9351_p8 = scmp.lt.s32.totalorder %s110_s26, %s110_s26 }
  0xd9   :  { %p9347_p7 = scmp.ne.s32.totalorder %s110_s26, %s9346_s22  ;;  %p9352_p9 = scmp.lt.s32.totalorder %s9346_s22, %s9346_s22 }
  0xdb   :  { %p9353_p10 = por %p9352_p9, %p9351_p8 }
  0xdd   :  { %p9354_p11 = pnand %p9353_p10, %p9347_p7 }
  0xdf   :  { %9357 = shalt.err (!%p9354_p11)
}
  0xe0   :  { %112 = dma.hbm_to_vmem [thread:$0]  %s10254_s8, 32, %s110_s26, [#allocation11]  }
  0xe1   :  { %s9508_s25 = smov [#allocation15]   ;;  %s9509_s21 = smov [#allocation18]  }
  0xe2   :  { %s131_s13 = sshll.u32 %s9508_s25, 4  ;;  %s151_s3 = sshll.u32 %s9509_s21, 4  ;;  %s132_s13 = int_to_ptr.vmem [resolvable:$true] %s131_s13  ;;  %s152_s3 = int_to_ptr.vmem [resolvable:$true] %s151_s3 }
  0xe3   :  { %s9358_s17 = scalar_lea.hbm %s10256_s10, 64 }
  0xe4   :  { %p9359_p12 = scmp.ne.s32.totalorder %s10256_s10, %s9358_s17  ;;  %p9362_p13 = scmp.lt.u32.totalorder %s9358_s17, %s10256_s10 }
  0xe6   :  { %p9364_p0 = pnand %p9362_p13, %p9359_p12 }
  0xe8   :  { %9367 = shalt.err (!%p9364_p0)
}
  0xe9   :  { %s9368_s8 = scalar_lea.vmem %s132_s13, 64  ;;  %p9373_p2 = scmp.lt.s32.totalorder %s132_s13, %s132_s13 }
  0xea   :  { %p9369_p1 = scmp.ne.s32.totalorder %s132_s13, %s9368_s8  ;;  %p9374_p3 = scmp.lt.s32.totalorder %s9368_s8, %s9368_s8 }
  0xec   :  { %p9375_p4 = por %p9374_p3, %p9373_p2 }
  0xee   :  { %p9376_p5 = pnand %p9375_p4, %p9369_p1 }
  0xf0   :  { %9379 = shalt.err (!%p9376_p5)
}
  0xf1   :  { %134 = dma.hbm_to_vmem [thread:$0]  %s10256_s10, 64, %s132_s13, [#allocation14]  }
  0xf2   :  { %s9380_s0 = scalar_lea.hbm %s10258_s12, 64 }
  0xf3   :  { %p9381_p6 = scmp.ne.s32.totalorder %s10258_s12, %s9380_s0  ;;  %p9384_p7 = scmp.lt.u32.totalorder %s9380_s0, %s10258_s12 }
  0xf5   :  { %p9386_p8 = pnand %p9384_p7, %p9381_p6 }
  0xf7   :  { %9389 = shalt.err (!%p9386_p8)
}
  0xf8   :  { %s9390_s24 = scalar_lea.vmem %s152_s3, 64  ;;  %p9395_p10 = scmp.lt.s32.totalorder %s152_s3, %s152_s3 }
  0xf9   :  { %p9391_p9 = scmp.ne.s32.totalorder %s152_s3, %s9390_s24  ;;  %p9396_p11 = scmp.lt.s32.totalorder %s9390_s24, %s9390_s24 }
  0xfb   :  { %p9397_p12 = por %p9396_p11, %p9395_p10 }
  0xfd   :  { %p9398_p13 = pnand %p9397_p12, %p9391_p9 }
  0xff   :  { %9401 = shalt.err (!%p9398_p13)
}
 0x100   :  { %154 = dma.hbm_to_vmem [thread:$0]  %s10258_s12, 64, %s152_s3, [#allocation17]  }
 0x101   :  { %s9510_s22 = smov [#allocation21]   ;;  %s9511_s1 = smov [#allocation24]  }
 0x102   :  { %s173_s6 = sshll.u32 %s9510_s22, 4  ;;  %s193_s25 = sshll.u32 %s9511_s1, 4  ;;  %s174_s6 = int_to_ptr.vmem [resolvable:$true] %s173_s6  ;;  %s194_s25 = int_to_ptr.vmem [resolvable:$true] %s193_s25 }
 0x103   :  { %s9402_s5 = scalar_lea.hbm %s10260_s14, 128 }
 0x104   :  { %p9403_p0 = scmp.ne.s32.totalorder %s10260_s14, %s9402_s5  ;;  %p9406_p1 = scmp.lt.u32.totalorder %s9402_s5, %s10260_s14 }
 0x106   :  { %p9408_p2 = pnand %p9406_p1, %p9403_p0 }
 0x108   :  { %9411 = shalt.err (!%p9408_p2)
}
 0x109   :  { %s9412_s12 = scalar_lea.vmem %s174_s6, 128  ;;  %p9417_p4 = scmp.lt.s32.totalorder %s174_s6, %s174_s6 }
 0x10a   :  { %p9413_p3 = scmp.ne.s32.totalorder %s174_s6, %s9412_s12  ;;  %p9418_p5 = scmp.lt.s32.totalorder %s9412_s12, %s9412_s12 }
 0x10c   :  { %p9419_p6 = por %p9418_p5, %p9417_p4 }
 0x10e   :  { %p9420_p7 = pnand %p9419_p6, %p9413_p3 }
 0x110   :  { %9423 = shalt.err (!%p9420_p7)
}
 0x111   :  { %176 = dma.hbm_to_vmem [thread:$0]  %s10260_s14, 128, %s174_s6, [#allocation20]  }
 0x112   :  { %s9424_s26 = scalar_lea.hbm %s10262_s16, 128 }
 0x113   :  { %p9425_p8 = scmp.ne.s32.totalorder %s10262_s16, %s9424_s26  ;;  %p9428_p9 = scmp.lt.u32.totalorder %s9424_s26, %s10262_s16 }
 0x115   :  { %p9430_p10 = pnand %p9428_p9, %p9425_p8 }
 0x117   :  { %9433 = shalt.err (!%p9430_p10)
}
 0x118   :  { %s9434_s15 = scalar_lea.vmem %s194_s25, 128  ;;  %p9439_p12 = scmp.lt.s32.totalorder %s194_s25, %s194_s25 }
 0x119   :  { %p9435_p11 = scmp.ne.s32.totalorder %s194_s25, %s9434_s15  ;;  %p9440_p13 = scmp.lt.s32.totalorder %s9434_s15, %s9434_s15 }
 0x11b   :  { %p9441_p0 = por %p9440_p13, %p9439_p12 }
 0x11d   :  { %p9442_p1 = pnand %p9441_p0, %p9435_p11 }
 0x11f   :  { %9445 = shalt.err (!%p9442_p1)
}
 0x120   :  { %196 = dma.hbm_to_vmem [thread:$0]  %s10262_s16, 128, %s194_s25, [#allocation23]  }
 0x121   :  { %s9512_s19 = smov [#allocation27]   ;;  %s9446_s23 = scalar_lea.hbm %s10264_s18, 112 }
 0x122   :  { %s215_s9 = sshll.u32 %s9512_s19, 4  ;;  %p9447_p2 = scmp.ne.s32.totalorder %s10264_s18, %s9446_s23  ;;  %s216_s9 = int_to_ptr.vmem [resolvable:$true] %s215_s9 }
 0x123   :  { %p9450_p3 = scmp.lt.u32.totalorder %s9446_s23, %s10264_s18 }
 0x125   :  { %p9452_p4 = pnand %p9450_p3, %p9447_p2 }
 0x127   :  { %9455 = shalt.err (!%p9452_p4)
}
 0x128   :  { %s9456_s21 = scalar_lea.vmem %s216_s9, 112  ;;  %s9460_s16 = scalar_lea.vmem %s216_s9, 128 }
 0x129   :  { %p9457_p5 = scmp.ne.s32.totalorder %s216_s9, %s9456_s21  ;;  %p9461_p6 = scmp.lt.s32.totalorder %s216_s9, %s216_s9 }
 0x12a   :  { %p9462_p7 = scmp.lt.s32.totalorder %s9460_s16, %s9456_s21 }
 0x12c   :  { %p9463_p8 = por %p9462_p7, %p9461_p6 }
 0x12e   :  { %p9464_p9 = pnand %p9463_p8, %p9457_p5 }
 0x130   :  { %9467 = shalt.err (!%p9464_p9)
}
 0x131   :  { %218 = dma.hbm_to_vmem [thread:$0]  %s10264_s18, 112, %s216_s9, [#allocation26]  }
 0x132   :  { %9468 = dma.done.wait [#allocation3], 1024  }
 0x133   :  { %9469 = vsyncadd [#allocation3], 4294966272 }
 0x134   :  { %9470 = dma.done.wait [#allocation5], 1040  }
 0x135   :  { %9471 = vsyncadd [#allocation5], 4294966256 }
 0x136   :  { %9472 = dma.done.wait [#allocation8], 2080  }
 0x137   :  { %9473 = vsyncadd [#allocation8], 4294965216 }
 0x138   :  { %9474 = dma.done.wait [#allocation11], 64  }
 0x139   :  { %9475 = vsyncadd [#allocation11], 4294967232 }
 0x13a   :  { %9476 = dma.done.wait [#allocation14], 8256  }
 0x13b   :  { %9477 = vsyncadd [#allocation14], 4294959040 }
 0x13c   :  { %9478 = dma.done.wait [#allocation17], 128  }
 0x13d   :  { %9479 = vsyncadd [#allocation17], 4294967168 }
 0x13e   :  { %9480 = dma.done.wait [#allocation20], 32896  }
 0x13f   :  { %9481 = vsyncadd [#allocation20], 4294934400 }
 0x140   :  { %9482 = dma.done.wait [#allocation23], 256  }
 0x141   :  { %9483 = vsyncadd [#allocation23], 4294967040 }
 0x142   :  { %9484 = dma.done.wait [#allocation26], 57456  }
 0x143   :  { %9485 = vsyncadd [#allocation26], 4294909840  ;;  %v9513_v0 = vmov 0   ;;  %v9514_v1 = vmov 0.0   ;;  %s10280_s17 = sld [smem:[#allocation38_spill]]  ;;  %v8244_v3 = vld [vmem:[#allocation4] sm:$0xff]   ;;  %v274_v11 = vlaneseq }
 0x144   :  { %8243 = vset.pattern.permute.xlu0 %v9513_v0  ;;  %8106 = vmatprep.subr.bf16.mxu0 %v9514_v1  ;;  %vm9515_vm0 = vmmov 0   ;;  %v8245_v4 = vld [vmem:[#allocation4 + $0x8] sm:$0xff]   ;;  %v8246_v5 = vld [vmem:[#allocation4 + $0x10] sm:$0xff]   ;;  %v8247_v6 = vld [vmem:[#allocation4 + $0x18] sm:$0xff]   ;;  %v9516_v16 = vmov 1.0|1.0  }
 0x145   :  { %8122 = vmatprep.mubr.msk.bf16.mxu0 %vm9515_vm0, %v9514_v1  ;;  %8107 = vmatpush3.bf16.msra.mxu0 %v8244_v3  ;;  %v8248_v7 = vld [vmem:[#allocation4 + $0x20] sm:$0xff]   ;;  %v8249_v8 = vld [vmem:[#allocation4 + $0x28] sm:$0xff]   ;;  %v8250_v9 = vld [vmem:[#allocation4 + $0x30] sm:$0xff]   ;;  %v275_v12 = vand.u32 127, %v274_v11  ;;  %s10281_s12 = sld [smem:[#allocation37_spill]]  ;;  %s10282_s2 = sld [smem:[#allocation41_spill]] }
 0x146   :  { %8108 = vmatprep.subr.bf16.mxu0 %v9514_v1  ;;  %v8251_v10 = vld [vmem:[#allocation4 + $0x38] sm:$0xff]   ;;  %v8252_v13 = vld [vmem:[#allocation2] sm:$0xff]   ;;  %v8253_v15 = vld [vmem:[#allocation2 + $0x8] sm:$0xff]  }
 0x147   :  { %v8254_v17 = vld [vmem:[#allocation2 + $0x10] sm:$0xff]   ;;  %v8255_v18 = vld [vmem:[#allocation2 + $0x18] sm:$0xff]   ;;  %v8256_v19 = vld [vmem:[#allocation2 + $0x20] sm:$0xff]  }
 0x148   :  { %v8257_v20 = vld [vmem:[#allocation2 + $0x28] sm:$0xff]   ;;  %v8258_v21 = vld [vmem:[#allocation2 + $0x30] sm:$0xff]   ;;  %v8259_v22 = vld [vmem:[#allocation2 + $0x38] sm:$0xff]  }
 0x149   :  { %v273_v2 = vld [vmem:[%s10280_s17] sm:$0xff]  ;;  %8109 = vmatpush3.bf16.msra.mxu0 %v8245_v4  ;;  %v8263_v28 = vld [vmem:[#allocation7 + $0x10] ss:$8 sps:$4 sm:$0xff]  }
 0x14a   :  { %277 = vperm.xlu0 %8243, %v273_v2   ;;  %8110 = vmatprep.subr.bf16.mxu0 %v9514_v1  ;;  %v8262_v25 = vld [vmem:[#allocation7 + $0x4] ss:$8 sps:$4 sm:$0xff]   ;;  %v8260_v26 = vld [vmem:[#allocation7] ss:$8 sps:$4 sm:$0xff]   ;;  %v8265_v27 = vld [vmem:[#allocation7 + $0x14] ss:$8 sps:$4 sm:$0xff]  }
 0x14b   :  { %v271_v23 = vld [vmem:[%s10281_s12] sm:$0xff]  ;;  %v8269_v31 = vld [vmem:[#allocation7 + $0x30] ss:$8 sps:$4 sm:$0xff]  }
 0x14c   :  { %v272_v24 = vpack.c.bf16 %v271_v23, %v271_v23  ;;  %v8268_v29 = vld [vmem:[#allocation7 + $0x24] ss:$8 sps:$4 sm:$0xff]   ;;  %v8266_v30 = vld [vmem:[#allocation7 + $0x20] ss:$8 sps:$4 sm:$0xff]   ;;  %v8271_v32 = vld [vmem:[#allocation7 + $0x34] ss:$8 sps:$4 sm:$0xff]  }
 0x14d   :  { %8111 = vmatpush3.bf16.msra.mxu0 %v8246_v5  ;;  %v8274_v33 = vld [vmem:[#allocation7 + $0x44] ss:$8 sps:$4 sm:$0xff]   ;;  %v8272_v34 = vld [vmem:[#allocation7 + $0x40] ss:$8 sps:$4 sm:$0xff]   ;;  %v8277_v35 = vld [vmem:[#allocation7 + $0x54] ss:$8 sps:$4 sm:$0xff]  }
 0x14e   :  { %8112 = vmatprep.subr.bf16.mxu0 %v9514_v1  ;;  %v8275_v36 = vld [vmem:[#allocation7 + $0x50] ss:$8 sps:$4 sm:$0xff]   ;;  %v8280_v37 = vld [vmem:[#allocation7 + $0x64] ss:$8 sps:$4 sm:$0xff]   ;;  %v8278_v38 = vld [vmem:[#allocation7 + $0x60] ss:$8 sps:$4 sm:$0xff]  }
 0x14f   :  { %v8283_v39 = vld [vmem:[#allocation7 + $0x74] ss:$8 sps:$4 sm:$0xff]   ;;  %v8281_v40 = vld [vmem:[#allocation7 + $0x70] ss:$8 sps:$4 sm:$0xff]  }
 0x150   :  { %v7215_v46 = vld [vmem:[#allocation6] ss:$0 sm:$0xff]  ;;  %v8284_v62 = vld [vmem:[#allocation13 + $0x4] ss:$16 sps:$4 sm:$0xff]   ;;  %v8288_v63 = vld [vmem:[#allocation13 + $0xc] ss:$16 sps:$4 sm:$0xff]  }
 0x151   :  { %8113 = vmatpush3.bf16.msra.mxu0 %v8247_v6  ;;  %1153 = vmatprep.subr.bf16.mxu1 %v8284_v62  ;;  %v8290_v2 = vld [vmem:[#allocation13 + $0x24] ss:$16 sps:$4 sm:$0xff]   ;;  %v8294_v3 = vld [vmem:[#allocation13 + $0x2c] ss:$16 sps:$4 sm:$0xff]   ;;  %v8292_v4 = vld [vmem:[#allocation13 + $0x28] ss:$16 sps:$4 sm:$0xff]  }
 0x152   :  { %8114 = vmatprep.subr.bf16.mxu0 %v9514_v1  ;;  %v8295_v5 = vld [vmem:[#allocation13 + $0x20] ss:$16 sps:$4 sm:$0xff]   ;;  %v8296_v6 = vld [vmem:[#allocation13 + $0x44] ss:$16 sps:$4 sm:$0xff]  }
 0x153   :  { %v8320_v23 = vld [vmem:[#allocation13 + $0xc4] ss:$16 sps:$4 sm:$0xff]   ;;  %v8379_v62 = vld [vmem:[#allocation13 + $0x1e0] ss:$16 sps:$4 sm:$0xff]  }
 0x155   :  { %8115 = vmatpush3.bf16.msra.mxu0 %v8248_v7  ;;  %v8300_v7 = vld [vmem:[#allocation13 + $0x4c] ss:$16 sps:$4 sm:$0xff]  }
 0x156   :  { %8116 = vmatprep.subr.bf16.mxu0 %v9514_v1 }
 0x159   :  { %8117 = vmatpush3.bf16.msra.mxu0 %v8249_v8  ;;  %v8298_v8 = vld [vmem:[#allocation13 + $0x48] ss:$16 sps:$4 sm:$0xff]  }
 0x15a   :  { %8118 = vmatprep.subr.bf16.mxu0 %v9514_v1 }
 0x15d   :  { %8119 = vmatpush3.bf16.msra.mxu0 %v8250_v9  ;;  %v8301_v9 = vld [vmem:[#allocation13 + $0x40] ss:$16 sps:$4 sm:$0xff]  }
 0x15e   :  { %8120 = vmatprep.subr.bf16.mxu0 %v9514_v1 }
 0x161   :  { %8121 = vmatpush3.bf16.msra.mxu0 %v8251_v10  ;;  %v8302_v10 = vld [vmem:[#allocation13 + $0x64] ss:$16 sps:$4 sm:$0xff]  }
 0x162   :  { %8126 = vmatprep.subr.bf16.mxu0 %v9514_v1 }
 0x1c9   :  { %v278_v14 = vpop.permute.xlu0 %277 }
 0x1ca   :  { %vm279_vm1 = vcmp.eq.s32.totalorder %v275_v12, %v278_v14  ;;  %v8306_v12 = vld [vmem:[#allocation13 + $0x6c] ss:$16 sps:$4 sm:$0xff]   ;;  %v8307_v14 = vld [vmem:[#allocation13 + $0x60] ss:$16 sps:$4 sm:$0xff]  }
 0x1cb   :  { %vm7205_vm2 = vmpackc.low %vm279_vm1, %vm279_vm1 }
 0x1cc   :  { %8123 = vmatmul.mubr.msk.bf16.vlgmr.msra.gmra.mrb[0].mxu0 %vm7205_vm2, %v9516_v16  ;;  %v8312_v16 = vld [vmem:[#allocation13 + $0x8c] ss:$16 sps:$4 sm:$0xff]  }
 0x1cd   :  { %8127 = vmatpush3.bf16.msra.mxu0 %v8252_v13  ;;  %8142 = vmatprep.mubr.msk.bf16.mxu0 %vm9515_vm0, %v9514_v1  ;;  %v8304_v13 = vld [vmem:[#allocation13 + $0x68] ss:$16 sps:$4 sm:$0xff]  }
 0x1ce   :  { %8128 = vmatprep.subr.bf16.mxu0 %v9514_v1 }
 0x1d1   :  { %8129 = vmatpush3.bf16.msra.mxu0 %v8253_v15  ;;  %v8308_v15 = vld [vmem:[#allocation13 + $0x84] ss:$16 sps:$4 sm:$0xff]  }
 0x1d2   :  { %8130 = vmatprep.subr.bf16.mxu0 %v9514_v1 }
 0x1d5   :  { %8131 = vmatpush3.bf16.msra.mxu0 %v8254_v17  ;;  %v8310_v17 = vld [vmem:[#allocation13 + $0x88] ss:$16 sps:$4 sm:$0xff]  }
 0x1d6   :  { %8132 = vmatprep.subr.bf16.mxu0 %v9514_v1 }
 0x1d9   :  { %8133 = vmatpush3.bf16.msra.mxu0 %v8255_v18  ;;  %v8313_v18 = vld [vmem:[#allocation13 + $0x80] ss:$16 sps:$4 sm:$0xff]  }
 0x1da   :  { %8134 = vmatprep.subr.bf16.mxu0 %v9514_v1 }
 0x1dd   :  { %8135 = vmatpush3.bf16.msra.mxu0 %v8256_v19  ;;  %v8314_v19 = vld [vmem:[#allocation13 + $0xa4] ss:$16 sps:$4 sm:$0xff]  }
 0x1de   :  { %8136 = vmatprep.subr.bf16.mxu0 %v9514_v1 }
 0x1e1   :  { %8137 = vmatpush3.bf16.msra.mxu0 %v8257_v20  ;;  %v8318_v20 = vld [vmem:[#allocation13 + $0xac] ss:$16 sps:$4 sm:$0xff]  }
 0x1e2   :  { %8138 = vmatprep.subr.bf16.mxu0 %v9514_v1 }
 0x1e5   :  { %8139 = vmatpush3.bf16.msra.mxu0 %v8258_v21  ;;  %v8316_v21 = vld [vmem:[#allocation13 + $0xa8] ss:$16 sps:$4 sm:$0xff]  }
 0x1e6   :  { %8140 = vmatprep.subr.bf16.mxu0 %v9514_v1  ;;  %v8289_v1 = vld [vmem:[#allocation13] ss:$16 sps:$4 sm:$0xff]  }
 0x1e7   :  { %1154 = vmatpush1.bf16.msra.mxu1 %v8289_v1 }
 0x1e8   :  { %1155 = vmatprep.subr.bf16.mxu1 %v8290_v2  ;;  %v524_v2 = vld [vmem:[#allocation9] sm:$0x3] }
 0x1e9   :  { %8141 = vmatpush3.bf16.msra.mxu0 %v8259_v22  ;;  %v8319_v22 = vld [vmem:[#allocation13 + $0xa0] ss:$16 sps:$4 sm:$0xff]  }
 0x1ea   :  { %616 = vmatprep.subr.bf16.mxu0 %v8262_v25  ;;  %v8322_v25 = vld [vmem:[#allocation13 + $0xc8] ss:$16 sps:$4 sm:$0xff]  }
 0x1eb   :  { %1156 = vmatpush1.bf16.msra.mxu1 %v8295_v5 }
 0x1ec   :  { %8143 = vmatmul.mubr.bf16.vlgmr.msra.gmra.mrb[4].mxu0 %v272_v24  ;;  %1157 = vmatprep.subr.bf16.mxu1 %v8296_v6  ;;  %v8324_v24 = vld [vmem:[#allocation13 + $0xcc] ss:$16 sps:$4 sm:$0xff]  }
 0x1ed   :  { %648 = vmatprep.mubr.bf16.mxu0 %v9513_v0  ;;  %617 = vmatpush1.bf16.msra.mxu0 %v8260_v26  ;;  %v8286_v0 = vld [vmem:[#allocation13 + $0x8] ss:$16 sps:$4 sm:$0xff]   ;;  %v8325_v26 = vld [vmem:[#allocation13 + $0xc0] ss:$16 sps:$4 sm:$0xff]  }
 0x1ee   :  { %618 = vmatprep.subr.bf16.mxu0 %v8265_v27  ;;  %v8326_v27 = vld [vmem:[#allocation13 + $0xe4] ss:$16 sps:$4 sm:$0xff]  }
 0x1ef   :  { %1158 = vmatpush1.bf16.msra.mxu1 %v8301_v9 }
 0x1f0   :  { %1159 = vmatprep.subr.bf16.mxu1 %v8302_v10 }
 0x1f1   :  { %619 = vmatpush1.bf16.msra.mxu0 %v8263_v28  ;;  %v8330_v28 = vld [vmem:[#allocation13 + $0xec] ss:$16 sps:$4 sm:$0xff]  }
 0x1f2   :  { %620 = vmatprep.subr.bf16.mxu0 %v8268_v29  ;;  %v8328_v29 = vld [vmem:[#allocation13 + $0xe8] ss:$16 sps:$4 sm:$0xff]  }
 0x1f3   :  { %1160 = vmatpush1.bf16.msra.mxu1 %v8307_v14 }
 0x1f4   :  { %1161 = vmatprep.subr.bf16.mxu1 %v8308_v15 }
 0x1f5   :  { %621 = vmatpush1.bf16.msra.mxu0 %v8266_v30  ;;  %v8331_v30 = vld [vmem:[#allocation13 + $0xe0] ss:$16 sps:$4 sm:$0xff]  }
 0x1f6   :  { %622 = vmatprep.subr.bf16.mxu0 %v8271_v32  ;;  %v8336_v32 = vld [vmem:[#allocation13 + $0x10c] ss:$16 sps:$4 sm:$0xff]  }
 0x1f7   :  { %1162 = vmatpush1.bf16.msra.mxu1 %v8313_v18 }
 0x1f8   :  { %1163 = vmatprep.subr.bf16.mxu1 %v8314_v19 }
 0x1f9   :  { %623 = vmatpush1.bf16.msra.mxu0 %v8269_v31  ;;  %v8332_v31 = vld [vmem:[#allocation13 + $0x104] ss:$16 sps:$4 sm:$0xff]  }
 0x1fa   :  { %624 = vmatprep.subr.bf16.mxu0 %v8274_v33  ;;  %v8334_v33 = vld [vmem:[#allocation13 + $0x108] ss:$16 sps:$4 sm:$0xff]  }
 0x1fb   :  { %1164 = vmatpush1.bf16.msra.mxu1 %v8319_v22 }
 0x1fc   :  { %1165 = vmatprep.subr.bf16.mxu1 %v8320_v23 }
 0x1fd   :  { %625 = vmatpush1.bf16.msra.mxu0 %v8272_v34  ;;  %v8337_v34 = vld [vmem:[#allocation13 + $0x100] ss:$16 sps:$4 sm:$0xff]  }
 0x1fe   :  { %626 = vmatprep.subr.bf16.mxu0 %v8277_v35  ;;  %v8338_v35 = vld [vmem:[#allocation13 + $0x124] ss:$16 sps:$4 sm:$0xff]  }
 0x1ff   :  { %1166 = vmatpush1.bf16.msra.mxu1 %v8325_v26 }
 0x200   :  { %1167 = vmatprep.subr.bf16.mxu1 %v8326_v27 }
 0x201   :  { %627 = vmatpush1.bf16.msra.mxu0 %v8275_v36  ;;  %v8340_v36 = vld [vmem:[#allocation13 + $0x128] ss:$16 sps:$4 sm:$0xff]  }
 0x202   :  { %628 = vmatprep.subr.bf16.mxu0 %v8280_v37  ;;  %v8342_v37 = vld [vmem:[#allocation13 + $0x12c] ss:$16 sps:$4 sm:$0xff]  }
 0x203   :  { %1168 = vmatpush1.bf16.msra.mxu1 %v8331_v30 }
 0x204   :  { %1169 = vmatprep.subr.bf16.mxu1 %v8332_v31 }
 0x205   :  { %629 = vmatpush1.bf16.msra.mxu0 %v8278_v38  ;;  %v8343_v38 = vld [vmem:[#allocation13 + $0x120] ss:$16 sps:$4 sm:$0xff]  }
 0x206   :  { %630 = vmatprep.subr.bf16.mxu0 %v8283_v39  ;;  %v8344_v39 = vld [vmem:[#allocation13 + $0x144] ss:$16 sps:$4 sm:$0xff]  }
 0x207   :  { %1170 = vmatpush1.bf16.msra.mxu1 %v8337_v34 }
 0x208   :  { %1171 = vmatprep.subr.bf16.mxu1 %v8338_v35 }
 0x209   :  { %631 = vmatpush1.bf16.msra.mxu0 %v8281_v40  ;;  %v8348_v40 = vld [vmem:[#allocation13 + $0x14c] ss:$16 sps:$4 sm:$0xff]  }
 0x20a   :  { %1194 = vmatprep.subr.bf16.mxu0 %v8288_v63  ;;  %v9867_v63 = vshrl.u32 %v274_v11, 7 }
 0x20b   :  { %1172 = vmatpush1.bf16.msra.mxu1 %v8343_v38 }
 0x20c   :  { %1173 = vmatprep.subr.bf16.mxu1 %v8344_v39  ;;  %v9873_v1 = vsub.s32 1, %v9867_v63 }
 0x29f   :  { %v396_v41 = vpop.f32.mrb[0].mxu0 }
 0x2a0   :  { %v8124_v42 = vpop.f32.mrb[1].mxu0 }
 0x2a1   :  { %v399_v43 = vpop.f32.mrb[2].mxu0  ;;  %v8349_v42 = vld [vmem:[#allocation13 + $0x140] ss:$16 sps:$4 sm:$0xff]  }
 0x2a2   :  { %v8125_v44 = vpop.f32.mrb[3].mxu0  ;;  %v8350_v43 = vld [vmem:[#allocation13 + $0x164] ss:$16 sps:$4 sm:$0xff]   ;;  %1174 = vmatpush1.bf16.msra.mxu1 %v8349_v42 }
 0x2a3   :  { %v8354_v44 = vld [vmem:[#allocation13 + $0x16c] ss:$16 sps:$4 sm:$0xff]   ;;  %1175 = vmatprep.subr.bf16.mxu1 %v8350_v43 }
 0x2bf   :  { %v484_v45 = vpop.f32.mrb[4].mxu0 }
 0x2c0   :  { %v485_v47 = vadd.f32 %v484_v45, %v396_v41  ;;  %v8144_v48 = vpop.f32.mrb[5].mxu0  ;;  %v8346_v41 = vld [vmem:[#allocation13 + $0x148] ss:$16 sps:$4 sm:$0xff]  }
 0x2c1   :  { %v487_v49 = vpop.f32.mrb[6].mxu0  ;;  %v8352_v45 = vld [vmem:[#allocation13 + $0x168] ss:$16 sps:$4 sm:$0xff]   ;;  %v8360_v48 = vld [vmem:[#allocation13 + $0x18c] ss:$16 sps:$4 sm:$0xff]  }
 0x2c2   :  { %v497_v50 = vadd.f32 %v7215_v46, %v485_v47  ;;  %v8145_v51 = vpop.f32.mrb[7].mxu0  ;;  %v8355_v46 = vld [vmem:[#allocation13 + $0x160] ss:$16 sps:$4 sm:$0xff]   ;;  %v8356_v47 = vld [vmem:[#allocation13 + $0x184] ss:$16 sps:$4 sm:$0xff]  }
 0x2c3   :  { %1176 = vmatpush1.bf16.msra.mxu1 %v8355_v46  ;;  %v8358_v49 = vld [vmem:[#allocation13 + $0x188] ss:$16 sps:$4 sm:$0xff]   ;;  %v8362_v51 = vld [vmem:[#allocation13 + $0x1a4] ss:$16 sps:$4 sm:$0xff]  }
 0x2c4   :  { %v499_v52 = vmul.f32 0.044715, %v497_v50  ;;  %v498_v58 = vmul.f32 0.5, %v497_v50  ;;  %1177 = vmatprep.subr.bf16.mxu1 %v8356_v47  ;;  %v657_v47 = vld [vmem:[#allocation10] sm:$0x3] }
 0x2c6   :  { %v500_v53 = vmul.f32 %v499_v52, %v497_v50  ;;  %v8366_v52 = vld [vmem:[#allocation13 + $0x1ac] ss:$16 sps:$4 sm:$0xff]  }
 0x2c8   :  { %v501_v54 = vmul.f32 %v500_v53, %v497_v50  ;;  %v8364_v53 = vld [vmem:[#allocation13 + $0x1a8] ss:$16 sps:$4 sm:$0xff]  }
 0x2ca   :  { %v502_v55 = vadd.f32 %v501_v54, %v497_v50  ;;  %v8361_v50 = vld [vmem:[#allocation13 + $0x180] ss:$16 sps:$4 sm:$0xff]  }
 0x2cb   :  { %1178 = vmatpush1.bf16.msra.mxu1 %v8361_v50  ;;  %v8367_v54 = vld [vmem:[#allocation13 + $0x1a0] ss:$16 sps:$4 sm:$0xff]  }
 0x2cc   :  { %v503_v56 = vmul.f32 0.7978846, %v502_v55  ;;  %1179 = vmatprep.subr.bf16.mxu1 %v8362_v51  ;;  %v8368_v55 = vld [vmem:[#allocation13 + $0x1c4] ss:$16 sps:$4 sm:$0xff]  }
 0x2ce   :  { %9020 = vtanh.f32 %v503_v56  ;;  %v8372_v56 = vld [vmem:[#allocation13 + $0x1cc] ss:$16 sps:$4 sm:$0xff]  }
 0x2cf   :  { %1180 = vmatpush1.bf16.msra.mxu1 %v8367_v54 }
 0x2d0   :  { %1181 = vmatprep.subr.bf16.mxu1 %v8368_v55 }
 0x2d8   :  { %v9021_v57 = vpop.eup %9020 }
 0x2d9   :  { %v505_v59 = vadd.f32 1.0, %v9021_v57  ;;  %v8370_v57 = vld [vmem:[#allocation13 + $0x1c8] ss:$16 sps:$4 sm:$0xff]  }
 0x2db   :  { %v506_v60 = vmul.f32 %v505_v59, %v498_v58  ;;  %v8373_v58 = vld [vmem:[#allocation13 + $0x1c0] ss:$16 sps:$4 sm:$0xff]   ;;  %v8374_v59 = vld [vmem:[#allocation13 + $0x1e4] ss:$16 sps:$4 sm:$0xff]  }
 0x2dc   :  { %1182 = vmatpush1.bf16.msra.mxu1 %v8373_v58 }
 0x2dd   :  { %v507_v61 = vpack.c.bf16 %v506_v60, %v506_v60  ;;  %v8378_v60 = vld [vmem:[#allocation13 + $0x1ec] ss:$16 sps:$4 sm:$0xff]   ;;  %1183 = vmatprep.subr.bf16.mxu1 %v8374_v59 }
 0x2df   :  { %649 = vmatmul.mubr.bf16.vlgmr.msra.gmra.mrb[8].mxu0 %v507_v61  ;;  %v8376_v61 = vld [vmem:[#allocation13 + $0x1e8] ss:$16 sps:$4 sm:$0xff]  }
 0x2e0   :  { %1195 = vmatpush1.bf16.msra.mxu0 %v8286_v0  ;;  %1184 = vmatpush1.bf16.msra.mxu1 %v8379_v62  ;;  %v9870_v0 = vsub.s32 0, %v9867_v63 }
 0x2e1   :  { %1196 = vmatprep.subr.bf16.mxu0 %v8294_v3 }
 0x2e2   :  { %v529_v3 = vrot.slane %v524_v2, %v9870_v0  ;;  %v705_v50 = vrot.slane %v657_v47, %v9870_v0 }
 0x2e4   :  { %1197 = vmatpush1.bf16.msra.mxu0 %v8292_v4  ;;  %v533_v4 = vrot.slane %v524_v2, %v9873_v1 }
 0x2e5   :  { %1198 = vmatprep.subr.bf16.mxu0 %v8300_v7 }
 0x2e8   :  { %1199 = vmatpush1.bf16.msra.mxu0 %v8298_v8 }
 0x2e9   :  { %1200 = vmatprep.subr.bf16.mxu0 %v8306_v12 }
 0x2ec   :  { %1201 = vmatpush1.bf16.msra.mxu0 %v8304_v13 }
 0x2ed   :  { %1202 = vmatprep.subr.bf16.mxu0 %v8312_v16 }
 0x2f0   :  { %1203 = vmatpush1.bf16.msra.mxu0 %v8310_v17 }
 0x2f1   :  { %1204 = vmatprep.subr.bf16.mxu0 %v8318_v20 }
 0x2f4   :  { %1205 = vmatpush1.bf16.msra.mxu0 %v8316_v21 }
 0x2f5   :  { %1206 = vmatprep.subr.bf16.mxu0 %v8324_v24 }
 0x2f8   :  { %1207 = vmatpush1.bf16.msra.mxu0 %v8322_v25 }
 0x2f9   :  { %1208 = vmatprep.subr.bf16.mxu0 %v8330_v28 }
 0x2fc   :  { %1209 = vmatpush1.bf16.msra.mxu0 %v8328_v29 }
 0x2fd   :  { %1210 = vmatprep.subr.bf16.mxu0 %v8336_v32 }
 0x300   :  { %1211 = vmatpush1.bf16.msra.mxu0 %v8334_v33 }
 0x301   :  { %1212 = vmatprep.subr.bf16.mxu0 %v8342_v37 }
 0x304   :  { %1213 = vmatpush1.bf16.msra.mxu0 %v8340_v36 }
 0x305   :  { %1214 = vmatprep.subr.bf16.mxu0 %v8348_v40 }
 0x308   :  { %1215 = vmatpush1.bf16.msra.mxu0 %v8346_v41 }
 0x309   :  { %1216 = vmatprep.subr.bf16.mxu0 %v8354_v44 }
 0x30c   :  { %1217 = vmatpush1.bf16.msra.mxu0 %v8352_v45 }
 0x30d   :  { %1218 = vmatprep.subr.bf16.mxu0 %v8360_v48  ;;  %v658_v48 = vld [vmem:[#allocation12] sm:$0x3] }
 0x30e   :  { %v722_v58 = vrot.slane %v658_v48, %v9873_v1 }
 0x310   :  { %1219 = vmatpush1.bf16.msra.mxu0 %v8358_v49 }
 0x311   :  { %1220 = vmatprep.subr.bf16.mxu0 %v8366_v52 }
 0x314   :  { %1221 = vmatpush1.bf16.msra.mxu0 %v8364_v53  ;;  %v709_v53 = vrot.slane %v657_v47, %v9873_v1  ;;  %v1439_v47 = vld [vmem:[#allocation19 + $0xe0] sm:$0xff] }
 0x315   :  { %1222 = vmatprep.subr.bf16.mxu0 %v8372_v56  ;;  %v718_v56 = vrot.slane %v658_v48, %v9870_v0  ;;  %v1436_v48 = vld [vmem:[#allocation19 + $0xc8] sm:$0xff] }
 0x318   :  { %1223 = vmatpush1.bf16.msra.mxu0 %v8370_v57 }
 0x319   :  { %1224 = vmatprep.subr.bf16.mxu0 %v8378_v60 }
 0x31c   :  { %1225 = vmatpush1.bf16.msra.mxu0 %v8376_v61 }
 0x3b2   :  { %v650_v5 = vpop.f32.mrb[8].mxu0 }
 0x3b3   :  { %v651_v6 = vadd.f32 %v650_v5, %v529_v3  ;;  %v652_v7 = vpop.f32.mrb[9].mxu0 }
 0x3b4   :  { %v653_v8 = vadd.f32 %v652_v7, %v533_v4  ;;  %v654_v9 = vpop.f32.mrb[10].mxu0 }
 0x3b5   :  { %v659_v10 = vrot.slane %v651_v6, 4  ;;  %v673_v12 = vmul.f32 %v651_v6, %v651_v6  ;;  %v655_v11 = vpop.f32.mrb[11].mxu0 }
 0x3b6   :  { %v665_v13 = vrot.slane %v653_v8, 4  ;;  %v674_v14 = vmul.f32 %v653_v8, %v653_v8 }
 0x3b7   :  { %v660_v15 = vadd.f32 %v659_v10, %v651_v6  ;;  %v675_v16 = vrot.slane %v673_v12, 4 }
 0x3b8   :  { %v666_v17 = vadd.f32 %v665_v13, %v653_v8  ;;  %v681_v18 = vrot.slane %v674_v14, 4 }
 0x3b9   :  { %v661_v19 = vrot.slane %v660_v15, 2  ;;  %v676_v20 = vadd.f32 %v675_v16, %v673_v12 }
 0x3ba   :  { %v667_v21 = vrot.slane %v666_v17, 2  ;;  %v682_v22 = vadd.f32 %v681_v18, %v674_v14 }
 0x3bb   :  { %v662_v23 = vadd.f32 %v661_v19, %v660_v15  ;;  %v677_v24 = vrot.slane %v676_v20, 2 }
 0x3bc   :  { %v668_v25 = vadd.f32 %v667_v21, %v666_v17  ;;  %v683_v26 = vrot.slane %v682_v22, 2 }
 0x3bd   :  { %v663_v27 = vrot.slane %v662_v23, 1  ;;  %v678_v28 = vadd.f32 %v677_v24, %v676_v20  ;;  %v1412_v24 = vld [vmem:[#allocation19 + $0x8] sm:$0xff] }
 0x3be   :  { %v669_v29 = vrot.slane %v668_v25, 1  ;;  %v684_v30 = vadd.f32 %v683_v26, %v682_v22  ;;  %v1411_v22 = vld [vmem:[#allocation19] sm:$0xff]  ;;  %v1416_v26 = vld [vmem:[#allocation19 + $0x28] sm:$0xff] }
 0x3bf   :  { %v664_v31 = vadd.f32 %v663_v27, %v662_v23  ;;  %v679_v32 = vrot.slane %v678_v28, 1  ;;  %v1415_v23 = vld [vmem:[#allocation19 + $0x20] sm:$0xff] }
 0x3c0   :  { %v670_v33 = vadd.f32 %v669_v29, %v668_v25  ;;  %v685_v34 = vrot.slane %v684_v30, 1  ;;  %v7297_v25 = vcombine.high %v1411_v22, %v1415_v23  ;;  %v7296_v27 = vcombine.low %v1411_v22, %v1415_v23 }
 0x3c1   :  { %v671_v35 = vmul.f32 0.125, %v664_v31  ;;  %v680_v36 = vadd.f32 %v679_v32, %v678_v28  ;;  %v7298_v28 = vcombine.low %v1412_v24, %v1416_v26  ;;  %v7299_v29 = vcombine.high %v1412_v24, %v1416_v26  ;;  %v1423_v31 = vld [vmem:[#allocation19 + $0x60] sm:$0xff]  ;;  %v1420_v32 = vld [vmem:[#allocation19 + $0x48] sm:$0xff] }
 0x3c2   :  { %v672_v37 = vmul.f32 0.125, %v670_v33  ;;  %v686_v38 = vadd.f32 %v685_v34, %v684_v30  ;;  %2989 = vmatprep.subr.bf16.mxu1 %v7297_v25  ;;  %v1419_v30 = vld [vmem:[#allocation19 + $0x40] sm:$0xff]  ;;  %v1424_v34 = vld [vmem:[#allocation19 + $0x68] sm:$0xff] }
 0x3c3   :  { %v687_v39 = vmul.f32 0.125, %v680_v36  ;;  %v689_v40 = vmul.f32 %v671_v35, %v671_v35  ;;  %v693_v49 = vsub.f32 %v651_v6, %v671_v35  ;;  %3071 = vmatprep.subr.bf16.mxu0 %v7299_v29  ;;  %v7305_v33 = vcombine.high %v1419_v30, %v1423_v31  ;;  %v1475_v25 = vld [vmem:[#allocation19 + $0x200] sm:$0xff]  ;;  %v1480_v29 = vld [vmem:[#allocation19 + $0x228] sm:$0xff] }
 0x3c4   :  { %v688_v41 = vmul.f32 0.125, %v686_v38  ;;  %v690_v42 = vmul.f32 %v672_v37, %v672_v37  ;;  %v694_v52 = vsub.f32 %v653_v8, %v672_v37  ;;  %v7304_v35 = vcombine.low %v1419_v30, %v1423_v31  ;;  %v1427_v38 = vld [vmem:[#allocation19 + $0x80] sm:$0xff] }
 0x3c5   :  { %v691_v43 = vsub.f32 %v687_v39, %v689_v40  ;;  %v7306_v36 = vcombine.low %v1420_v32, %v1424_v34  ;;  %v7307_v37 = vcombine.high %v1420_v32, %v1424_v34  ;;  %v1431_v39 = vld [vmem:[#allocation19 + $0xa0] sm:$0xff]  ;;  %v1428_v40 = vld [vmem:[#allocation19 + $0x88] sm:$0xff] }
 0x3c6   :  { %v692_v44 = vsub.f32 %v688_v41, %v690_v42  ;;  %v7313_v41 = vcombine.high %v1427_v38, %v1431_v39  ;;  %v1432_v42 = vld [vmem:[#allocation19 + $0xa8] sm:$0xff]  ;;  %v1479_v26 = vld [vmem:[#allocation19 + $0x220] sm:$0xff] }
 0x3c7   :  { %v695_v45 = vadd.f32 0.8, %v691_v43  ;;  %v7312_v43 = vcombine.low %v1427_v38, %v1431_v39  ;;  %v7360_v30 = vcombine.low %v1475_v25, %v1479_v26  ;;  %v1487_v34 = vld [vmem:[#allocation19 + $0x260] sm:$0xff] }
 0x3c8   :  { %v696_v46 = vadd.f32 0.8, %v692_v44  ;;  %v7314_v44 = vcombine.low %v1428_v40, %v1432_v42 }
 0x3c9   :  { %9022 = vrsqrt.f32 %v695_v45  ;;  %v7315_v45 = vcombine.high %v1428_v40, %v1432_v42  ;;  %v1495_v42 = vld [vmem:[#allocation19 + $0x2a0] sm:$0xff] }
 0x3ca   :  { %9024 = vrsqrt.f32 %v696_v46  ;;  %v1435_v46 = vld [vmem:[#allocation19 + $0xc0] sm:$0xff] }
 0x3d3   :  { %v9023_v51 = vpop.eup %9022 }
 0x3d4   :  { %v9025_v54 = vpop.eup %9024  ;;  %v699_v55 = vmul.f32 %v9023_v51, %v693_v49  ;;  %v7321_v49 = vcombine.high %v1435_v46, %v1439_v47  ;;  %v7320_v51 = vcombine.low %v1435_v46, %v1439_v47  ;;  %v1499_v46 = vld [vmem:[#allocation19 + $0x2c0] sm:$0xff] }
 0x3d5   :  { %v700_v57 = vmul.f32 %v9025_v54, %v694_v52  ;;  %v1443_v54 = vld [vmem:[#allocation19 + $0x100] sm:$0xff] }
 0x3d6   :  { %v712_v59 = vmul.f32 %v705_v50, %v699_v55  ;;  %v1440_v50 = vld [vmem:[#allocation19 + $0xe8] sm:$0xff]  ;;  %v1447_v55 = vld [vmem:[#allocation19 + $0x120] sm:$0xff] }
 0x3d7   :  { %v713_v60 = vmul.f32 %v709_v53, %v700_v57  ;;  %v7322_v52 = vcombine.low %v1436_v48, %v1440_v50  ;;  %v7323_v53 = vcombine.high %v1436_v48, %v1440_v50  ;;  %v7329_v57 = vcombine.high %v1443_v54, %v1447_v55  ;;  %v1503_v47 = vld [vmem:[#allocation19 + $0x2e0] sm:$0xff]  ;;  %v1500_v50 = vld [vmem:[#allocation19 + $0x2c8] sm:$0xff] }
 0x3d8   :  { %v725_v61 = vadd.f32 %v718_v56, %v712_v59  ;;  %v1444_v56 = vld [vmem:[#allocation19 + $0x108] sm:$0xff]  ;;  %v7328_v59 = vcombine.low %v1443_v54, %v1447_v55  ;;  %v1507_v54 = vld [vmem:[#allocation19 + $0x300] sm:$0xff] }
 0x3d9   :  { %v726_v62 = vadd.f32 %v722_v58, %v713_v60  ;;  %v1448_v58 = vld [vmem:[#allocation19 + $0x128] sm:$0xff]  ;;  %v1511_v55 = vld [vmem:[#allocation19 + $0x320] sm:$0xff] }
 0x3da   :  { %v729_v2 = vmul.f32 0.044715, %v725_v61  ;;  %v727_v14 = vmul.f32 0.5, %v725_v61  ;;  %v7330_v60 = vcombine.low %v1444_v56, %v1448_v58 }
 0x3db   :  { %v730_v3 = vmul.f32 0.044715, %v726_v62  ;;  %v728_v16 = vmul.f32 0.5, %v726_v62 }
 0x3dc   :  { %v731_v4 = vmul.f32 %v729_v2, %v725_v61  ;;  %v1455_v2 = vld [vmem:[#allocation19 + $0x160] sm:$0xff] }
 0x3dd   :  { %v732_v5 = vmul.f32 %v730_v3, %v726_v62  ;;  %v1452_v3 = vld [vmem:[#allocation19 + $0x148] sm:$0xff] }
 0x3de   :  { %v733_v6 = vmul.f32 %v731_v4, %v725_v61 }
 0x3df   :  { %v734_v7 = vmul.f32 %v732_v5, %v726_v62  ;;  %v1456_v5 = vld [vmem:[#allocation19 + $0x168] sm:$0xff] }
 0x3e0   :  { %v735_v8 = vadd.f32 %v733_v6, %v725_v61  ;;  %v7331_v61 = vcombine.high %v1444_v56, %v1448_v58  ;;  %v1508_v58 = vld [vmem:[#allocation19 + $0x308] sm:$0xff] }
 0x3e1   :  { %v736_v9 = vadd.f32 %v734_v7, %v726_v62  ;;  %v1451_v62 = vld [vmem:[#allocation19 + $0x140] sm:$0xff]  ;;  %v7338_v7 = vcombine.low %v1452_v3, %v1456_v5 }
 0x3e2   :  { %v737_v10 = vmul.f32 0.7978846, %v735_v8  ;;  %v7337_v4 = vcombine.high %v1451_v62, %v1455_v2  ;;  %v7336_v6 = vcombine.low %v1451_v62, %v1455_v2  ;;  %v7339_v8 = vcombine.high %v1452_v3, %v1456_v5  ;;  %v1515_v62 = vld [vmem:[#allocation19 + $0x340] sm:$0xff]  ;;  %v1516_v5 = vld [vmem:[#allocation19 + $0x348] sm:$0xff] }
 0x3e3   :  { %v738_v12 = vmul.f32 0.7978846, %v736_v9  ;;  %v1459_v9 = vld [vmem:[#allocation19 + $0x180] sm:$0xff] }
 0x3e4   :  { %9026 = vtanh.f32 %v737_v10  ;;  %v1463_v10 = vld [vmem:[#allocation19 + $0x1a0] sm:$0xff] }
 0x3e5   :  { %9028 = vtanh.f32 %v738_v12  ;;  %v1460_v12 = vld [vmem:[#allocation19 + $0x188] sm:$0xff]  ;;  %v1519_v2 = vld [vmem:[#allocation19 + $0x360] sm:$0xff] }
 0x3ee   :  { %v9027_v11 = vpop.eup %9026 }
 0x3ef   :  { %v9029_v13 = vpop.eup %9028  ;;  %v741_v15 = vadd.f32 1.0, %v9027_v11  ;;  %v7345_v11 = vcombine.high %v1459_v9, %v1463_v10 }
 0x3f0   :  { %v742_v17 = vadd.f32 1.0, %v9029_v13  ;;  %v1464_v13 = vld [vmem:[#allocation19 + $0x1a8] sm:$0xff] }
 0x3f1   :  { %v743_v18 = vmul.f32 %v741_v15, %v727_v14  ;;  %v7344_v14 = vcombine.low %v1459_v9, %v1463_v10  ;;  %v7346_v15 = vcombine.low %v1460_v12, %v1464_v13  ;;  %v1523_v9 = vld [vmem:[#allocation19 + $0x380] sm:$0xff] }
 0x3f2   :  { %v744_v19 = vmul.f32 %v742_v17, %v728_v16  ;;  %v7347_v16 = vcombine.high %v1460_v12, %v1464_v13  ;;  %v1467_v17 = vld [vmem:[#allocation19 + $0x1c0] sm:$0xff]  ;;  %v1524_v13 = vld [vmem:[#allocation19 + $0x388] sm:$0xff] }
 0x3f3   :  { %v745_v21 = vpack.c.bf16 %v743_v18, %v743_v18  ;;  %v1471_v18 = vld [vmem:[#allocation19 + $0x1e0] sm:$0xff] }
 0x3f4   :  { %v746_v20 = vpack.c.bf16 %v744_v19, %v744_v19  ;;  %v1468_v19 = vld [vmem:[#allocation19 + $0x1c8] sm:$0xff]  ;;  %v7352_v22 = vcombine.low %v1467_v17, %v1471_v18  ;;  %v1527_v10 = vld [vmem:[#allocation19 + $0x3a0] sm:$0xff] }
 0x3f6   :  { %1185 = vmatprep.mubr.bf16.mxu1 %v746_v20  ;;  %1226 = vmatprep.mubr.bf16.mxu0 %v746_v20  ;;  %v7353_v20 = vcombine.high %v1467_v17, %v1471_v18  ;;  %v1531_v17 = vld [vmem:[#allocation19 + $0x3c0] sm:$0xff] }
 0x3f7   :  { %1186 = vmatmul.mubr.bf16.vlgmr.msra.gmra.mrb[0].mxu1 %v745_v21  ;;  %1227 = vmatmul.mubr.bf16.vlgmr.msra.gmra.mrb[12].mxu0 %v745_v21  ;;  %v1472_v21 = vld [vmem:[#allocation19 + $0x1e8] sm:$0xff]  ;;  %v1535_v18 = vld [vmem:[#allocation19 + $0x3e0] sm:$0xff] }
 0x3f8   :  { %2990 = vmatpush1.bf16.msra.mxu1 %v7296_v27  ;;  %3072 = vmatpush1.bf16.msra.mxu0 %v7298_v28  ;;  %v7354_v23 = vcombine.low %v1468_v19, %v1472_v21  ;;  %v7355_v24 = vcombine.high %v1468_v19, %v1472_v21  ;;  %v1476_v27 = vld [vmem:[#allocation19 + $0x208] sm:$0xff]  ;;  %v7361_v28 = vcombine.high %v1475_v25, %v1479_v26 }
 0x3f9   :  { %2991 = vmatprep.subr.bf16.mxu1 %v7305_v33  ;;  %3073 = vmatprep.subr.bf16.mxu0 %v7307_v37  ;;  %v7362_v31 = vcombine.low %v1476_v27, %v1480_v29  ;;  %v7363_v32 = vcombine.high %v1476_v27, %v1480_v29  ;;  %v1483_v33 = vld [vmem:[#allocation19 + $0x240] sm:$0xff]  ;;  %v1488_v37 = vld [vmem:[#allocation19 + $0x268] sm:$0xff]  ;;  %v7416_v26 = vcombine.low %v1531_v17, %v1535_v18 }
 0x3fa   :  { %v7368_v38 = vcombine.low %v1483_v33, %v1487_v34  ;;  %v1532_v21 = vld [vmem:[#allocation19 + $0x3c8] sm:$0xff]  ;;  %v9883_v29 = vld [vmem:[#allocation19 + $0x420] sm:$0xff] }
 0x3fc   :  { %2992 = vmatpush1.bf16.msra.mxu1 %v7304_v35  ;;  %3074 = vmatpush1.bf16.msra.mxu0 %v7306_v36  ;;  %v1484_v35 = vld [vmem:[#allocation19 + $0x248] sm:$0xff]  ;;  %v7369_v36 = vcombine.high %v1483_v33, %v1487_v34 }
 0x3fd   :  { %2993 = vmatprep.subr.bf16.mxu1 %v7313_v41  ;;  %3075 = vmatprep.subr.bf16.mxu0 %v7315_v45  ;;  %v7370_v39 = vcombine.low %v1484_v35, %v1488_v37  ;;  %v7371_v40 = vcombine.high %v1484_v35, %v1488_v37  ;;  %v1491_v41 = vld [vmem:[#allocation19 + $0x280] sm:$0xff]  ;;  %v1496_v45 = vld [vmem:[#allocation19 + $0x2a8] sm:$0xff]  ;;  %v811_v37 = vld [vmem:[#allocation15] sm:$0xf] }
 0x3fe   :  { %v7376_v48 = vcombine.low %v1491_v41, %v1495_v42 }
 0x400   :  { %2994 = vmatpush1.bf16.msra.mxu1 %v7312_v43  ;;  %3076 = vmatpush1.bf16.msra.mxu0 %v7314_v44  ;;  %v1492_v43 = vld [vmem:[#allocation19 + $0x288] sm:$0xff]  ;;  %v7377_v44 = vcombine.high %v1491_v41, %v1495_v42  ;;  %v820_v41 = vrot.slane %v811_v37, %v9873_v1 }
 0x401   :  { %2995 = vmatprep.subr.bf16.mxu1 %v7321_v49  ;;  %3077 = vmatprep.subr.bf16.mxu0 %v7323_v53  ;;  %v7379_v49 = vcombine.high %v1492_v43, %v1496_v45  ;;  %v7378_v53 = vcombine.low %v1492_v43, %v1496_v45 }
 0x404   :  { %2996 = vmatpush1.bf16.msra.mxu1 %v7320_v51  ;;  %3078 = vmatpush1.bf16.msra.mxu0 %v7322_v52  ;;  %v1504_v51 = vld [vmem:[#allocation19 + $0x2e8] sm:$0xff]  ;;  %v7385_v52 = vcombine.high %v1499_v46, %v1503_v47 }
 0x405   :  { %2997 = vmatprep.subr.bf16.mxu1 %v7329_v57  ;;  %3079 = vmatprep.subr.bf16.mxu0 %v7331_v61  ;;  %v7387_v56 = vcombine.high %v1500_v50, %v1504_v51  ;;  %v7384_v57 = vcombine.low %v1499_v46, %v1503_v47  ;;  %v7386_v61 = vcombine.low %v1500_v50, %v1504_v51 }
 0x408   :  { %2998 = vmatpush1.bf16.msra.mxu1 %v7328_v59  ;;  %3080 = vmatpush1.bf16.msra.mxu0 %v7330_v60  ;;  %v1512_v59 = vld [vmem:[#allocation19 + $0x328] sm:$0xff]  ;;  %v7393_v60 = vcombine.high %v1507_v54, %v1511_v55 }
 0x409   :  { %2999 = vmatprep.subr.bf16.mxu1 %v7337_v4  ;;  %3081 = vmatprep.subr.bf16.mxu0 %v7339_v8  ;;  %v7395_v3 = vcombine.high %v1508_v58, %v1512_v59  ;;  %v7392_v4 = vcombine.low %v1507_v54, %v1511_v55  ;;  %v7394_v8 = vcombine.low %v1508_v58, %v1512_v59 }
 0x40c   :  { %3000 = vmatpush1.bf16.msra.mxu1 %v7336_v6  ;;  %3082 = vmatpush1.bf16.msra.mxu0 %v7338_v7  ;;  %v1520_v6 = vld [vmem:[#allocation19 + $0x368] sm:$0xff]  ;;  %v7401_v7 = vcombine.high %v1515_v62, %v1519_v2 }
 0x40d   :  { %3001 = vmatprep.subr.bf16.mxu1 %v7345_v11  ;;  %3083 = vmatprep.subr.bf16.mxu0 %v7347_v16  ;;  %v7403_v12 = vcombine.high %v1516_v5, %v1520_v6  ;;  %v7400_v11 = vcombine.low %v1515_v62, %v1519_v2  ;;  %v7402_v16 = vcombine.low %v1516_v5, %v1520_v6 }
 0x410   :  { %3002 = vmatpush1.bf16.msra.mxu1 %v7344_v14  ;;  %3084 = vmatpush1.bf16.msra.mxu0 %v7346_v15  ;;  %v1528_v14 = vld [vmem:[#allocation19 + $0x3a8] sm:$0xff]  ;;  %v7409_v15 = vcombine.high %v1523_v9, %v1527_v10 }
 0x411   :  { %3003 = vmatprep.subr.bf16.mxu1 %v7353_v20  ;;  %3085 = vmatprep.subr.bf16.mxu0 %v7355_v24  ;;  %v7411_v19 = vcombine.high %v1524_v13, %v1528_v14  ;;  %v7408_v20 = vcombine.low %v1523_v9, %v1527_v10  ;;  %v7410_v24 = vcombine.low %v1524_v13, %v1528_v14 }
 0x414   :  { %3004 = vmatpush1.bf16.msra.mxu1 %v7352_v22  ;;  %3086 = vmatpush1.bf16.msra.mxu0 %v7354_v23  ;;  %v1536_v22 = vld [vmem:[#allocation19 + $0x3e8] sm:$0xff]  ;;  %v7417_v23 = vcombine.high %v1531_v17, %v1535_v18 }
 0x415   :  { %3005 = vmatprep.subr.bf16.mxu1 %v7361_v28  ;;  %3087 = vmatprep.subr.bf16.mxu0 %v7363_v32  ;;  %v7419_v25 = vcombine.high %v1532_v21, %v1536_v22  ;;  %v7418_v27 = vcombine.low %v1532_v21, %v1536_v22  ;;  %v9881_v28 = vld [vmem:[#allocation19 + $0x400] sm:$0xff]  ;;  %v9889_v32 = vld [vmem:[#allocation19 + $0x428] sm:$0xff] }
 0x416   :  { %v7424_v33 = vcombine.low %v9881_v28, %v9883_v29 }
 0x418   :  { %3006 = vmatpush1.bf16.msra.mxu1 %v7360_v30  ;;  %3088 = vmatpush1.bf16.msra.mxu0 %v7362_v31  ;;  %v9885_v30 = vld [vmem:[#allocation19 + $0x408] sm:$0xff]  ;;  %v7425_v31 = vcombine.high %v9881_v28, %v9883_v29 }
 0x419   :  { %3007 = vmatprep.subr.bf16.mxu1 %v7369_v36  ;;  %3089 = vmatprep.subr.bf16.mxu0 %v7371_v40  ;;  %v7426_v34 = vcombine.low %v9885_v30, %v9889_v32  ;;  %v7427_v35 = vcombine.high %v9885_v30, %v9889_v32  ;;  %v9898_v36 = vsub.s32 2, %v9867_v63 }
 0x41b   :  { %v824_v40 = vrot.slane %v811_v37, %v9898_v36 }
 0x41c   :  { %3008 = vmatpush1.bf16.msra.mxu1 %v7368_v38  ;;  %3090 = vmatpush1.bf16.msra.mxu0 %v7370_v39  ;;  %v9901_v38 = vsub.s32 3, %v9867_v63  ;;  %v816_v39 = vrot.slane %v811_v37, %v9870_v0 }
 0x41d   :  { %3009 = vmatprep.subr.bf16.mxu1 %v7377_v44  ;;  %3091 = vmatprep.subr.bf16.mxu0 %v7379_v49 }
 0x41e   :  { %v828_v42 = vrot.slane %v811_v37, %v9901_v38 }
 0x420   :  { %3010 = vmatpush1.bf16.msra.mxu1 %v7376_v48  ;;  %3092 = vmatpush1.bf16.msra.mxu0 %v7378_v53 }
 0x421   :  { %3011 = vmatprep.subr.bf16.mxu1 %v7385_v52  ;;  %3093 = vmatprep.subr.bf16.mxu0 %v7387_v56 }
 0x424   :  { %3012 = vmatpush1.bf16.msra.mxu1 %v7384_v57  ;;  %3094 = vmatpush1.bf16.msra.mxu0 %v7386_v61 }
 0x425   :  { %3013 = vmatprep.subr.bf16.mxu1 %v7393_v60  ;;  %3095 = vmatprep.subr.bf16.mxu0 %v7395_v3 }
 0x428   :  { %3014 = vmatpush1.bf16.msra.mxu1 %v7392_v4  ;;  %3096 = vmatpush1.bf16.msra.mxu0 %v7394_v8 }
 0x429   :  { %3015 = vmatprep.subr.bf16.mxu1 %v7401_v7  ;;  %3097 = vmatprep.subr.bf16.mxu0 %v7403_v12 }
 0x42c   :  { %3016 = vmatpush1.bf16.msra.mxu1 %v7400_v11  ;;  %3098 = vmatpush1.bf16.msra.mxu0 %v7402_v16 }
 0x42d   :  { %3017 = vmatprep.subr.bf16.mxu1 %v7409_v15  ;;  %3099 = vmatprep.subr.bf16.mxu0 %v7411_v19 }
 0x430   :  { %3018 = vmatpush1.bf16.msra.mxu1 %v7408_v20  ;;  %3100 = vmatpush1.bf16.msra.mxu0 %v7410_v24 }
 0x431   :  { %3019 = vmatprep.subr.bf16.mxu1 %v7417_v23  ;;  %3101 = vmatprep.subr.bf16.mxu0 %v7419_v25 }
 0x434   :  { %3020 = vmatpush1.bf16.msra.mxu1 %v7416_v26  ;;  %3102 = vmatpush1.bf16.msra.mxu0 %v7418_v27 }
 0x435   :  { %3030 = vmatprep.subr.bf16.mxu1 %v7425_v31  ;;  %3112 = vmatprep.subr.bf16.mxu0 %v7427_v35 }
 0x4ca   :  { %v1187_v43 = vpop.f32.mrb[0].mxu1  ;;  %v1228_v44 = vpop.f32.mrb[12].mxu0 }
 0x4cb   :  { %v9907_v45 = vadd.f32 %v1187_v43, %v816_v39  ;;  %v9909_v46 = vadd.f32 %v1228_v44, %v824_v40  ;;  %v1189_v47 = vpop.f32.mrb[1].mxu1  ;;  %v1230_v48 = vpop.f32.mrb[13].mxu0 }
 0x4cc   :  { %v9911_v49 = vadd.f32 %v1189_v47, %v820_v41  ;;  %v9913_v50 = vadd.f32 %v1230_v48, %v828_v42  ;;  %v1191_v51 = vpop.f32.mrb[2].mxu1  ;;  %v1232_v52 = vpop.f32.mrb[14].mxu0 }
 0x4cd   :  { %v1237_v53 = vrot.slane %v9907_v45, 4  ;;  %v1265_v54 = vmul.f32 %v9907_v45, %v9907_v45  ;;  %v1249_v55 = vrot.slane %v9909_v46, 4  ;;  %v1267_v56 = vmul.f32 %v9909_v46, %v9909_v46  ;;  %v1192_v57 = vpop.f32.mrb[3].mxu1  ;;  %v1233_v58 = vpop.f32.mrb[15].mxu0 }
 0x4ce   :  { %v1243_v59 = vrot.slane %v9911_v49, 4  ;;  %v1266_v60 = vmul.f32 %v9911_v49, %v9911_v49  ;;  %v1255_v61 = vrot.slane %v9913_v50, 4  ;;  %v1268_v62 = vmul.f32 %v9913_v50, %v9913_v50 }
 0x4cf   :  { %v1238_v2 = vadd.f32 %v1237_v53, %v9907_v45  ;;  %v1269_v3 = vrot.slane %v1265_v54, 4  ;;  %v1250_v4 = vadd.f32 %v1249_v55, %v9909_v46  ;;  %v1281_v5 = vrot.slane %v1267_v56, 4 }
 0x4d0   :  { %v1244_v6 = vadd.f32 %v1243_v59, %v9911_v49  ;;  %v1275_v7 = vrot.slane %v1266_v60, 4  ;;  %v1256_v8 = vadd.f32 %v1255_v61, %v9913_v50  ;;  %v1287_v9 = vrot.slane %v1268_v62, 4 }
 0x4d1   :  { %v1239_v10 = vrot.slane %v1238_v2, 2  ;;  %v1270_v12 = vadd.f32 %v1269_v3, %v1265_v54  ;;  %v1251_v11 = vrot.slane %v1250_v4, 2  ;;  %v1282_v13 = vadd.f32 %v1281_v5, %v1267_v56 }
 0x4d2   :  { %v1245_v14 = vrot.slane %v1244_v6, 2  ;;  %v1276_v15 = vadd.f32 %v1275_v7, %v1266_v60  ;;  %v1257_v16 = vrot.slane %v1256_v8, 2  ;;  %v1288_v17 = vadd.f32 %v1287_v9, %v1268_v62 }
 0x4d3   :  { %v1240_v18 = vadd.f32 %v1239_v10, %v1238_v2  ;;  %v1271_v19 = vrot.slane %v1270_v12, 2  ;;  %v1252_v20 = vadd.f32 %v1251_v11, %v1250_v4  ;;  %v1283_v21 = vrot.slane %v1282_v13, 2 }
 0x4d4   :  { %v1246_v22 = vadd.f32 %v1245_v14, %v1244_v6  ;;  %v1277_v23 = vrot.slane %v1276_v15, 2  ;;  %v1258_v24 = vadd.f32 %v1257_v16, %v1256_v8  ;;  %v1289_v25 = vrot.slane %v1288_v17, 2 }
 0x4d5   :  { %v1241_v26 = vrot.slane %v1240_v18, 1  ;;  %v1272_v27 = vadd.f32 %v1271_v19, %v1270_v12  ;;  %v1253_v31 = vrot.slane %v1252_v20, 1  ;;  %v1284_v35 = vadd.f32 %v1283_v21, %v1282_v13 }
 0x4d6   :  { %v1247_v37 = vrot.slane %v1246_v22, 1  ;;  %v1278_v39 = vadd.f32 %v1277_v23, %v1276_v15  ;;  %v1259_v40 = vrot.slane %v1258_v24, 1  ;;  %v1290_v41 = vadd.f32 %v1289_v25, %v1288_v17  ;;  %v1235_v17 = vld [vmem:[#allocation16] sm:$0xf] }
 0x4d7   :  { %v1242_v42 = vadd.f32 %v1241_v26, %v1240_v18  ;;  %v1273_v43 = vrot.slane %v1272_v27, 1  ;;  %v1254_v44 = vadd.f32 %v1253_v31, %v1252_v20  ;;  %v1285_v47 = vrot.slane %v1284_v35, 1  ;;  %v1236_v18 = vld [vmem:[#allocation18] sm:$0xf] }
 0x4d8   :  { %v1248_v48 = vadd.f32 %v1247_v37, %v1246_v22  ;;  %v1279_v51 = vrot.slane %v1278_v39, 1  ;;  %v1260_v52 = vadd.f32 %v1259_v40, %v1258_v24  ;;  %v1291_v53 = vrot.slane %v1290_v41, 1 }
 0x4d9   :  { %v1261_v54 = vmul.f32 0.125, %v1242_v42  ;;  %v1274_v55 = vadd.f32 %v1273_v43, %v1272_v27  ;;  %v1263_v56 = vmul.f32 0.125, %v1254_v44  ;;  %v1286_v57 = vadd.f32 %v1285_v47, %v1284_v35 }
 0x4da   :  { %v1262_v58 = vmul.f32 0.125, %v1248_v48  ;;  %v1280_v59 = vadd.f32 %v1279_v51, %v1278_v39  ;;  %v1264_v60 = vmul.f32 0.125, %v1260_v52  ;;  %v1292_v61 = vadd.f32 %v1291_v53, %v1290_v41 }
 0x4db   :  { %v1293_v62 = vmul.f32 0.125, %v1274_v55  ;;  %v1297_v2 = vmul.f32 %v1261_v54, %v1261_v54  ;;  %v1295_v3 = vmul.f32 0.125, %v1286_v57  ;;  %v1299_v4 = vmul.f32 %v1263_v56, %v1263_v56 }
 0x4dc   :  { %v1294_v5 = vmul.f32 0.125, %v1280_v59  ;;  %v1298_v6 = vmul.f32 %v1262_v58, %v1262_v58  ;;  %v1296_v8 = vmul.f32 0.125, %v1292_v61  ;;  %v1300_v9 = vmul.f32 %v1264_v60, %v1264_v60 }
 0x4dd   :  { %v1301_v7 = vsub.f32 %v1293_v62, %v1297_v2  ;;  %v1303_v10 = vsub.f32 %v1295_v3, %v1299_v4  ;;  %v1305_v19 = vsub.f32 %v9907_v45, %v1261_v54  ;;  %v1325_v20 = vrot.slane %v1235_v17, %v9870_v0 }
 0x4de   :  { %v1302_v12 = vsub.f32 %v1294_v5, %v1298_v6  ;;  %v1304_v13 = vsub.f32 %v1296_v8, %v1300_v9  ;;  %v1307_v22 = vsub.f32 %v9909_v46, %v1263_v56  ;;  %v1333_v23 = vrot.slane %v1235_v17, %v9898_v36 }
 0x4df   :  { %v1309_v11 = vadd.f32 0.8, %v1301_v7  ;;  %v1311_v14 = vadd.f32 0.8, %v1303_v10  ;;  %v1350_v26 = vrot.slane %v1236_v18, %v9870_v0  ;;  %v1306_v27 = vsub.f32 %v9911_v49, %v1262_v58 }
 0x4e0   :  { %v1310_v15 = vadd.f32 0.8, %v1302_v12  ;;  %v1312_v16 = vadd.f32 0.8, %v1304_v13  ;;  %v1329_v31 = vrot.slane %v1235_v17, %v9873_v1  ;;  %v1358_v39 = vrot.slane %v1236_v18, %v9898_v36 }
 0x4e1   :  { %9030 = vrsqrt.f32 %v1309_v11  ;;  %v1308_v45 = vsub.f32 %v9913_v50, %v1264_v60  ;;  %v1337_v40 = vrot.slane %v1235_v17, %v9901_v38  ;;  %v1354_v43 = vrot.slane %v1236_v18, %v9873_v1 }
 0x4e2   :  { %9032 = vrsqrt.f32 %v1311_v14  ;;  %v1362_v48 = vrot.slane %v1236_v18, %v9901_v38 }
 0x4e3   :  { %9034 = vrsqrt.f32 %v1310_v15 }
 0x4e4   :  { %9036 = vrsqrt.f32 %v1312_v16 }
 0x4eb   :  { %v9031_v21 = vpop.eup %9030 }
 0x4ec   :  { %v9033_v24 = vpop.eup %9032  ;;  %v1317_v25 = vmul.f32 %v9031_v21, %v1305_v19 }
 0x4ed   :  { %v9035_v35 = vpop.eup %9034  ;;  %v1319_v37 = vmul.f32 %v9033_v24, %v1307_v22  ;;  %v1551_v22 = vld [vmem:[#allocation19 + $0x460] sm:$0xff]  ;;  %v1552_v24 = vld [vmem:[#allocation19 + $0x468] sm:$0xff] }
 0x4ee   :  { %v9037_v41 = vpop.eup %9036  ;;  %v1342_v46 = vmul.f32 %v1325_v20, %v1317_v25  ;;  %v1318_v42 = vmul.f32 %v9035_v35, %v1306_v27  ;;  %v1547_v20 = vld [vmem:[#allocation19 + $0x440] sm:$0xff] }
 0x4ef   :  { %v1344_v44 = vmul.f32 %v1333_v23, %v1319_v37  ;;  %v1320_v47 = vmul.f32 %v9037_v41, %v1308_v45  ;;  %v1548_v23 = vld [vmem:[#allocation19 + $0x448] sm:$0xff]  ;;  %v1555_v27 = vld [vmem:[#allocation19 + $0x480] sm:$0xff]  ;;  %v7432_v41 = vcombine.low %v1547_v20, %v1551_v22 }
 0x4f0   :  { %v1367_v49 = vadd.f32 %v1350_v26, %v1342_v46  ;;  %v1343_v51 = vmul.f32 %v1329_v31, %v1318_v42  ;;  %v7433_v31 = vcombine.high %v1547_v20, %v1551_v22  ;;  %v7435_v35 = vcombine.high %v1548_v23, %v1552_v24  ;;  %v1559_v37 = vld [vmem:[#allocation19 + $0x4a0] sm:$0xff]  ;;  %v1560_v45 = vld [vmem:[#allocation19 + $0x4a8] sm:$0xff] }
 0x4f1   :  { %v9943_v52 = vadd.f32 %v1358_v39, %v1344_v44  ;;  %v1345_v53 = vmul.f32 %v1337_v40, %v1320_v47  ;;  %v1556_v39 = vld [vmem:[#allocation19 + $0x488] sm:$0xff]  ;;  %v7434_v46 = vcombine.low %v1548_v23, %v1552_v24  ;;  %v7441_v42 = vcombine.high %v1555_v27, %v1559_v37  ;;  %v1563_v44 = vld [vmem:[#allocation19 + $0x4c0] sm:$0xff] }
 0x4f2   :  { %v1368_v54 = vadd.f32 %v1354_v43, %v1343_v51  ;;  %v1375_v55 = vmul.f32 0.044715, %v1367_v49  ;;  %v1371_v11 = vmul.f32 0.5, %v1367_v49  ;;  %v7443_v43 = vcombine.high %v1556_v39, %v1560_v45  ;;  %v1567_v47 = vld [vmem:[#allocation19 + $0x4e0] sm:$0xff]  ;;  %v1572_v51 = vld [vmem:[#allocation19 + $0x508] sm:$0xff] }
 0x4f3   :  { %v1370_v56 = vadd.f32 %v1362_v48, %v1345_v53  ;;  %v1564_v48 = vld [vmem:[#allocation19 + $0x4c8] sm:$0xff]  ;;  %v7440_v28 = vcombine.low %v1555_v27, %v1559_v37  ;;  %v7442_v29 = vcombine.low %v1556_v39, %v1560_v45  ;;  %v7449_v30 = vcombine.high %v1563_v44, %v1567_v47  ;;  %v1607_v22 = vld [vmem:[#allocation19 + $0x620] sm:$0xff] }
 0x4f4   :  { %v1376_v50 = vmul.f32 0.044715, %v1368_v54  ;;  %v1379_v57 = vmul.f32 %v1375_v55, %v1367_v49  ;;  %v1372_v14 = vmul.f32 0.5, %v1368_v54  ;;  %v1576_v53 = vld [vmem:[#allocation19 + $0x528] sm:$0xff]  ;;  %v1611_v45 = vld [vmem:[#allocation19 + $0x640] sm:$0xff] }
 0x4f5   :  { %v1378_v58 = vmul.f32 0.044715, %v1370_v56  ;;  %v1374_v17 = vmul.f32 0.5, %v1370_v56  ;;  %v1604_v23 = vld [vmem:[#allocation19 + $0x608] sm:$0xff] }
 0x4f6   :  { %v1380_v59 = vmul.f32 %v1376_v50, %v1368_v54  ;;  %v1383_v60 = vmul.f32 %v1379_v57, %v1367_v49  ;;  %v7459_v50 = vcombine.high %v1572_v51, %v1576_v53  ;;  %v1579_v57 = vld [vmem:[#allocation19 + $0x540] sm:$0xff]  ;;  %v1608_v24 = vld [vmem:[#allocation19 + $0x628] sm:$0xff] }
 0x4f7   :  { %v1382_v61 = vmul.f32 %v1378_v58, %v1370_v56  ;;  %v1583_v58 = vld [vmem:[#allocation19 + $0x560] sm:$0xff]  ;;  %v7491_v39 = vcombine.high %v1604_v23, %v1608_v24 }
 0x4f8   :  { %v1384_v62 = vmul.f32 %v1380_v59, %v1368_v54  ;;  %v1387_v2 = vadd.f32 %v1383_v60, %v1367_v49  ;;  %v1568_v49 = vld [vmem:[#allocation19 + $0x4e8] sm:$0xff] }
 0x4f9   :  { %v1386_v3 = vmul.f32 %v1382_v61, %v1370_v56  ;;  %v7451_v32 = vcombine.high %v1564_v48, %v1568_v49  ;;  %v7450_v55 = vcombine.low %v1564_v48, %v1568_v49  ;;  %v1580_v59 = vld [vmem:[#allocation19 + $0x548] sm:$0xff] }
 0x4fa   :  { %v1388_v4 = vadd.f32 %v1384_v62, %v1368_v54  ;;  %v1391_v5 = vmul.f32 0.7978846, %v1387_v2  ;;  %v7448_v54 = vcombine.low %v1563_v44, %v1567_v47  ;;  %v1584_v60 = vld [vmem:[#allocation19 + $0x568] sm:$0xff]  ;;  %v7458_v62 = vcombine.low %v1572_v51, %v1576_v53 }
 0x4fb   :  { %v1390_v6 = vadd.f32 %v1386_v3, %v1370_v56  ;;  %v7465_v2 = vcombine.high %v1579_v57, %v1583_v58  ;;  %v7467_v3 = vcombine.high %v1580_v59, %v1584_v60  ;;  %v7490_v44 = vcombine.low %v1604_v23, %v1608_v24 }
 0x4fc   :  { %v1392_v7 = vmul.f32 0.7978846, %v1388_v4  ;;  %9038 = vtanh.f32 %v1391_v5  ;;  %v1587_v4 = vld [vmem:[#allocation19 + $0x580] sm:$0xff] }
 0x4fd   :  { %v1394_v8 = vmul.f32 0.7978846, %v1390_v6  ;;  %v1591_v5 = vld [vmem:[#allocation19 + $0x5a0] sm:$0xff]  ;;  %v1588_v6 = vld [vmem:[#allocation19 + $0x588] sm:$0xff] }
 0x4fe   :  { %9040 = vtanh.f32 %v1392_v7  ;;  %v1592_v7 = vld [vmem:[#allocation19 + $0x5a8] sm:$0xff] }
 0x4ff   :  { %9042 = vtanh.f32 %v1394_v8  ;;  %v7464_v8 = vcombine.low %v1579_v57, %v1583_v58  ;;  %v1632_v57 = vld [vmem:[#allocation19 + $0x6e8] sm:$0xff] }
 0x506   :  { %v9039_v9 = vpop.eup %9038 }
 0x507   :  { %v1399_v10 = vadd.f32 1.0, %v9039_v9  ;;  %v7466_v9 = vcombine.low %v1580_v59, %v1584_v60 }
 0x508   :  { %v9041_v12 = vpop.eup %9040 }
 0x509   :  { %v9043_v13 = vpop.eup %9042  ;;  %v1400_v15 = vadd.f32 1.0, %v9041_v12  ;;  %v1403_v16 = vmul.f32 %v1399_v10, %v1371_v11  ;;  %v7473_v10 = vcombine.high %v1587_v4, %v1591_v5  ;;  %v7475_v12 = vcombine.high %v1588_v6, %v1592_v7  ;;  %v1595_v11 = vld [vmem:[#allocation19 + $0x5c0] sm:$0xff] }
 0x50a   :  { %v1402_v18 = vadd.f32 1.0, %v9043_v13  ;;  %v1599_v13 = vld [vmem:[#allocation19 + $0x5e0] sm:$0xff] }
 0x50b   :  { %v1404_v19 = vmul.f32 %v1400_v15, %v1372_v14  ;;  %v9947_v26 = vpack.c.bf16 %v1403_v16, %v1403_v16  ;;  %v1596_v14 = vld [vmem:[#allocation19 + $0x5c8] sm:$0xff]  ;;  %v7472_v16 = vcombine.low %v1587_v4, %v1591_v5  ;;  %v7480_v27 = vcombine.low %v1595_v11, %v1599_v13 }
 0x50c   :  { %v1406_v21 = vmul.f32 %v1402_v18, %v1374_v17  ;;  %v1600_v15 = vld [vmem:[#allocation19 + $0x5e8] sm:$0xff]  ;;  %v7474_v17 = vcombine.low %v1588_v6, %v1592_v7  ;;  %v1377_v18 = vmul.f32 0.044715, %v9943_v52 }
 0x50d   :  { %v9945_v25 = vpack.c.bf16 %v1404_v19, %v1404_v19  ;;  %v7481_v19 = vcombine.high %v1595_v11, %v1599_v13  ;;  %v7483_v20 = vcombine.high %v1596_v14, %v1600_v15  ;;  %v1636_v4 = vld [vmem:[#allocation19 + $0x708] sm:$0xff] }
 0x50e   :  { %v9953_v40 = vpack.c.bf16 %v1406_v21, %v1406_v21  ;;  %v1603_v21 = vld [vmem:[#allocation19 + $0x600] sm:$0xff]  ;;  %v1640_v5 = vld [vmem:[#allocation19 + $0x728] sm:$0xff] }
 0x50f   :  { %3021 = vmatprep.mubr.bf16.mxu1 %v9945_v25  ;;  %3103 = vmatprep.mubr.bf16.mxu0 %v9945_v25  ;;  %v7489_v37 = vcombine.high %v1603_v21, %v1607_v22  ;;  %v1644_v11 = vld [vmem:[#allocation19 + $0x748] sm:$0xff] }
 0x510   :  { %3022 = vmatmul.mubr.bf16.vlgmr.msra.gmra.mrb[4].mxu1 %v9947_v26  ;;  %3104 = vmatmul.mubr.bf16.vlgmr.msra.gmra.mrb[16].mxu0 %v9947_v26  ;;  %v1648_v13 = vld [vmem:[#allocation19 + $0x768] sm:$0xff] }
 0x511   :  { %3031 = vmatpush1.bf16.msra.mxu1 %v7424_v33  ;;  %3113 = vmatpush1.bf16.msra.mxu0 %v7426_v34  ;;  %v1571_v33 = vld [vmem:[#allocation19 + $0x500] sm:$0xff]  ;;  %v7530_v23 = vcombine.low %v1644_v11, %v1648_v13 }
 0x512   :  { %3062 = vmatprep.mubr.bf16.mxu1 %v9953_v40  ;;  %3144 = vmatprep.mubr.bf16.mxu0 %v9953_v40  ;;  %v1575_v34 = vld [vmem:[#allocation19 + $0x520] sm:$0xff] }
 0x513   :  { %3032 = vmatprep.subr.bf16.mxu1 %v7433_v31  ;;  %3114 = vmatprep.subr.bf16.mxu0 %v7435_v35  ;;  %v7457_v56 = vcombine.high %v1571_v33, %v1575_v34  ;;  %v7456_v61 = vcombine.low %v1571_v33, %v1575_v34  ;;  %v7482_v31 = vcombine.low %v1596_v14, %v1600_v15 }
 0x514   :  { %v1381_v35 = vmul.f32 %v1377_v18, %v9943_v52  ;;  %v7522_v15 = vcombine.low %v1636_v4, %v1640_v5  ;;  %v1651_v18 = vld [vmem:[#allocation19 + $0x780] sm:$0xff] }
 0x515   :  { %3033 = vmatpush1.bf16.msra.mxu1 %v7432_v41  ;;  %3115 = vmatpush1.bf16.msra.mxu0 %v7434_v46  ;;  %v1615_v41 = vld [vmem:[#allocation19 + $0x660] sm:$0xff]  ;;  %v1612_v46 = vld [vmem:[#allocation19 + $0x648] sm:$0xff] }
 0x516   :  { %3034 = vmatprep.subr.bf16.mxu1 %v7441_v42  ;;  %3116 = vmatprep.subr.bf16.mxu0 %v7443_v43  ;;  %v1616_v42 = vld [vmem:[#allocation19 + $0x668] sm:$0xff]  ;;  %v7488_v43 = vcombine.low %v1603_v21, %v1607_v22  ;;  %v1385_v47 = vmul.f32 %v1381_v35, %v9943_v52  ;;  %v7497_v48 = vcombine.high %v1611_v45, %v1615_v41 }
 0x517   :  { %v7499_v49 = vcombine.high %v1612_v46, %v1616_v42  ;;  %v7496_v33 = vcombine.low %v1611_v45, %v1615_v41  ;;  %v7498_v34 = vcombine.low %v1612_v46, %v1616_v42  ;;  %v1656_v21 = vld [vmem:[#allocation19 + $0x7a8] sm:$0xff] }
 0x518   :  { %v1389_v51 = vadd.f32 %v1385_v47, %v9943_v52  ;;  %v1664_v45 = vld [vmem:[#allocation19 + $0x7e8] sm:$0xff]  ;;  %v1413_v47 = vld [vmem:[#allocation19 + $0x10] sm:$0xff] }
 0x519   :  { %3035 = vmatpush1.bf16.msra.mxu1 %v7440_v28  ;;  %3117 = vmatpush1.bf16.msra.mxu0 %v7442_v29  ;;  %v1619_v28 = vld [vmem:[#allocation19 + $0x680] sm:$0xff] }
 0x51a   :  { %3036 = vmatprep.subr.bf16.mxu1 %v7449_v30  ;;  %3118 = vmatprep.subr.bf16.mxu0 %v7451_v32  ;;  %v1623_v29 = vld [vmem:[#allocation19 + $0x6a0] sm:$0xff]  ;;  %v1620_v30 = vld [vmem:[#allocation19 + $0x688] sm:$0xff]  ;;  %v1393_v60 = vmul.f32 0.7978846, %v1389_v51 }
 0x51b   :  { %v1624_v32 = vld [vmem:[#allocation19 + $0x6a8] sm:$0xff]  ;;  %v7505_v53 = vcombine.high %v1619_v28, %v1623_v29  ;;  %v7504_v58 = vcombine.low %v1619_v28, %v1623_v29  ;;  %v1418_v28 = vld [vmem:[#allocation19 + $0x38] sm:$0xff]  ;;  %v1373_v29 = vmul.f32 0.5, %v9943_v52 }
 0x51c   :  { %v7506_v59 = vcombine.low %v1620_v30, %v1624_v32  ;;  %9044 = vtanh.f32 %v1393_v60  ;;  %v1429_v60 = vld [vmem:[#allocation19 + $0x90] sm:$0xff] }
 0x51d   :  { %3037 = vmatpush1.bf16.msra.mxu1 %v7448_v54  ;;  %3119 = vmatpush1.bf16.msra.mxu0 %v7450_v55  ;;  %v7507_v54 = vcombine.high %v1620_v30, %v1624_v32  ;;  %v1627_v55 = vld [vmem:[#allocation19 + $0x6c0] sm:$0xff] }
 0x51e   :  { %3038 = vmatprep.subr.bf16.mxu1 %v7457_v56  ;;  %3120 = vmatprep.subr.bf16.mxu0 %v7459_v50  ;;  %v1631_v56 = vld [vmem:[#allocation19 + $0x6e0] sm:$0xff]  ;;  %v1628_v50 = vld [vmem:[#allocation19 + $0x6c8] sm:$0xff] }
 0x51f   :  { %v7512_v6 = vcombine.low %v1627_v55, %v1631_v56  ;;  %v7514_v7 = vcombine.low %v1628_v50, %v1632_v57 }
 0x521   :  { %3039 = vmatpush1.bf16.msra.mxu1 %v7456_v61  ;;  %3121 = vmatpush1.bf16.msra.mxu0 %v7458_v62  ;;  %v7513_v61 = vcombine.high %v1627_v55, %v1631_v56  ;;  %v7515_v62 = vcombine.high %v1628_v50, %v1632_v57  ;;  %v1422_v55 = vld [vmem:[#allocation19 + $0x58] sm:$0xff] }
 0x522   :  { %3040 = vmatprep.subr.bf16.mxu1 %v7465_v2  ;;  %3122 = vmatprep.subr.bf16.mxu0 %v7467_v3  ;;  %v1635_v2 = vld [vmem:[#allocation19 + $0x700] sm:$0xff]  ;;  %v1426_v56 = vld [vmem:[#allocation19 + $0x78] sm:$0xff] }
 0x523   :  { %v1639_v3 = vld [vmem:[#allocation19 + $0x720] sm:$0xff] }
 0x524   :  { %v7520_v14 = vcombine.low %v1635_v2, %v1639_v3 }
 0x525   :  { %3041 = vmatpush1.bf16.msra.mxu1 %v7464_v8  ;;  %3123 = vmatpush1.bf16.msra.mxu0 %v7466_v9  ;;  %v7521_v8 = vcombine.high %v1635_v2, %v1639_v3  ;;  %v7523_v9 = vcombine.high %v1636_v4, %v1640_v5  ;;  %v1434_v2 = vld [vmem:[#allocation19 + $0xb8] sm:$0xff]  ;;  %v7310_v4 = vcombine.low %v1422_v55, %v1426_v56 }
 0x526   :  { %3042 = vmatprep.subr.bf16.mxu1 %v7473_v10  ;;  %3124 = vmatprep.subr.bf16.mxu0 %v7475_v12  ;;  %v1643_v10 = vld [vmem:[#allocation19 + $0x740] sm:$0xff]  ;;  %v9045_v35 = vpop.eup %9044 }
 0x527   :  { %v1647_v12 = vld [vmem:[#allocation19 + $0x760] sm:$0xff] }
 0x528   :  { %v7528_v22 = vcombine.low %v1643_v10, %v1647_v12 }
 0x529   :  { %3043 = vmatpush1.bf16.msra.mxu1 %v7472_v16  ;;  %3125 = vmatpush1.bf16.msra.mxu0 %v7474_v17  ;;  %v7529_v16 = vcombine.high %v1643_v10, %v1647_v12  ;;  %v7531_v17 = vcombine.high %v1644_v11, %v1648_v13  ;;  %v1442_v10 = vld [vmem:[#allocation19 + $0xf8] sm:$0xff] }
 0x52a   :  { %3044 = vmatprep.subr.bf16.mxu1 %v7481_v19  ;;  %3126 = vmatprep.subr.bf16.mxu0 %v7483_v20  ;;  %v1655_v19 = vld [vmem:[#allocation19 + $0x7a0] sm:$0xff]  ;;  %v1652_v20 = vld [vmem:[#allocation19 + $0x788] sm:$0xff] }
 0x52b   :  { %v7537_v24 = vcombine.high %v1651_v18, %v1655_v19  ;;  %v7536_v41 = vcombine.low %v1651_v18, %v1655_v19  ;;  %v7538_v46 = vcombine.low %v1652_v20, %v1656_v21 }
 0x52d   :  { %3045 = vmatpush1.bf16.msra.mxu1 %v7480_v27  ;;  %3127 = vmatpush1.bf16.msra.mxu0 %v7482_v31  ;;  %v7539_v27 = vcombine.high %v1652_v20, %v1656_v21  ;;  %v1659_v31 = vld [vmem:[#allocation19 + $0x7c0] sm:$0xff] }
 0x52e   :  { %3046 = vmatprep.subr.bf16.mxu1 %v7489_v37  ;;  %3128 = vmatprep.subr.bf16.mxu0 %v7491_v39  ;;  %v1663_v37 = vld [vmem:[#allocation19 + $0x7e0] sm:$0xff]  ;;  %v1660_v39 = vld [vmem:[#allocation19 + $0x7c8] sm:$0xff] }
 0x52f   :  { %v7545_v42 = vcombine.high %v1659_v31, %v1663_v37  ;;  %v7544_v30 = vcombine.low %v1659_v31, %v1663_v37  ;;  %v7546_v32 = vcombine.low %v1660_v39, %v1664_v45 }
 0x531   :  { %3047 = vmatpush1.bf16.msra.mxu1 %v7488_v43  ;;  %3129 = vmatpush1.bf16.msra.mxu0 %v7490_v44  ;;  %v7547_v43 = vcombine.high %v1660_v39, %v1664_v45  ;;  %v1401_v44 = vadd.f32 1.0, %v9045_v35  ;;  %v1461_v45 = vld [vmem:[#allocation19 + $0x190] sm:$0xff] }
 0x532   :  { %3048 = vmatprep.subr.bf16.mxu1 %v7497_v48  ;;  %3130 = vmatprep.subr.bf16.mxu0 %v7499_v49  ;;  %v1417_v48 = vld [vmem:[#allocation19 + $0x30] sm:$0xff]  ;;  %v1414_v49 = vld [vmem:[#allocation19 + $0x18] sm:$0xff] }
 0x533   :  { %v7303_v51 = vcombine.high %v1414_v49, %v1418_v28  ;;  %v7300_v50 = vcombine.low %v1413_v47, %v1417_v48  ;;  %v7302_v52 = vcombine.low %v1414_v49, %v1418_v28  ;;  %v1469_v49 = vld [vmem:[#allocation19 + $0x1d0] sm:$0xff] }
 0x534   :  { %v1473_v28 = vld [vmem:[#allocation19 + $0x1f0] sm:$0xff] }
 0x535   :  { %3049 = vmatpush1.bf16.msra.mxu1 %v7496_v33  ;;  %3131 = vmatpush1.bf16.msra.mxu0 %v7498_v34  ;;  %v1405_v33 = vmul.f32 %v1401_v44, %v1373_v29  ;;  %v7301_v34 = vcombine.high %v1413_v47, %v1417_v48  ;;  %v1470_v29 = vld [vmem:[#allocation19 + $0x1d8] sm:$0xff] }
 0x536   :  { %3050 = vmatprep.subr.bf16.mxu1 %v7505_v53  ;;  %3132 = vmatprep.subr.bf16.mxu0 %v7507_v54  ;;  %v1421_v53 = vld [vmem:[#allocation19 + $0x50] sm:$0xff] }
 0x537   :  { %v1425_v54 = vld [vmem:[#allocation19 + $0x70] sm:$0xff]  ;;  %v9968_v57 = vpack.c.bf16 %v1405_v33, %v1405_v33 }
 0x538   :  { %v7308_v3 = vcombine.low %v1421_v53, %v1425_v54 }
 0x539   :  { %3051 = vmatpush1.bf16.msra.mxu1 %v7504_v58  ;;  %3133 = vmatpush1.bf16.msra.mxu0 %v7506_v59  ;;  %v7309_v58 = vcombine.high %v1421_v53, %v1425_v54  ;;  %v7311_v59 = vcombine.high %v1422_v55, %v1426_v56  ;;  %v1477_v53 = vld [vmem:[#allocation19 + $0x210] sm:$0xff]  ;;  %v1478_v55 = vld [vmem:[#allocation19 + $0x218] sm:$0xff] }
 0x53a   :  { %3052 = vmatprep.subr.bf16.mxu1 %v7513_v61  ;;  %3134 = vmatprep.subr.bf16.mxu0 %v7515_v62  ;;  %v1433_v61 = vld [vmem:[#allocation19 + $0xb0] sm:$0xff]  ;;  %v1430_v62 = vld [vmem:[#allocation19 + $0x98] sm:$0xff] }
 0x53b   :  { %v7317_v5 = vcombine.high %v1429_v60, %v1433_v61  ;;  %v7316_v12 = vcombine.low %v1429_v60, %v1433_v61  ;;  %v7318_v11 = vcombine.low %v1430_v62, %v1434_v2  ;;  %v1481_v54 = vld [vmem:[#allocation19 + $0x230] sm:$0xff]  ;;  %v1482_v56 = vld [vmem:[#allocation19 + $0x238] sm:$0xff] }
 0x53c   :  { %v1485_v60 = vld [vmem:[#allocation19 + $0x250] sm:$0xff] }
 0x53d   :  { %3053 = vmatpush1.bf16.msra.mxu1 %v7512_v6  ;;  %3135 = vmatpush1.bf16.msra.mxu0 %v7514_v7  ;;  %v7319_v6 = vcombine.high %v1430_v62, %v1434_v2  ;;  %v1437_v7 = vld [vmem:[#allocation19 + $0xd0] sm:$0xff]  ;;  %v1486_v62 = vld [vmem:[#allocation19 + $0x258] sm:$0xff] }
 0x53e   :  { %3054 = vmatprep.subr.bf16.mxu1 %v7521_v8  ;;  %3136 = vmatprep.subr.bf16.mxu0 %v7523_v9  ;;  %v1441_v8 = vld [vmem:[#allocation19 + $0xf0] sm:$0xff]  ;;  %v1438_v9 = vld [vmem:[#allocation19 + $0xd8] sm:$0xff] }
 0x53f   :  { %v7325_v13 = vcombine.high %v1437_v7, %v1441_v8  ;;  %v7324_v18 = vcombine.low %v1437_v7, %v1441_v8  ;;  %v7326_v19 = vcombine.low %v1438_v9, %v1442_v10  ;;  %v1489_v61 = vld [vmem:[#allocation19 + $0x270] sm:$0xff]  ;;  %v1490_v2 = vld [vmem:[#allocation19 + $0x278] sm:$0xff] }
 0x540   :  { %v1493_v7 = vld [vmem:[#allocation19 + $0x290] sm:$0xff] }
 0x541   :  { %3055 = vmatpush1.bf16.msra.mxu1 %v7520_v14  ;;  %3137 = vmatpush1.bf16.msra.mxu0 %v7522_v15  ;;  %v7327_v14 = vcombine.high %v1438_v9, %v1442_v10  ;;  %v1445_v15 = vld [vmem:[#allocation19 + $0x110] sm:$0xff]  ;;  %v1494_v9 = vld [vmem:[#allocation19 + $0x298] sm:$0xff] }
 0x542   :  { %3056 = vmatprep.subr.bf16.mxu1 %v7529_v16  ;;  %3138 = vmatprep.subr.bf16.mxu0 %v7531_v17  ;;  %v1449_v16 = vld [vmem:[#allocation19 + $0x130] sm:$0xff]  ;;  %v1450_v17 = vld [vmem:[#allocation19 + $0x138] sm:$0xff] }
 0x543   :  { %v7333_v20 = vcombine.high %v1445_v15, %v1449_v16  ;;  %v7332_v31 = vcombine.low %v1445_v15, %v1449_v16  ;;  %v1497_v8 = vld [vmem:[#allocation19 + $0x2b0] sm:$0xff]  ;;  %v1498_v10 = vld [vmem:[#allocation19 + $0x2b8] sm:$0xff] }
 0x544   :  { %v1501_v15 = vld [vmem:[#allocation19 + $0x2d0] sm:$0xff] }
 0x545   :  { %3057 = vmatpush1.bf16.msra.mxu1 %v7528_v22  ;;  %3139 = vmatpush1.bf16.msra.mxu0 %v7530_v23  ;;  %v1453_v22 = vld [vmem:[#allocation19 + $0x150] sm:$0xff] }
 0x546   :  { %3058 = vmatprep.subr.bf16.mxu1 %v7537_v24  ;;  %3140 = vmatprep.subr.bf16.mxu0 %v7539_v27  ;;  %v1457_v23 = vld [vmem:[#allocation19 + $0x170] sm:$0xff]  ;;  %v1454_v24 = vld [vmem:[#allocation19 + $0x158] sm:$0xff] }
 0x547   :  { %v1458_v27 = vld [vmem:[#allocation19 + $0x178] sm:$0xff]  ;;  %v7341_v37 = vcombine.high %v1453_v22, %v1457_v23  ;;  %v1505_v16 = vld [vmem:[#allocation19 + $0x2f0] sm:$0xff] }
 0x548   :  { %v7343_v39 = vcombine.high %v1454_v24, %v1458_v27  ;;  %v7342_v44 = vcombine.low %v1454_v24, %v1458_v27  ;;  %v1510_v24 = vld [vmem:[#allocation19 + $0x318] sm:$0xff] }
 0x549   :  { %3059 = vmatpush1.bf16.msra.mxu1 %v7536_v41  ;;  %3141 = vmatpush1.bf16.msra.mxu0 %v7538_v46  ;;  %v1465_v41 = vld [vmem:[#allocation19 + $0x1b0] sm:$0xff]  ;;  %v1462_v46 = vld [vmem:[#allocation19 + $0x198] sm:$0xff] }
 0x54a   :  { %3060 = vmatprep.subr.bf16.mxu1 %v7545_v42  ;;  %3142 = vmatprep.subr.bf16.mxu0 %v7547_v43  ;;  %v1466_v42 = vld [vmem:[#allocation19 + $0x1b8] sm:$0xff]  ;;  %v7340_v43 = vcombine.low %v1453_v22, %v1457_v23  ;;  %v7349_v47 = vcombine.high %v1461_v45, %v1465_v41  ;;  %v1509_v22 = vld [vmem:[#allocation19 + $0x310] sm:$0xff] }
 0x54b   :  { %v7351_v48 = vcombine.high %v1462_v46, %v1466_v42  ;;  %v7350_v33 = vcombine.low %v1462_v46, %v1466_v42  ;;  %v1513_v23 = vld [vmem:[#allocation19 + $0x330] sm:$0xff]  ;;  %v1514_v27 = vld [vmem:[#allocation19 + $0x338] sm:$0xff] }
 0x54c   :  { %v1518_v46 = vld [vmem:[#allocation19 + $0x358] sm:$0xff] }
 0x54d   :  { %3061 = vmatpush1.bf16.msra.mxu1 %v7544_v30  ;;  %3143 = vmatpush1.bf16.msra.mxu0 %v7546_v32  ;;  %v1474_v30 = vld [vmem:[#allocation19 + $0x1f8] sm:$0xff]  ;;  %v7348_v32 = vcombine.low %v1461_v45, %v1465_v41  ;;  %v1517_v45 = vld [vmem:[#allocation19 + $0x350] sm:$0xff] }
 0x54e   :  { %3153 = vmatprep.subr.bf16.mxu1 %v7301_v34  ;;  %3235 = vmatprep.subr.bf16.mxu0 %v7303_v51  ;;  %v7357_v34 = vcombine.high %v1469_v49, %v1473_v28  ;;  %v7359_v51 = vcombine.high %v1470_v29, %v1474_v30  ;;  %v1521_v41 = vld [vmem:[#allocation19 + $0x370] sm:$0xff]  ;;  %v1522_v42 = vld [vmem:[#allocation19 + $0x378] sm:$0xff] }
 0x550   :  { %3063 = vmatmul.mubr.bf16.vlgmr.msra.gmra.mrb[4].mxu1 %v9968_v57  ;;  %3145 = vmatmul.mubr.bf16.vlgmr.msra.gmra.mrb[16].mxu0 %v9968_v57 }
 0x551   :  { %3154 = vmatpush1.bf16.msra.mxu1 %v7300_v50  ;;  %3185 = vmatprep.mubr.bf16.mxu1 %v9945_v25  ;;  %v7356_v50 = vcombine.low %v1469_v49, %v1473_v28  ;;  %v1525_v49 = vld [vmem:[#allocation19 + $0x390] sm:$0xff] }
 0x552   :  { %3236 = vmatpush1.bf16.msra.mxu0 %v7302_v52  ;;  %3267 = vmatprep.mubr.bf16.mxu0 %v9945_v25  ;;  %v1446_v25 = vld [vmem:[#allocation19 + $0x118] sm:$0xff]  ;;  %v7358_v52 = vcombine.low %v1470_v29, %v1474_v30  ;;  %v1529_v28 = vld [vmem:[#allocation19 + $0x3b0] sm:$0xff] }
 0x553   :  { %3155 = vmatprep.subr.bf16.mxu1 %v7309_v58  ;;  %3237 = vmatprep.subr.bf16.mxu0 %v7311_v59  ;;  %v7335_v21 = vcombine.high %v1446_v25, %v1450_v17  ;;  %v7334_v35 = vcombine.low %v1446_v25, %v1450_v17  ;;  %v7365_v58 = vcombine.high %v1477_v53, %v1481_v54  ;;  %v1502_v25 = vld [vmem:[#allocation19 + $0x2d8] sm:$0xff] }
 0x554   :  { %v7367_v59 = vcombine.high %v1478_v55, %v1482_v56  ;;  %v1506_v17 = vld [vmem:[#allocation19 + $0x2f8] sm:$0xff] }
 0x555   :  { %3156 = vmatpush1.bf16.msra.mxu1 %v7308_v3  ;;  %v7364_v3 = vcombine.low %v1477_v53, %v1481_v54  ;;  %v1526_v29 = vld [vmem:[#allocation19 + $0x398] sm:$0xff]  ;;  %v1533_v53 = vld [vmem:[#allocation19 + $0x3d0] sm:$0xff] }
 0x556   :  { %3238 = vmatpush1.bf16.msra.mxu0 %v7310_v4  ;;  %3157 = vmatprep.subr.bf16.mxu1 %v7317_v5  ;;  %v7366_v4 = vcombine.low %v1478_v55, %v1482_v56  ;;  %v7373_v5 = vcombine.high %v1485_v60, %v1489_v61  ;;  %v1530_v30 = vld [vmem:[#allocation19 + $0x3b8] sm:$0xff]  ;;  %v1537_v54 = vld [vmem:[#allocation19 + $0x3f0] sm:$0xff] }
 0x557   :  { %3239 = vmatprep.subr.bf16.mxu0 %v7319_v6  ;;  %v7375_v6 = vcombine.high %v1486_v62, %v1490_v2  ;;  %v1534_v55 = vld [vmem:[#allocation19 + $0x3d8] sm:$0xff] }
 0x558   :  { %v1538_v56 = vld [vmem:[#allocation19 + $0x3f8] sm:$0xff] }
 0x559   :  { %3158 = vmatpush1.bf16.msra.mxu1 %v7316_v12  ;;  %v7372_v12 = vcombine.low %v1485_v60, %v1489_v61  ;;  %v1541_v60 = vld [vmem:[#allocation19 + $0x410] sm:$0xff] }
 0x55a   :  { %3240 = vmatpush1.bf16.msra.mxu0 %v7318_v11  ;;  %3159 = vmatprep.subr.bf16.mxu1 %v7325_v13  ;;  %v7374_v11 = vcombine.low %v1486_v62, %v1490_v2  ;;  %v7381_v13 = vcombine.high %v1493_v7, %v1497_v8  ;;  %v1545_v61 = vld [vmem:[#allocation19 + $0x430] sm:$0xff]  ;;  %v1542_v62 = vld [vmem:[#allocation19 + $0x418] sm:$0xff] }
 0x55b   :  { %3241 = vmatprep.subr.bf16.mxu0 %v7327_v14  ;;  %v7383_v14 = vcombine.high %v1494_v9, %v1498_v10  ;;  %v1546_v2 = vld [vmem:[#allocation19 + $0x438] sm:$0xff] }
 0x55d   :  { %3160 = vmatpush1.bf16.msra.mxu1 %v7324_v18  ;;  %v7380_v18 = vcombine.low %v1493_v7, %v1497_v8  ;;  %v1549_v7 = vld [vmem:[#allocation19 + $0x450] sm:$0xff] }
 0x55e   :  { %3242 = vmatpush1.bf16.msra.mxu0 %v7326_v19  ;;  %3161 = vmatprep.subr.bf16.mxu1 %v7333_v20  ;;  %v7382_v19 = vcombine.low %v1494_v9, %v1498_v10  ;;  %v7389_v20 = vcombine.high %v1501_v15, %v1505_v16  ;;  %v1553_v8 = vld [vmem:[#allocation19 + $0x470] sm:$0xff]  ;;  %v7428_v9 = vcombine.low %v1541_v60, %v1545_v61  ;;  %v1550_v10 = vld [vmem:[#allocation19 + $0x458] sm:$0xff] }
 0x55f   :  { %3243 = vmatprep.subr.bf16.mxu0 %v7335_v21  ;;  %v7391_v21 = vcombine.high %v1502_v25, %v1506_v17 }
 0x561   :  { %3162 = vmatpush1.bf16.msra.mxu1 %v7332_v31  ;;  %v7388_v31 = vcombine.low %v1501_v15, %v1505_v16  ;;  %v1561_v15 = vld [vmem:[#allocation19 + $0x4b0] sm:$0xff] }
 0x562   :  { %3244 = vmatpush1.bf16.msra.mxu0 %v7334_v35  ;;  %3163 = vmatprep.subr.bf16.mxu1 %v7341_v37  ;;  %v7390_v35 = vcombine.low %v1502_v25, %v1506_v17  ;;  %v7397_v37 = vcombine.high %v1509_v22, %v1513_v23  ;;  %v1558_v25 = vld [vmem:[#allocation19 + $0x498] sm:$0xff] }
 0x563   :  { %3245 = vmatprep.subr.bf16.mxu0 %v7343_v39  ;;  %v7399_v39 = vcombine.high %v1510_v24, %v1514_v27  ;;  %v1562_v17 = vld [vmem:[#allocation19 + $0x4b8] sm:$0xff] }
 0x565   :  { %3164 = vmatpush1.bf16.msra.mxu1 %v7340_v43  ;;  %v7396_v43 = vcombine.low %v1509_v22, %v1513_v23  ;;  %v1565_v22 = vld [vmem:[#allocation19 + $0x4d0] sm:$0xff] }
 0x566   :  { %3246 = vmatpush1.bf16.msra.mxu0 %v7342_v44  ;;  %3165 = vmatprep.subr.bf16.mxu1 %v7349_v47  ;;  %v7398_v44 = vcombine.low %v1510_v24, %v1514_v27  ;;  %v7405_v47 = vcombine.high %v1517_v45, %v1521_v41  ;;  %v1569_v23 = vld [vmem:[#allocation19 + $0x4f0] sm:$0xff]  ;;  %v1566_v24 = vld [vmem:[#allocation19 + $0x4d8] sm:$0xff] }
 0x567   :  { %3247 = vmatprep.subr.bf16.mxu0 %v7351_v48  ;;  %v7407_v48 = vcombine.high %v1518_v46, %v1522_v42  ;;  %v1570_v27 = vld [vmem:[#allocation19 + $0x4f8] sm:$0xff] }
 0x569   :  { %3166 = vmatpush1.bf16.msra.mxu1 %v7348_v32  ;;  %v7404_v32 = vcombine.low %v1517_v45, %v1521_v41  ;;  %v1577_v45 = vld [vmem:[#allocation19 + $0x530] sm:$0xff]  ;;  %v1574_v41 = vld [vmem:[#allocation19 + $0x518] sm:$0xff] }
 0x56a   :  { %3248 = vmatpush1.bf16.msra.mxu0 %v7350_v33  ;;  %3167 = vmatprep.subr.bf16.mxu1 %v7357_v34  ;;  %v7406_v33 = vcombine.low %v1518_v46, %v1522_v42  ;;  %v7413_v34 = vcombine.high %v1525_v49, %v1529_v28  ;;  %v1578_v46 = vld [vmem:[#allocation19 + $0x538] sm:$0xff]  ;;  %v7454_v42 = vcombine.low %v1566_v24, %v1570_v27 }
 0x56b   :  { %3249 = vmatprep.subr.bf16.mxu0 %v7359_v51  ;;  %v7415_v51 = vcombine.high %v1526_v29, %v1530_v30 }
 0x56d   :  { %3168 = vmatpush1.bf16.msra.mxu1 %v7356_v50  ;;  %v7412_v50 = vcombine.low %v1525_v49, %v1529_v28  ;;  %v1582_v49 = vld [vmem:[#allocation19 + $0x558] sm:$0xff] }
 0x56e   :  { %3250 = vmatpush1.bf16.msra.mxu0 %v7358_v52  ;;  %3169 = vmatprep.subr.bf16.mxu1 %v7365_v58  ;;  %v7414_v52 = vcombine.low %v1526_v29, %v1530_v30  ;;  %v7421_v58 = vcombine.high %v1533_v53, %v1537_v54  ;;  %v1586_v28 = vld [vmem:[#allocation19 + $0x578] sm:$0xff]  ;;  %v7462_v30 = vcombine.low %v1574_v41, %v1578_v46 }
 0x56f   :  { %3251 = vmatprep.subr.bf16.mxu0 %v7367_v59  ;;  %v7423_v59 = vcombine.high %v1534_v55, %v1538_v56 }
 0x571   :  { %3170 = vmatpush1.bf16.msra.mxu1 %v7364_v3  ;;  %v7420_v3 = vcombine.low %v1533_v53, %v1537_v54  ;;  %v1590_v53 = vld [vmem:[#allocation19 + $0x598] sm:$0xff] }
 0x572   :  { %3252 = vmatpush1.bf16.msra.mxu0 %v7366_v4  ;;  %3171 = vmatprep.subr.bf16.mxu1 %v7373_v5  ;;  %v7422_v4 = vcombine.low %v1534_v55, %v1538_v56  ;;  %v7429_v5 = vcombine.high %v1541_v60, %v1545_v61  ;;  %v1594_v54 = vld [vmem:[#allocation19 + $0x5b8] sm:$0xff]  ;;  %v7470_v56 = vcombine.low %v1582_v49, %v1586_v28 }
 0x573   :  { %3253 = vmatprep.subr.bf16.mxu0 %v7375_v6  ;;  %v7431_v6 = vcombine.high %v1542_v62, %v1546_v2  ;;  %v1598_v60 = vld [vmem:[#allocation19 + $0x5d8] sm:$0xff] }
 0x574   :  { %v1602_v61 = vld [vmem:[#allocation19 + $0x5f8] sm:$0xff] }
 0x575   :  { %3172 = vmatpush1.bf16.msra.mxu1 %v7372_v12  ;;  %v1554_v12 = vld [vmem:[#allocation19 + $0x478] sm:$0xff] }
 0x576   :  { %3254 = vmatpush1.bf16.msra.mxu0 %v7374_v11  ;;  %3173 = vmatprep.subr.bf16.mxu1 %v7381_v13  ;;  %v7430_v11 = vcombine.low %v1542_v62, %v1546_v2  ;;  %v7437_v13 = vcombine.high %v1549_v7, %v1553_v8  ;;  %v7439_v16 = vcombine.high %v1550_v10, %v1554_v12 }
 0x577   :  { %3255 = vmatprep.subr.bf16.mxu0 %v7383_v14  ;;  %v1557_v14 = vld [vmem:[#allocation19 + $0x490] sm:$0xff]  ;;  %v7478_v2 = vcombine.low %v1590_v53, %v1594_v54 }
 0x579   :  { %3174 = vmatpush1.bf16.msra.mxu1 %v7380_v18  ;;  %v7436_v18 = vcombine.low %v1549_v7, %v1553_v8  ;;  %v1606_v7 = vld [vmem:[#allocation19 + $0x618] sm:$0xff] }
 0x57a   :  { %3256 = vmatpush1.bf16.msra.mxu0 %v7382_v19  ;;  %3175 = vmatprep.subr.bf16.mxu1 %v7389_v20  ;;  %v7438_v19 = vcombine.low %v1550_v10, %v1554_v12  ;;  %v7445_v20 = vcombine.high %v1557_v14, %v1561_v15  ;;  %v1610_v8 = vld [vmem:[#allocation19 + $0x638] sm:$0xff]  ;;  %v7486_v10 = vcombine.low %v1598_v60, %v1602_v61 }
 0x57b   :  { %3257 = vmatprep.subr.bf16.mxu0 %v7391_v21  ;;  %v7447_v21 = vcombine.high %v1558_v25, %v1562_v17 }
 0x57d   :  { %3176 = vmatpush1.bf16.msra.mxu1 %v7388_v31  ;;  %v7444_v31 = vcombine.low %v1557_v14, %v1561_v15  ;;  %v1617_v14 = vld [vmem:[#allocation19 + $0x670] sm:$0xff]  ;;  %v1614_v15 = vld [vmem:[#allocation19 + $0x658] sm:$0xff] }
 0x57e   :  { %3258 = vmatpush1.bf16.msra.mxu0 %v7390_v35  ;;  %3177 = vmatprep.subr.bf16.mxu1 %v7397_v37  ;;  %v7453_v35 = vcombine.high %v1565_v22, %v1569_v23  ;;  %v7455_v37 = vcombine.high %v1566_v24, %v1570_v27 }
 0x57f   :  { %3259 = vmatprep.subr.bf16.mxu0 %v7399_v39  ;;  %v1573_v39 = vld [vmem:[#allocation19 + $0x510] sm:$0xff] }
 0x580   :  { %v7460_v29 = vcombine.low %v1573_v39, %v1577_v45 }
 0x581   :  { %3178 = vmatpush1.bf16.msra.mxu1 %v7396_v43  ;;  %v7461_v43 = vcombine.high %v1573_v39, %v1577_v45  ;;  %v1630_v39 = vld [vmem:[#allocation19 + $0x6d8] sm:$0xff] }
 0x582   :  { %3260 = vmatpush1.bf16.msra.mxu0 %v7398_v44  ;;  %3179 = vmatprep.subr.bf16.mxu1 %v7405_v47  ;;  %v7463_v44 = vcombine.high %v1574_v41, %v1578_v46  ;;  %v1581_v47 = vld [vmem:[#allocation19 + $0x550] sm:$0xff]  ;;  %v1634_v45 = vld [vmem:[#allocation19 + $0x6f8] sm:$0xff] }
 0x583   :  { %3261 = vmatprep.subr.bf16.mxu0 %v7407_v48  ;;  %v1585_v48 = vld [vmem:[#allocation19 + $0x570] sm:$0xff] }
 0x584   :  { %v7468_v55 = vcombine.low %v1581_v47, %v1585_v48 }
 0x585   :  { %3180 = vmatpush1.bf16.msra.mxu1 %v7404_v32  ;;  %v7469_v32 = vcombine.high %v1581_v47, %v1585_v48  ;;  %v1638_v47 = vld [vmem:[#allocation19 + $0x718] sm:$0xff] }
 0x586   :  { %3262 = vmatpush1.bf16.msra.mxu0 %v7406_v33  ;;  %3181 = vmatprep.subr.bf16.mxu1 %v7413_v34  ;;  %v7471_v33 = vcombine.high %v1582_v49, %v1586_v28  ;;  %v1589_v34 = vld [vmem:[#allocation19 + $0x590] sm:$0xff]  ;;  %v1642_v48 = vld [vmem:[#allocation19 + $0x738] sm:$0xff]  ;;  %v7518_v28 = vcombine.low %v1630_v39, %v1634_v45 }
 0x587   :  { %3263 = vmatprep.subr.bf16.mxu0 %v7415_v51  ;;  %v1593_v51 = vld [vmem:[#allocation19 + $0x5b0] sm:$0xff] }
 0x588   :  { %v7476_v62 = vcombine.low %v1589_v34, %v1593_v51 }
 0x589   :  { %3182 = vmatpush1.bf16.msra.mxu1 %v7412_v50  ;;  %v7477_v50 = vcombine.high %v1589_v34, %v1593_v51  ;;  %v1646_v34 = vld [vmem:[#allocation19 + $0x758] sm:$0xff] }
 0x58a   :  { %3264 = vmatpush1.bf16.msra.mxu0 %v7414_v52  ;;  %3183 = vmatprep.subr.bf16.mxu1 %v7421_v58  ;;  %v7479_v52 = vcombine.high %v1590_v53, %v1594_v54  ;;  %v1597_v58 = vld [vmem:[#allocation19 + $0x5d0] sm:$0xff]  ;;  %v1650_v51 = vld [vmem:[#allocation19 + $0x778] sm:$0xff]  ;;  %v7526_v54 = vcombine.low %v1638_v47, %v1642_v48 }
 0x58b   :  { %3265 = vmatprep.subr.bf16.mxu0 %v7423_v59  ;;  %v1601_v59 = vld [vmem:[#allocation19 + $0x5f0] sm:$0xff] }
 0x58d   :  { %3184 = vmatpush1.bf16.msra.mxu1 %v7420_v3  ;;  %v7485_v3 = vcombine.high %v1597_v58, %v1601_v59 }
 0x58e   :  { %3266 = vmatpush1.bf16.msra.mxu0 %v7422_v4  ;;  %3194 = vmatprep.subr.bf16.mxu1 %v7429_v5  ;;  %v7487_v4 = vcombine.high %v1598_v60, %v1602_v61  ;;  %v1605_v5 = vld [vmem:[#allocation19 + $0x610] sm:$0xff]  ;;  %v7534_v61 = vcombine.low %v1646_v34, %v1650_v51 }
 0x58f   :  { %3276 = vmatprep.subr.bf16.mxu0 %v7431_v6  ;;  %v1609_v6 = vld [vmem:[#allocation19 + $0x630] sm:$0xff] }
 0x590   :  { %3186 = vmatmul.mubr.bf16.vlgmr.msra.gmra.mrb[8].mxu1 %v9947_v26  ;;  %v7493_v12 = vcombine.high %v1605_v5, %v1609_v6 }
 0x591   :  { %3268 = vmatmul.mubr.bf16.vlgmr.msra.gmra.mrb[20].mxu0 %v9947_v26  ;;  %3195 = vmatpush1.bf16.msra.mxu1 %v7428_v9  ;;  %v7446_v26 = vcombine.low %v1558_v25, %v1562_v17  ;;  %v7484_v9 = vcombine.low %v1597_v58, %v1601_v59  ;;  %v7492_v25 = vcombine.low %v1605_v5, %v1609_v6  ;;  %v1654_v58 = vld [vmem:[#allocation19 + $0x798] sm:$0xff] }
 0x592   :  { %3226 = vmatprep.mubr.bf16.mxu1 %v9953_v40  ;;  %3277 = vmatpush1.bf16.msra.mxu0 %v7430_v11  ;;  %v7495_v11 = vcombine.high %v1606_v7, %v1610_v8  ;;  %v7494_v17 = vcombine.low %v1606_v7, %v1610_v8  ;;  %v1658_v59 = vld [vmem:[#allocation19 + $0x7b8] sm:$0xff] }
 0x593   :  { %3308 = vmatprep.mubr.bf16.mxu0 %v9953_v40  ;;  %3196 = vmatprep.subr.bf16.mxu1 %v7437_v13  ;;  %v7452_v40 = vcombine.low %v1565_v22, %v1569_v23  ;;  %v1613_v13 = vld [vmem:[#allocation19 + $0x650] sm:$0xff]  ;;  %v1622_v22 = vld [vmem:[#allocation19 + $0x698] sm:$0xff]  ;;  %v7542_v8 = vcombine.low %v1654_v58, %v1658_v59 }
 0x594   :  { %3278 = vmatprep.subr.bf16.mxu0 %v7439_v16  ;;  %v1618_v16 = vld [vmem:[#allocation19 + $0x678] sm:$0xff]  ;;  %v7500_v24 = vcombine.low %v1613_v13, %v1617_v14 }
 0x595   :  { %3197 = vmatpush1.bf16.msra.mxu1 %v7436_v18  ;;  %v7501_v18 = vcombine.high %v1613_v13, %v1617_v14  ;;  %v1626_v23 = vld [vmem:[#allocation19 + $0x6b8] sm:$0xff]  ;;  %v7502_v27 = vcombine.low %v1614_v15, %v1618_v16  ;;  %v8385_v14 = vld [vmem:[#allocation25 + $0xc] ss:$28 sps:$4 sm:$0xff]  }
 0x596   :  { %3279 = vmatpush1.bf16.msra.mxu0 %v7438_v19  ;;  %3198 = vmatprep.subr.bf16.mxu1 %v7445_v20  ;;  %v7503_v19 = vcombine.high %v1614_v15, %v1618_v16  ;;  %v1621_v20 = vld [vmem:[#allocation19 + $0x690] sm:$0xff]  ;;  %v7510_v46 = vcombine.low %v1622_v22, %v1626_v23  ;;  %v1662_v5 = vld [vmem:[#allocation19 + $0x7d8] sm:$0xff] }
 0x597   :  { %3280 = vmatprep.subr.bf16.mxu0 %v7447_v21  ;;  %v1625_v21 = vld [vmem:[#allocation19 + $0x6b0] sm:$0xff]  ;;  %v1666_v6 = vld [vmem:[#allocation19 + $0x7f8] sm:$0xff] }
 0x598   :  { %v7508_v41 = vcombine.low %v1621_v20, %v1625_v21  ;;  %v8382_v13 = vld [vmem:[#allocation25 + $0x4] ss:$28 sps:$4 sm:$0xff]  }
 0x599   :  { %3199 = vmatpush1.bf16.msra.mxu1 %v7444_v31  ;;  %v7509_v31 = vcombine.high %v1621_v20, %v1625_v21  ;;  %v8380_v15 = vld [vmem:[#allocation25] ss:$28 sps:$4 sm:$0xff]   ;;  %v8383_v16 = vld [vmem:[#allocation25 + $0x8] ss:$28 sps:$4 sm:$0xff]   ;;  %v8394_v20 = vld [vmem:[#allocation25 + $0x74] ss:$28 sps:$4 sm:$0xff]  }
 0x59a   :  { %3281 = vmatpush1.bf16.msra.mxu0 %v7446_v26  ;;  %3200 = vmatprep.subr.bf16.mxu1 %v7453_v35  ;;  %v7511_v26 = vcombine.high %v1622_v22, %v1626_v23  ;;  %v1629_v35 = vld [vmem:[#allocation19 + $0x6d0] sm:$0xff]  ;;  %v8392_v22 = vld [vmem:[#allocation25 + $0x70] ss:$28 sps:$4 sm:$0xff]  }
 0x59b   :  { %3282 = vmatprep.subr.bf16.mxu0 %v7455_v37  ;;  %v1633_v37 = vld [vmem:[#allocation19 + $0x6f0] sm:$0xff] }
 0x59c   :  { %v7516_v49 = vcombine.low %v1629_v35, %v1633_v37  ;;  %v8397_v21 = vld [vmem:[#allocation25 + $0x7c] ss:$28 sps:$4 sm:$0xff]  }
 0x59d   :  { %3201 = vmatpush1.bf16.msra.mxu1 %v7452_v40  ;;  %v7517_v40 = vcombine.high %v1629_v35, %v1633_v37  ;;  %v8395_v23 = vld [vmem:[#allocation25 + $0x78] ss:$28 sps:$4 sm:$0xff]   ;;  %v8409_v35 = vld [vmem:[#allocation25 + $0xec] ss:$28 sps:$4 sm:$0xff]   ;;  %v8404_v37 = vld [vmem:[#allocation25 + $0xe0] ss:$28 sps:$4 sm:$0xff]  }
 0x59e   :  { %3283 = vmatpush1.bf16.msra.mxu0 %v7454_v42  ;;  %3202 = vmatprep.subr.bf16.mxu1 %v7461_v43  ;;  %v7519_v42 = vcombine.high %v1630_v39, %v1634_v45  ;;  %v1637_v43 = vld [vmem:[#allocation19 + $0x710] sm:$0xff]  ;;  %v8407_v39 = vld [vmem:[#allocation25 + $0xe8] ss:$28 sps:$4 sm:$0xff]  }
 0x59f   :  { %3284 = vmatprep.subr.bf16.mxu0 %v7463_v44  ;;  %v1641_v44 = vld [vmem:[#allocation19 + $0x730] sm:$0xff] }
 0x5a0   :  { %v7524_v53 = vcombine.low %v1637_v43, %v1641_v44  ;;  %v8412_v45 = vld [vmem:[#allocation25 + $0x11c] ss:$28 sps:$4 sm:$0xff]  }
 0x5a1   :  { %3203 = vmatpush1.bf16.msra.mxu1 %v7460_v29  ;;  %v7525_v29 = vcombine.high %v1637_v43, %v1641_v44  ;;  %v8421_v43 = vld [vmem:[#allocation25 + $0x15c] ss:$28 sps:$4 sm:$0xff]   ;;  %v8416_v44 = vld [vmem:[#allocation25 + $0x150] ss:$28 sps:$4 sm:$0xff]  }
 0x5a2   :  { %3285 = vmatpush1.bf16.msra.mxu0 %v7462_v30  ;;  %3204 = vmatprep.subr.bf16.mxu1 %v7469_v32  ;;  %v7527_v30 = vcombine.high %v1638_v47, %v1642_v48  ;;  %v1645_v32 = vld [vmem:[#allocation19 + $0x750] sm:$0xff]  ;;  %v8424_v48 = vld [vmem:[#allocation25 + $0x18c] ss:$28 sps:$4 sm:$0xff]  }
 0x5a3   :  { %3286 = vmatprep.subr.bf16.mxu0 %v7471_v33  ;;  %v1649_v33 = vld [vmem:[#allocation19 + $0x770] sm:$0xff] }
 0x5a4   :  { %v7532_v60 = vcombine.low %v1645_v32, %v1649_v33  ;;  %v8419_v47 = vld [vmem:[#allocation25 + $0x158] ss:$28 sps:$4 sm:$0xff]  }
 0x5a5   :  { %3205 = vmatpush1.bf16.msra.mxu1 %v7468_v55  ;;  %v7533_v55 = vcombine.high %v1645_v32, %v1649_v33  ;;  %v8433_v32 = vld [vmem:[#allocation25 + $0x1cc] ss:$28 sps:$4 sm:$0xff]   ;;  %v8428_v33 = vld [vmem:[#allocation25 + $0x1c0] ss:$28 sps:$4 sm:$0xff]  }
 0x5a6   :  { %3287 = vmatpush1.bf16.msra.mxu0 %v7470_v56  ;;  %3206 = vmatprep.subr.bf16.mxu1 %v7477_v50  ;;  %v7535_v56 = vcombine.high %v1646_v34, %v1650_v51  ;;  %v1653_v50 = vld [vmem:[#allocation19 + $0x790] sm:$0xff]  ;;  %v8431_v34 = vld [vmem:[#allocation25 + $0x1c8] ss:$28 sps:$4 sm:$0xff]  }
 0x5a7   :  { %3288 = vmatprep.subr.bf16.mxu0 %v7479_v52  ;;  %v1657_v52 = vld [vmem:[#allocation19 + $0x7b0] sm:$0xff] }
 0x5a8   :  { %v7540_v7 = vcombine.low %v1653_v50, %v1657_v52  ;;  %v8436_v51 = vld [vmem:[#allocation25 + $0x1fc] ss:$28 sps:$4 sm:$0xff]  }
 0x5a9   :  { %3207 = vmatpush1.bf16.msra.mxu1 %v7476_v62  ;;  %v7541_v62 = vcombine.high %v1653_v50, %v1657_v52  ;;  %v8445_v50 = vld [vmem:[#allocation25 + $0x23c] ss:$28 sps:$4 sm:$0xff]   ;;  %v8440_v52 = vld [vmem:[#allocation25 + $0x230] ss:$28 sps:$4 sm:$0xff]  }
 0x5aa   :  { %3289 = vmatpush1.bf16.msra.mxu0 %v7478_v2  ;;  %3208 = vmatprep.subr.bf16.mxu1 %v7485_v3  ;;  %v7543_v2 = vcombine.high %v1654_v58, %v1658_v59  ;;  %v1661_v3 = vld [vmem:[#allocation19 + $0x7d0] sm:$0xff]  ;;  %v8448_v59 = vld [vmem:[#allocation25 + $0x26c] ss:$28 sps:$4 sm:$0xff]  }
 0x5ab   :  { %3290 = vmatprep.subr.bf16.mxu0 %v7487_v4  ;;  %v1665_v4 = vld [vmem:[#allocation19 + $0x7f0] sm:$0xff] }
 0x5ac   :  { %v8443_v58 = vld [vmem:[#allocation25 + $0x238] ss:$28 sps:$4 sm:$0xff]  }
 0x5ad   :  { %3209 = vmatpush1.bf16.msra.mxu1 %v7484_v9  ;;  %v7549_v9 = vcombine.high %v1661_v3, %v1665_v4 }
 0x5ae   :  { %3291 = vmatpush1.bf16.msra.mxu0 %v7486_v10  ;;  %3210 = vmatprep.subr.bf16.mxu1 %v7493_v12  ;;  %v7551_v10 = vcombine.high %v1662_v5, %v1666_v6  ;;  %v7548_v12 = vcombine.low %v1661_v3, %v1665_v4  ;;  %v8457_v3 = vld [vmem:[#allocation25 + $0x2ac] ss:$28 sps:$4 sm:$0xff]   ;;  %v8452_v4 = vld [vmem:[#allocation25 + $0x2a0] ss:$28 sps:$4 sm:$0xff]  }
 0x5af   :  { %3292 = vmatprep.subr.bf16.mxu0 %v7495_v11  ;;  %v7550_v11 = vcombine.low %v1662_v5, %v1666_v6  ;;  %v8455_v5 = vld [vmem:[#allocation25 + $0x2a8] ss:$28 sps:$4 sm:$0xff]   ;;  %v8460_v6 = vld [vmem:[#allocation25 + $0x2dc] ss:$28 sps:$4 sm:$0xff]  }
 0x5b1   :  { %3211 = vmatpush1.bf16.msra.mxu1 %v7492_v25  ;;  %v8388_v25 = vld [vmem:[#allocation25 + $0x3c] ss:$28 sps:$4 sm:$0xff]  }
 0x5b2   :  { %3293 = vmatpush1.bf16.msra.mxu0 %v7494_v17  ;;  %3212 = vmatprep.subr.bf16.mxu1 %v7501_v18  ;;  %v8391_v17 = vld [vmem:[#allocation25 + $0x44] ss:$28 sps:$4 sm:$0xff]   ;;  %v8386_v18 = vld [vmem:[#allocation25 + $0x38] ss:$28 sps:$4 sm:$0xff]  }
 0x5b3   :  { %3294 = vmatprep.subr.bf16.mxu0 %v7503_v19  ;;  %v8389_v19 = vld [vmem:[#allocation25 + $0x40] ss:$28 sps:$4 sm:$0xff]  }
 0x5b5   :  { %3213 = vmatpush1.bf16.msra.mxu1 %v7500_v24  ;;  %v8400_v24 = vld [vmem:[#allocation25 + $0xac] ss:$28 sps:$4 sm:$0xff]  }
 0x5b6   :  { %3295 = vmatpush1.bf16.msra.mxu0 %v7502_v27  ;;  %3214 = vmatprep.subr.bf16.mxu1 %v7509_v31  ;;  %v8403_v27 = vld [vmem:[#allocation25 + $0xb4] ss:$28 sps:$4 sm:$0xff]   ;;  %v8398_v31 = vld [vmem:[#allocation25 + $0xa8] ss:$28 sps:$4 sm:$0xff]  }
 0x5b7   :  { %3296 = vmatprep.subr.bf16.mxu0 %v7511_v26  ;;  %v8406_v26 = vld [vmem:[#allocation25 + $0xe4] ss:$28 sps:$4 sm:$0xff]  }
 0x5b9   :  { %3215 = vmatpush1.bf16.msra.mxu1 %v7508_v41  ;;  %v8415_v41 = vld [vmem:[#allocation25 + $0x124] ss:$28 sps:$4 sm:$0xff]  }
 0x5ba   :  { %3297 = vmatpush1.bf16.msra.mxu0 %v7510_v46  ;;  %3216 = vmatprep.subr.bf16.mxu1 %v7517_v40  ;;  %v8410_v46 = vld [vmem:[#allocation25 + $0x118] ss:$28 sps:$4 sm:$0xff]   ;;  %v8413_v40 = vld [vmem:[#allocation25 + $0x120] ss:$28 sps:$4 sm:$0xff]  }
 0x5bb   :  { %3298 = vmatprep.subr.bf16.mxu0 %v7519_v42  ;;  %v8418_v42 = vld [vmem:[#allocation25 + $0x154] ss:$28 sps:$4 sm:$0xff]  }
 0x5bd   :  { %3217 = vmatpush1.bf16.msra.mxu1 %v7516_v49  ;;  %v8427_v49 = vld [vmem:[#allocation25 + $0x194] ss:$28 sps:$4 sm:$0xff]  }
 0x5be   :  { %3299 = vmatpush1.bf16.msra.mxu0 %v7518_v28  ;;  %3218 = vmatprep.subr.bf16.mxu1 %v7525_v29  ;;  %v8422_v28 = vld [vmem:[#allocation25 + $0x188] ss:$28 sps:$4 sm:$0xff]   ;;  %v8425_v29 = vld [vmem:[#allocation25 + $0x190] ss:$28 sps:$4 sm:$0xff]  }
 0x5bf   :  { %3300 = vmatprep.subr.bf16.mxu0 %v7527_v30  ;;  %v8430_v30 = vld [vmem:[#allocation25 + $0x1c4] ss:$28 sps:$4 sm:$0xff]  }
 0x5c1   :  { %3219 = vmatpush1.bf16.msra.mxu1 %v7524_v53  ;;  %v8439_v53 = vld [vmem:[#allocation25 + $0x204] ss:$28 sps:$4 sm:$0xff]  }
 0x5c2   :  { %3301 = vmatpush1.bf16.msra.mxu0 %v7526_v54  ;;  %3220 = vmatprep.subr.bf16.mxu1 %v7533_v55  ;;  %v8434_v54 = vld [vmem:[#allocation25 + $0x1f8] ss:$28 sps:$4 sm:$0xff]   ;;  %v8437_v55 = vld [vmem:[#allocation25 + $0x200] ss:$28 sps:$4 sm:$0xff]  }
 0x5c3   :  { %3302 = vmatprep.subr.bf16.mxu0 %v7535_v56  ;;  %v8442_v56 = vld [vmem:[#allocation25 + $0x234] ss:$28 sps:$4 sm:$0xff]  }
 0x5c5   :  { %3221 = vmatpush1.bf16.msra.mxu1 %v7532_v60  ;;  %v8451_v60 = vld [vmem:[#allocation25 + $0x274] ss:$28 sps:$4 sm:$0xff]  }
 0x5c6   :  { %3303 = vmatpush1.bf16.msra.mxu0 %v7534_v61  ;;  %3222 = vmatprep.subr.bf16.mxu1 %v7541_v62  ;;  %v8446_v61 = vld [vmem:[#allocation25 + $0x268] ss:$28 sps:$4 sm:$0xff]   ;;  %v8449_v62 = vld [vmem:[#allocation25 + $0x270] ss:$28 sps:$4 sm:$0xff]  }
 0x5c7   :  { %3304 = vmatprep.subr.bf16.mxu0 %v7543_v2  ;;  %v8454_v2 = vld [vmem:[#allocation25 + $0x2a4] ss:$28 sps:$4 sm:$0xff]  }
 0x5c9   :  { %3223 = vmatpush1.bf16.msra.mxu1 %v7540_v7  ;;  %v8463_v7 = vld [vmem:[#allocation25 + $0x2e4] ss:$28 sps:$4 sm:$0xff]  }
 0x5ca   :  { %3305 = vmatpush1.bf16.msra.mxu0 %v7542_v8  ;;  %3224 = vmatprep.subr.bf16.mxu1 %v7549_v9  ;;  %v8458_v8 = vld [vmem:[#allocation25 + $0x2d8] ss:$28 sps:$4 sm:$0xff]   ;;  %v8461_v9 = vld [vmem:[#allocation25 + $0x2e0] ss:$28 sps:$4 sm:$0xff]  }
 0x5cb   :  { %3306 = vmatprep.subr.bf16.mxu0 %v7551_v10  ;;  %v8466_v10 = vld [vmem:[#allocation25 + $0x314] ss:$28 sps:$4 sm:$0xff]  }
 0x5cd   :  { %3225 = vmatpush1.bf16.msra.mxu1 %v7548_v12  ;;  %v8469_v12 = vld [vmem:[#allocation25 + $0x31c] ss:$28 sps:$4 sm:$0xff]  }
 0x5ce   :  { %3307 = vmatpush1.bf16.msra.mxu0 %v7550_v11  ;;  %6518 = vmatprep.subr.bf16.mxu1 %v8382_v13  ;;  %v8464_v11 = vld [vmem:[#allocation25 + $0x310] ss:$28 sps:$4 sm:$0xff]   ;;  %v8467_v13 = vld [vmem:[#allocation25 + $0x318] ss:$28 sps:$4 sm:$0xff]  }
 0x5cf   :  { %6682 = vmatprep.subr.bf16.mxu0 %v8385_v14  ;;  %v8472_v14 = vld [vmem:[#allocation25 + $0x34c] ss:$28 sps:$4 sm:$0xff]  }
 0x5d0   :  { %3227 = vmatmul.mubr.bf16.vlgmr.msra.gmra.mrb[8].mxu1 %v9968_v57 }
 0x5d1   :  { %3309 = vmatmul.mubr.bf16.vlgmr.msra.gmra.mrb[20].mxu0 %v9968_v57  ;;  %6519 = vmatpush1.bf16.msra.mxu1 %v8380_v15  ;;  %v8401_v57 = vld [vmem:[#allocation25 + $0xb0] ss:$28 sps:$4 sm:$0xff]  }
 0x5d2   :  { %6683 = vmatpush1.bf16.msra.mxu0 %v8383_v16  ;;  %6520 = vmatprep.subr.bf16.mxu1 %v8388_v25  ;;  %v8475_v15 = vld [vmem:[#allocation25 + $0x354] ss:$28 sps:$4 sm:$0xff]   ;;  %v8470_v16 = vld [vmem:[#allocation25 + $0x348] ss:$28 sps:$4 sm:$0xff]  }
 0x5d3   :  { %6684 = vmatprep.subr.bf16.mxu0 %v8391_v17  ;;  %v8473_v25 = vld [vmem:[#allocation25 + $0x350] ss:$28 sps:$4 sm:$0xff]   ;;  %v8478_v17 = vld [vmem:[#allocation25 + $0x384] ss:$28 sps:$4 sm:$0xff]  }
 0x5d5   :  { %6521 = vmatpush1.bf16.msra.mxu1 %v8386_v18  ;;  %v8481_v18 = vld [vmem:[#allocation25 + $0x38c] ss:$28 sps:$4 sm:$0xff]  }
 0x5d6   :  { %6685 = vmatpush1.bf16.msra.mxu0 %v8389_v19  ;;  %6522 = vmatprep.subr.bf16.mxu1 %v8394_v20  ;;  %v9980_v19 = vld [vmem:[#allocation21] sm:$0xff] }
 0x5d7   :  { %6686 = vmatprep.subr.bf16.mxu0 %v8397_v21  ;;  %v1672_v20 = vrot.slane %v9980_v19, %v9870_v0  ;;  %v1676_v21 = vrot.slane %v9980_v19, %v9873_v1 }
 0x5d9   :  { %6523 = vmatpush1.bf16.msra.mxu1 %v8392_v22  ;;  %v1684_v22 = vrot.slane %v9980_v19, %v9901_v38 }
 0x5da   :  { %6687 = vmatpush1.bf16.msra.mxu0 %v8395_v23  ;;  %6524 = vmatprep.subr.bf16.mxu1 %v8400_v24 }
 0x5db   :  { %6688 = vmatprep.subr.bf16.mxu0 %v8403_v27 }
 0x5dd   :  { %6525 = vmatpush1.bf16.msra.mxu1 %v8398_v31 }
 0x5de   :  { %6689 = vmatpush1.bf16.msra.mxu0 %v8401_v57  ;;  %6526 = vmatprep.subr.bf16.mxu1 %v8406_v26 }
 0x5df   :  { %6690 = vmatprep.subr.bf16.mxu0 %v8409_v35 }
 0x5e1   :  { %6527 = vmatpush1.bf16.msra.mxu1 %v8404_v37 }
 0x5e2   :  { %6691 = vmatpush1.bf16.msra.mxu0 %v8407_v39  ;;  %6528 = vmatprep.subr.bf16.mxu1 %v8412_v45 }
 0x5e3   :  { %6692 = vmatprep.subr.bf16.mxu0 %v8415_v41 }
 0x5e5   :  { %6529 = vmatpush1.bf16.msra.mxu1 %v8410_v46 }
 0x5e6   :  { %6693 = vmatpush1.bf16.msra.mxu0 %v8413_v40  ;;  %6530 = vmatprep.subr.bf16.mxu1 %v8418_v42 }
 0x5e7   :  { %6694 = vmatprep.subr.bf16.mxu0 %v8421_v43 }
 0x5e9   :  { %6531 = vmatpush1.bf16.msra.mxu1 %v8416_v44 }
 0x5ea   :  { %6695 = vmatpush1.bf16.msra.mxu0 %v8419_v47  ;;  %6532 = vmatprep.subr.bf16.mxu1 %v8424_v48 }
 0x5eb   :  { %6696 = vmatprep.subr.bf16.mxu0 %v8427_v49 }
 0x5ed   :  { %6533 = vmatpush1.bf16.msra.mxu1 %v8422_v28 }
 0x5ee   :  { %6697 = vmatpush1.bf16.msra.mxu0 %v8425_v29  ;;  %6534 = vmatprep.subr.bf16.mxu1 %v8430_v30 }
 0x5ef   :  { %6698 = vmatprep.subr.bf16.mxu0 %v8433_v32 }
 0x5f1   :  { %6535 = vmatpush1.bf16.msra.mxu1 %v8428_v33 }
 0x5f2   :  { %6699 = vmatpush1.bf16.msra.mxu0 %v8431_v34  ;;  %6536 = vmatprep.subr.bf16.mxu1 %v8436_v51 }
 0x5f3   :  { %6700 = vmatprep.subr.bf16.mxu0 %v8439_v53 }
 0x5f5   :  { %6537 = vmatpush1.bf16.msra.mxu1 %v8434_v54 }
 0x5f6   :  { %6701 = vmatpush1.bf16.msra.mxu0 %v8437_v55  ;;  %6538 = vmatprep.subr.bf16.mxu1 %v8442_v56 }
 0x5f7   :  { %6702 = vmatprep.subr.bf16.mxu0 %v8445_v50 }
 0x5f9   :  { %6539 = vmatpush1.bf16.msra.mxu1 %v8440_v52 }
 0x5fa   :  { %6703 = vmatpush1.bf16.msra.mxu0 %v8443_v58  ;;  %6540 = vmatprep.subr.bf16.mxu1 %v8448_v59 }
 0x5fb   :  { %6704 = vmatprep.subr.bf16.mxu0 %v8451_v60 }
 0x5fd   :  { %6541 = vmatpush1.bf16.msra.mxu1 %v8446_v61 }
 0x5fe   :  { %6705 = vmatpush1.bf16.msra.mxu0 %v8449_v62  ;;  %6542 = vmatprep.subr.bf16.mxu1 %v8454_v2 }
 0x5ff   :  { %6706 = vmatprep.subr.bf16.mxu0 %v8457_v3 }
 0x601   :  { %6543 = vmatpush1.bf16.msra.mxu1 %v8452_v4 }
 0x602   :  { %6707 = vmatpush1.bf16.msra.mxu0 %v8455_v5  ;;  %6544 = vmatprep.subr.bf16.mxu1 %v8460_v6 }
 0x603   :  { %6708 = vmatprep.subr.bf16.mxu0 %v8463_v7 }
 0x605   :  { %6545 = vmatpush1.bf16.msra.mxu1 %v8458_v8 }
 0x606   :  { %6709 = vmatpush1.bf16.msra.mxu0 %v8461_v9  ;;  %6546 = vmatprep.subr.bf16.mxu1 %v8466_v10 }
 0x607   :  { %6710 = vmatprep.subr.bf16.mxu0 %v8469_v12 }
 0x609   :  { %6547 = vmatpush1.bf16.msra.mxu1 %v8464_v11 }
 0x60a   :  { %6711 = vmatpush1.bf16.msra.mxu0 %v8467_v13  ;;  %6548 = vmatprep.subr.bf16.mxu1 %v8472_v14 }
 0x60b   :  { %6712 = vmatprep.subr.bf16.mxu0 %v8475_v15 }
 0x60d   :  { %6549 = vmatpush1.bf16.msra.mxu1 %v8470_v16 }
 0x60e   :  { %6713 = vmatpush1.bf16.msra.mxu0 %v8473_v25  ;;  %6559 = vmatprep.subr.bf16.mxu1 %v8478_v17 }
 0x60f   :  { %6723 = vmatprep.subr.bf16.mxu0 %v8481_v18 }
 0x623   :  { %v3064_v23 = vpop.f32.mrb[4].mxu1  ;;  %v9988_v24 = vpop.f32.mrb[16].mxu0 }
 0x624   :  { %v9990_v27 = vadd.f32 %v3064_v23, %v1672_v20  ;;  %v3066_v31 = vpop.f32.mrb[5].mxu1  ;;  %v3148_v57 = vpop.f32.mrb[17].mxu0  ;;  %v1680_v20 = vrot.slane %v9980_v19, %v9898_v36 }
 0x625   :  { %v9992_v26 = vadd.f32 %v3066_v31, %v1676_v21  ;;  %v9994_v35 = vadd.f32 %v3148_v57, %v1684_v22  ;;  %v3068_v37 = vpop.f32.mrb[6].mxu1  ;;  %v3150_v39 = vpop.f32.mrb[18].mxu0 }
 0x626   :  { %v3319_v45 = vrot.slane %v9990_v27, 4  ;;  %v3375_v41 = vmul.f32 %v9990_v27, %v9990_v27  ;;  %v3069_v46 = vpop.f32.mrb[7].mxu1  ;;  %v3151_v40 = vpop.f32.mrb[19].mxu0 }
 0x627   :  { %v3325_v42 = vrot.slane %v9992_v26, 4  ;;  %v3376_v43 = vmul.f32 %v9992_v26, %v9992_v26  ;;  %v3337_v44 = vrot.slane %v9994_v35, 4  ;;  %v3378_v47 = vmul.f32 %v9994_v35, %v9994_v35 }
 0x628   :  { %v3320_v48 = vadd.f32 %v9990_v27, %v3319_v45  ;;  %v3383_v49 = vrot.slane %v3375_v41, 4 }
 0x629   :  { %v3326_v28 = vadd.f32 %v9992_v26, %v3325_v42  ;;  %v3389_v29 = vrot.slane %v3376_v43, 4  ;;  %v3338_v30 = vadd.f32 %v9994_v35, %v3337_v44  ;;  %v3401_v32 = vrot.slane %v3378_v47, 4  ;;  %v10016_v44 = vld [vmem:[#allocation22] sm:$0xff] }
 0x62a   :  { %v3321_v33 = vrot.slane %v3320_v48, 2  ;;  %v3384_v34 = vadd.f32 %v3383_v49, %v3375_v41  ;;  %v10011_v41 = vadd.f32 %v9988_v24, %v1680_v20 }
 0x62b   :  { %v3327_v51 = vrot.slane %v3326_v28, 2  ;;  %v3390_v53 = vadd.f32 %v3389_v29, %v3376_v43  ;;  %v3339_v54 = vrot.slane %v3338_v30, 2  ;;  %v3402_v55 = vadd.f32 %v3401_v32, %v3378_v47  ;;  %v10018_v47 = vld [vmem:[#allocation24] sm:$0xff] }
 0x62c   :  { %v3322_v56 = vadd.f32 %v3321_v33, %v3320_v48  ;;  %v3385_v50 = vrot.slane %v3384_v34, 2  ;;  %v3331_v42 = vrot.slane %v10011_v41, 4  ;;  %v3377_v43 = vmul.f32 %v10011_v41, %v10011_v41 }
 0x62d   :  { %v3328_v52 = vadd.f32 %v3327_v51, %v3326_v28  ;;  %v3391_v58 = vrot.slane %v3390_v53, 2  ;;  %v3340_v59 = vadd.f32 %v3339_v54, %v3338_v30  ;;  %v3403_v60 = vrot.slane %v3402_v55, 2 }
 0x62e   :  { %v3323_v61 = vrot.slane %v3322_v56, 1  ;;  %v3386_v62 = vadd.f32 %v3385_v50, %v3384_v34  ;;  %v3332_v48 = vadd.f32 %v10011_v41, %v3331_v42  ;;  %v3395_v49 = vrot.slane %v3377_v43, 4 }
 0x62f   :  { %v3329_v2 = vrot.slane %v3328_v52, 1  ;;  %v3392_v3 = vadd.f32 %v3391_v58, %v3390_v53  ;;  %v3341_v4 = vrot.slane %v3340_v59, 1  ;;  %v3404_v5 = vadd.f32 %v3403_v60, %v3402_v55 }
 0x630   :  { %v3324_v6 = vadd.f32 %v3323_v61, %v3322_v56  ;;  %v3387_v7 = vrot.slane %v3386_v62, 1  ;;  %v3491_v28 = vrot.slane %v10016_v44, %v9870_v0  ;;  %v3540_v30 = vrot.slane %v10018_v47, %v9870_v0 }
 0x631   :  { %v3330_v8 = vadd.f32 %v3329_v2, %v3328_v52  ;;  %v3393_v9 = vrot.slane %v3392_v3, 1  ;;  %v3342_v10 = vadd.f32 %v3341_v4, %v3340_v59  ;;  %v3405_v12 = vrot.slane %v3404_v5, 1 }
 0x632   :  { %v3367_v11 = vmul.f32 0.125, %v3324_v6  ;;  %v3388_v13 = vadd.f32 %v3387_v7, %v3386_v62  ;;  %v3495_v32 = vrot.slane %v10016_v44, %v9873_v1  ;;  %v3333_v34 = vrot.slane %v3332_v48, 2 }
 0x633   :  { %v3368_v14 = vmul.f32 0.125, %v3330_v8  ;;  %v3394_v15 = vadd.f32 %v3393_v9, %v3392_v3  ;;  %v3370_v16 = vmul.f32 0.125, %v3342_v10  ;;  %v3406_v25 = vadd.f32 %v3405_v12, %v3404_v5 }
 0x634   :  { %v3431_v17 = vmul.f32 0.125, %v3388_v13  ;;  %v3439_v18 = vmul.f32 %v3367_v11, %v3367_v11  ;;  %v3455_v24 = vsub.f32 %v9990_v27, %v3367_v11  ;;  %v3396_v51 = vadd.f32 %v3395_v49, %v3377_v43 }
 0x635   :  { %v3432_v21 = vmul.f32 0.125, %v3394_v15  ;;  %v3440_v22 = vmul.f32 %v3368_v14, %v3368_v14  ;;  %v3434_v31 = vmul.f32 0.125, %v3406_v25  ;;  %v3442_v57 = vmul.f32 %v3370_v16, %v3370_v16 }
 0x636   :  { %v3447_v23 = vsub.f32 %v3431_v17, %v3439_v18  ;;  %v3456_v53 = vsub.f32 %v9992_v26, %v3368_v14  ;;  %v3458_v55 = vsub.f32 %v9994_v35, %v3370_v16  ;;  %v3503_v27 = vrot.slane %v10016_v44, %v9901_v38 }
 0x637   :  { %v3448_v37 = vsub.f32 %v3432_v21, %v3440_v22  ;;  %v3450_v45 = vsub.f32 %v3434_v31, %v3442_v57  ;;  %v3544_v58 = vrot.slane %v10018_v47, %v9873_v1  ;;  %v3552_v60 = vrot.slane %v10018_v47, %v9901_v38 }
 0x638   :  { %v3463_v39 = vadd.f32 0.8, %v3447_v23  ;;  %v3334_v62 = vadd.f32 %v3333_v34, %v3332_v48  ;;  %v3397_v2 = vrot.slane %v3396_v51, 2 }
 0x639   :  { %v3464_v46 = vadd.f32 0.8, %v3448_v37  ;;  %v3466_v40 = vadd.f32 0.8, %v3450_v45 }
 0x63a   :  { %9046 = vrsqrt.f32 %v3463_v39  ;;  %v3335_v6 = vrot.slane %v3334_v62, 1  ;;  %v3398_v7 = vadd.f32 %v3397_v2, %v3396_v51 }
 0x63b   :  { %9048 = vrsqrt.f32 %v3464_v46 }
 0x63c   :  { %9050 = vrsqrt.f32 %v3466_v40  ;;  %v3336_v14 = vadd.f32 %v3335_v6, %v3334_v62  ;;  %v3399_v15 = vrot.slane %v3398_v7, 1  ;;  %v8491_v62 = vld [vmem:[#allocation25 + $0x3f8] ss:$28 sps:$4 sm:$0xff]   ;;  %v8494_v6 = vld [vmem:[#allocation25 + $0x428] ss:$28 sps:$4 sm:$0xff]  }
 0x63e   :  { %v3369_v22 = vmul.f32 0.125, %v3336_v14  ;;  %v3400_v23 = vadd.f32 %v3399_v15, %v3398_v7  ;;  %v8497_v7 = vld [vmem:[#allocation25 + $0x430] ss:$28 sps:$4 sm:$0xff]   ;;  %v8511_v14 = vld [vmem:[#allocation25 + $0x4a4] ss:$28 sps:$4 sm:$0xff]  }
 0x640   :  { %v3433_v37 = vmul.f32 0.125, %v3400_v23  ;;  %v3441_v39 = vmul.f32 %v3369_v22, %v3369_v22  ;;  %v8520_v23 = vld [vmem:[#allocation25 + $0x50c] ss:$28 sps:$4 sm:$0xff]  }
 0x642   :  { %v3449_v45 = vsub.f32 %v3433_v37, %v3441_v39  ;;  %v8521_v37 = vld [vmem:[#allocation25 + $0x510] ss:$28 sps:$4 sm:$0xff]  }
 0x644   :  { %v9047_v29 = vpop.eup %9046  ;;  %v3465_v43 = vadd.f32 0.8, %v3449_v45  ;;  %v8526_v45 = vld [vmem:[#allocation25 + $0x544] ss:$28 sps:$4 sm:$0xff]  }
 0x645   :  { %v3479_v33 = vmul.f32 %v9047_v29, %v3455_v24  ;;  %v9049_v54 = vpop.eup %9048 }
 0x646   :  { %v9051_v56 = vpop.eup %9050  ;;  %v3480_v52 = vmul.f32 %v9049_v54, %v3456_v53  ;;  %v8476_v53 = vld [vmem:[#allocation25 + $0x380] ss:$28 sps:$4 sm:$0xff]   ;;  %v8479_v54 = vld [vmem:[#allocation25 + $0x388] ss:$28 sps:$4 sm:$0xff]  }
 0x647   :  { %v3528_v50 = vmul.f32 %v3491_v28, %v3479_v33  ;;  %v3482_v59 = vmul.f32 %v9051_v56, %v3458_v55  ;;  %v8487_v56 = vld [vmem:[#allocation25 + $0x3c4] ss:$28 sps:$4 sm:$0xff]  }
 0x648   :  { %v3529_v26 = vmul.f32 %v3495_v32, %v3480_v52  ;;  %v8482_v52 = vld [vmem:[#allocation25 + $0x3b8] ss:$28 sps:$4 sm:$0xff]  }
 0x649   :  { %v3577_v61 = vadd.f32 %v3540_v30, %v3528_v50  ;;  %v3531_v3 = vmul.f32 %v3503_v27, %v3482_v59  ;;  %v8484_v27 = vld [vmem:[#allocation25 + $0x3bc] ss:$28 sps:$4 sm:$0xff]   ;;  %v8490_v59 = vld [vmem:[#allocation25 + $0x3f4] ss:$28 sps:$4 sm:$0xff]  }
 0x64a   :  { %v3578_v4 = vadd.f32 %v3544_v58, %v3529_v26  ;;  %v8485_v58 = vld [vmem:[#allocation25 + $0x3c0] ss:$28 sps:$4 sm:$0xff]   ;;  %v8496_v26 = vld [vmem:[#allocation25 + $0x42c] ss:$28 sps:$4 sm:$0xff]  }
 0x64b   :  { %v3593_v35 = vmul.f32 0.044715, %v3577_v61  ;;  %v3580_v5 = vadd.f32 %v3552_v60, %v3531_v3  ;;  %v3585_v48 = vmul.f32 0.5, %v3577_v61  ;;  %v8493_v60 = vld [vmem:[#allocation25 + $0x3fc] ss:$28 sps:$4 sm:$0xff]  }
 0x64c   :  { %v3594_v8 = vmul.f32 0.044715, %v3578_v4  ;;  %v3586_v24 = vmul.f32 0.5, %v3578_v4  ;;  %v8499_v3 = vld [vmem:[#allocation25 + $0x434] ss:$28 sps:$4 sm:$0xff]  }
 0x64d   :  { %v3601_v9 = vmul.f32 %v3593_v35, %v3577_v61  ;;  %v3596_v10 = vmul.f32 0.044715, %v3580_v5  ;;  %v3588_v30 = vmul.f32 0.5, %v3580_v5 }
 0x64e   :  { %v3602_v12 = vmul.f32 %v3594_v8, %v3578_v4  ;;  %v8502_v8 = vld [vmem:[#allocation25 + $0x464] ss:$28 sps:$4 sm:$0xff]  }
 0x64f   :  { %v3609_v11 = vmul.f32 %v3601_v9, %v3577_v61  ;;  %v3604_v13 = vmul.f32 %v3596_v10, %v3580_v5  ;;  %v8505_v9 = vld [vmem:[#allocation25 + $0x46c] ss:$28 sps:$4 sm:$0xff]  }
 0x650   :  { %v3610_v16 = vmul.f32 %v3602_v12, %v3578_v4  ;;  %v3548_v12 = vrot.slane %v10018_v47, %v9898_v36 }
 0x651   :  { %v3617_v25 = vadd.f32 %v3609_v11, %v3577_v61  ;;  %v3612_v17 = vmul.f32 %v3604_v13, %v3580_v5  ;;  %v8488_v61 = vld [vmem:[#allocation25 + $0x3f0] ss:$28 sps:$4 sm:$0xff]   ;;  %v8500_v11 = vld [vmem:[#allocation25 + $0x460] ss:$28 sps:$4 sm:$0xff]  }
 0x652   :  { %v3618_v18 = vadd.f32 %v3610_v16, %v3578_v4  ;;  %v3457_v4 = vsub.f32 %v10011_v41, %v3369_v22  ;;  %v8503_v41 = vld [vmem:[#allocation25 + $0x468] ss:$28 sps:$4 sm:$0xff]   ;;  %v8508_v13 = vld [vmem:[#allocation25 + $0x49c] ss:$28 sps:$4 sm:$0xff]  }
 0x653   :  { %v3625_v20 = vmul.f32 0.7978846, %v3617_v25  ;;  %v3620_v21 = vadd.f32 %v3612_v17, %v3580_v5  ;;  %v3499_v5 = vrot.slane %v10016_v44, %v9898_v36  ;;  %v8506_v16 = vld [vmem:[#allocation25 + $0x498] ss:$28 sps:$4 sm:$0xff]   ;;  %v8509_v25 = vld [vmem:[#allocation25 + $0x4a0] ss:$28 sps:$4 sm:$0xff]  }
 0x654   :  { %v3626_v31 = vmul.f32 0.7978846, %v3618_v18  ;;  %v8514_v17 = vld [vmem:[#allocation25 + $0x4d4] ss:$28 sps:$4 sm:$0xff]   ;;  %v8517_v18 = vld [vmem:[#allocation25 + $0x4dc] ss:$28 sps:$4 sm:$0xff]  }
 0x655   :  { %9052 = vtanh.f32 %v3625_v20  ;;  %v3628_v57 = vmul.f32 0.7978846, %v3620_v21  ;;  %v8512_v20 = vld [vmem:[#allocation25 + $0x4d0] ss:$28 sps:$4 sm:$0xff]   ;;  %v8515_v21 = vld [vmem:[#allocation25 + $0x4d8] ss:$28 sps:$4 sm:$0xff]  }
 0x656   :  { %9054 = vtanh.f32 %v3626_v31  ;;  %v8523_v31 = vld [vmem:[#allocation25 + $0x514] ss:$28 sps:$4 sm:$0xff]  }
 0x657   :  { %9056 = vtanh.f32 %v3628_v57  ;;  %v8518_v57 = vld [vmem:[#allocation25 + $0x508] ss:$28 sps:$4 sm:$0xff]  }
 0x658   :  { %9058 = vrsqrt.f32 %v3465_v43 }
 0x65f   :  { %v9053_v46 = vpop.eup %9052 }
 0x660   :  { %v3641_v40 = vadd.f32 1.0, %v9053_v46  ;;  %v9055_v42 = vpop.eup %9054  ;;  %v8529_v46 = vld [vmem:[#allocation25 + $0x54c] ss:$28 sps:$4 sm:$0xff]  }
 0x661   :  { %v9057_v49 = vpop.eup %9056  ;;  %v3642_v28 = vadd.f32 1.0, %v9055_v42  ;;  %v8527_v42 = vld [vmem:[#allocation25 + $0x548] ss:$28 sps:$4 sm:$0xff]  }
 0x662   :  { %v3649_v29 = vmul.f32 %v3641_v40, %v3585_v48  ;;  %v3644_v32 = vadd.f32 1.0, %v9057_v49  ;;  %v9059_v2 = vpop.eup %9058  ;;  %v8524_v40 = vld [vmem:[#allocation25 + $0x540] ss:$28 sps:$4 sm:$0xff]  }
 0x663   :  { %v3650_v33 = vmul.f32 %v3642_v28, %v3586_v24  ;;  %v3481_v35 = vmul.f32 %v9059_v2, %v3457_v4  ;;  %v8532_v48 = vld [vmem:[#allocation25 + $0x57c] ss:$28 sps:$4 sm:$0xff]   ;;  %v8535_v49 = vld [vmem:[#allocation25 + $0x584] ss:$28 sps:$4 sm:$0xff]   ;;  %v8562_v4 = vld [vmem:[#allocation25 + $0x694] ss:$28 sps:$4 sm:$0xff]  }
 0x664   :  { %v3652_v34 = vmul.f32 %v3644_v32, %v3588_v30  ;;  %v10038_v55 = vpack.c.bf16 %v3649_v29, %v3649_v29  ;;  %v8530_v24 = vld [vmem:[#allocation25 + $0x578] ss:$28 sps:$4 sm:$0xff]   ;;  %v8533_v28 = vld [vmem:[#allocation25 + $0x580] ss:$28 sps:$4 sm:$0xff]  }
 0x665   :  { %v10036_v51 = vpack.c.bf16 %v3650_v33, %v3650_v33  ;;  %v3530_v10 = vmul.f32 %v3499_v5, %v3481_v35  ;;  %v8538_v30 = vld [vmem:[#allocation25 + $0x5b4] ss:$28 sps:$4 sm:$0xff]   ;;  %v8541_v32 = vld [vmem:[#allocation25 + $0x5bc] ss:$28 sps:$4 sm:$0xff]   ;;  %v8559_v2 = vld [vmem:[#allocation25 + $0x664] ss:$28 sps:$4 sm:$0xff]  }
 0x666   :  { %v10044_v50 = vpack.c.bf16 %v3652_v34, %v3652_v34  ;;  %v8536_v33 = vld [vmem:[#allocation25 + $0x5b0] ss:$28 sps:$4 sm:$0xff]   ;;  %v8539_v34 = vld [vmem:[#allocation25 + $0x5b8] ss:$28 sps:$4 sm:$0xff]  }
 0x667   :  { %6550 = vmatprep.mubr.bf16.mxu1 %v10036_v51  ;;  %6714 = vmatprep.mubr.bf16.mxu0 %v10036_v51  ;;  %v10053_v15 = vadd.f32 %v3548_v12, %v3530_v10  ;;  %v8565_v35 = vld [vmem:[#allocation25 + $0x69c] ss:$28 sps:$4 sm:$0xff]   ;;  %v10066_v10 = vsub.s32 7, %v9867_v63  ;;  %v8568_v12 = vld [vmem:[#allocation25 + $0x6cc] ss:$28 sps:$4 sm:$0xff]  }
 0x668   :  { %6551 = vmatmul.mubr.bf16.vlgmr.msra.gmra.mrb[12].mxu1 %v10038_v55  ;;  %6715 = vmatmul.mubr.bf16.vlgmr.msra.gmra.mrb[24].mxu0 %v10038_v55 }
 0x669   :  { %6560 = vmatpush1.bf16.msra.mxu1 %v8476_v53  ;;  %6724 = vmatpush1.bf16.msra.mxu0 %v8479_v54  ;;  %v3595_v22 = vmul.f32 0.044715, %v10053_v15  ;;  %v8544_v54 = vld [vmem:[#allocation25 + $0x5ec] ss:$28 sps:$4 sm:$0xff]  }
 0x66a   :  { %6591 = vmatprep.mubr.bf16.mxu1 %v10044_v50  ;;  %6755 = vmatprep.mubr.bf16.mxu0 %v10044_v50 }
 0x66b   :  { %6561 = vmatprep.subr.bf16.mxu1 %v8484_v27  ;;  %6725 = vmatprep.subr.bf16.mxu0 %v8487_v56  ;;  %v3603_v39 = vmul.f32 %v3595_v22, %v10053_v15  ;;  %v8547_v27 = vld [vmem:[#allocation25 + $0x5f4] ss:$28 sps:$4 sm:$0xff]   ;;  %v8542_v56 = vld [vmem:[#allocation25 + $0x5e8] ss:$28 sps:$4 sm:$0xff]  }
 0x66c   :  { %v8574_v22 = vld [vmem:[#allocation25 + $0x704] ss:$28 sps:$4 sm:$0xff]  }
 0x66d   :  { %6562 = vmatpush1.bf16.msra.mxu1 %v8482_v52  ;;  %6726 = vmatpush1.bf16.msra.mxu0 %v8485_v58  ;;  %v3611_v43 = vmul.f32 %v3603_v39, %v10053_v15  ;;  %v8545_v52 = vld [vmem:[#allocation25 + $0x5f0] ss:$28 sps:$4 sm:$0xff]   ;;  %v8550_v58 = vld [vmem:[#allocation25 + $0x624] ss:$28 sps:$4 sm:$0xff]  }
 0x66e   :  { %6563 = vmatprep.subr.bf16.mxu1 %v8490_v59  ;;  %6727 = vmatprep.subr.bf16.mxu0 %v8493_v60  ;;  %v8553_v59 = vld [vmem:[#allocation25 + $0x62c] ss:$28 sps:$4 sm:$0xff]   ;;  %v8548_v60 = vld [vmem:[#allocation25 + $0x620] ss:$28 sps:$4 sm:$0xff]  }
 0x66f   :  { %v3619_v29 = vadd.f32 %v3611_v43, %v10053_v15 }
 0x671   :  { %6564 = vmatpush1.bf16.msra.mxu1 %v8488_v61  ;;  %6728 = vmatpush1.bf16.msra.mxu0 %v8491_v62  ;;  %v3627_v53 = vmul.f32 0.7978846, %v3619_v29  ;;  %v8551_v61 = vld [vmem:[#allocation25 + $0x628] ss:$28 sps:$4 sm:$0xff]   ;;  %v8556_v62 = vld [vmem:[#allocation25 + $0x65c] ss:$28 sps:$4 sm:$0xff]  }
 0x672   :  { %6565 = vmatprep.subr.bf16.mxu1 %v8496_v26  ;;  %6729 = vmatprep.subr.bf16.mxu0 %v8499_v3  ;;  %v8554_v26 = vld [vmem:[#allocation25 + $0x658] ss:$28 sps:$4 sm:$0xff]   ;;  %v8557_v3 = vld [vmem:[#allocation25 + $0x660] ss:$28 sps:$4 sm:$0xff]  }
 0x673   :  { %9060 = vtanh.f32 %v3627_v53 }
 0x675   :  { %6566 = vmatpush1.bf16.msra.mxu1 %v8494_v6  ;;  %6730 = vmatpush1.bf16.msra.mxu0 %v8497_v7  ;;  %v10060_v6 = vsub.s32 4, %v9867_v63  ;;  %v10063_v7 = vsub.s32 5, %v9867_v63 }
 0x676   :  { %6567 = vmatprep.subr.bf16.mxu1 %v8502_v8  ;;  %6731 = vmatprep.subr.bf16.mxu0 %v8505_v9  ;;  %v8560_v8 = vld [vmem:[#allocation25 + $0x690] ss:$28 sps:$4 sm:$0xff]   ;;  %v8563_v9 = vld [vmem:[#allocation25 + $0x698] ss:$28 sps:$4 sm:$0xff]  }
 0x679   :  { %6568 = vmatpush1.bf16.msra.mxu1 %v8500_v11  ;;  %6732 = vmatpush1.bf16.msra.mxu0 %v8503_v41  ;;  %v8571_v11 = vld [vmem:[#allocation25 + $0x6d4] ss:$28 sps:$4 sm:$0xff]  }
 0x67a   :  { %6569 = vmatprep.subr.bf16.mxu1 %v8508_v13  ;;  %6733 = vmatprep.subr.bf16.mxu0 %v8511_v14  ;;  %v1688_v13 = vrot.slane %v9980_v19, %v10060_v6  ;;  %v1692_v14 = vrot.slane %v9980_v19, %v10063_v7 }
 0x67d   :  { %6570 = vmatpush1.bf16.msra.mxu1 %v8506_v16  ;;  %6734 = vmatpush1.bf16.msra.mxu0 %v8509_v25  ;;  %v9061_v5 = vpop.eup %9060  ;;  %v3587_v16 = vmul.f32 0.5, %v10053_v15  ;;  %v8566_v25 = vld [vmem:[#allocation25 + $0x6c8] ss:$28 sps:$4 sm:$0xff]  }
 0x67e   :  { %6571 = vmatprep.subr.bf16.mxu1 %v8514_v17  ;;  %6735 = vmatprep.subr.bf16.mxu0 %v8517_v18  ;;  %v3643_v41 = vadd.f32 1.0, %v9061_v5  ;;  %v8569_v17 = vld [vmem:[#allocation25 + $0x6d0] ss:$28 sps:$4 sm:$0xff]   ;;  %v1700_v18 = vrot.slane %v9980_v19, %v10066_v10  ;;  %v8589_v5 = vld [vmem:[#allocation25 + $0x77c] ss:$28 sps:$4 sm:$0xff]  }
 0x681   :  { %6572 = vmatpush1.bf16.msra.mxu1 %v8512_v20  ;;  %6736 = vmatpush1.bf16.msra.mxu0 %v8515_v21  ;;  %v3651_v21 = vmul.f32 %v3643_v41, %v3587_v16 }
 0x682   :  { %6573 = vmatprep.subr.bf16.mxu1 %v8520_v23  ;;  %6737 = vmatprep.subr.bf16.mxu0 %v8523_v31  ;;  %v8577_v23 = vld [vmem:[#allocation25 + $0x70c] ss:$28 sps:$4 sm:$0xff]  }
 0x685   :  { %6574 = vmatpush1.bf16.msra.mxu1 %v8518_v57  ;;  %6738 = vmatpush1.bf16.msra.mxu0 %v8521_v37 }
 0x686   :  { %6575 = vmatprep.subr.bf16.mxu1 %v8526_v45  ;;  %6739 = vmatprep.subr.bf16.mxu0 %v8529_v46  ;;  %v8572_v46 = vld [vmem:[#allocation25 + $0x700] ss:$28 sps:$4 sm:$0xff]  }
 0x689   :  { %6576 = vmatpush1.bf16.msra.mxu1 %v8524_v40  ;;  %6740 = vmatpush1.bf16.msra.mxu0 %v8527_v42 }
 0x68a   :  { %6577 = vmatprep.subr.bf16.mxu1 %v8532_v48  ;;  %6741 = vmatprep.subr.bf16.mxu0 %v8535_v49 }
 0x68d   :  { %6578 = vmatpush1.bf16.msra.mxu1 %v8530_v24  ;;  %6742 = vmatpush1.bf16.msra.mxu0 %v8533_v28  ;;  %v8575_v24 = vld [vmem:[#allocation25 + $0x708] ss:$28 sps:$4 sm:$0xff]  }
 0x68e   :  { %6579 = vmatprep.subr.bf16.mxu1 %v8538_v30  ;;  %6743 = vmatprep.subr.bf16.mxu0 %v8541_v32  ;;  %v10089_v32 = vpack.c.bf16 %v3651_v21, %v3651_v21  ;;  %v10100_v21 = vsub.s32 6, %v9867_v63  ;;  %v8590_v63 = vld [vmem:[#allocation25 + $0x7a8] ss:$28 sps:$4 sm:$0xff]  }
 0x691   :  { %6580 = vmatpush1.bf16.msra.mxu1 %v8536_v33  ;;  %6744 = vmatpush1.bf16.msra.mxu0 %v8539_v34  ;;  %v8580_v33 = vld [vmem:[#allocation25 + $0x73c] ss:$28 sps:$4 sm:$0xff]   ;;  %v8583_v34 = vld [vmem:[#allocation25 + $0x744] ss:$28 sps:$4 sm:$0xff]  }
 0x692   :  { %6581 = vmatprep.subr.bf16.mxu1 %v8544_v54  ;;  %6745 = vmatprep.subr.bf16.mxu0 %v8547_v27 }
 0x695   :  { %6582 = vmatpush1.bf16.msra.mxu1 %v8542_v56  ;;  %6746 = vmatpush1.bf16.msra.mxu0 %v8545_v52 }
 0x696   :  { %6583 = vmatprep.subr.bf16.mxu1 %v8550_v58  ;;  %6747 = vmatprep.subr.bf16.mxu0 %v8553_v59 }
 0x699   :  { %6584 = vmatpush1.bf16.msra.mxu1 %v8548_v60  ;;  %6748 = vmatpush1.bf16.msra.mxu0 %v8551_v61 }
 0x69a   :  { %6585 = vmatprep.subr.bf16.mxu1 %v8556_v62  ;;  %6749 = vmatprep.subr.bf16.mxu0 %v8559_v2  ;;  %v8578_v2 = vld [vmem:[#allocation25 + $0x738] ss:$28 sps:$4 sm:$0xff]  }
 0x69d   :  { %6586 = vmatpush1.bf16.msra.mxu1 %v8554_v26  ;;  %6750 = vmatpush1.bf16.msra.mxu0 %v8557_v3  ;;  %v8581_v26 = vld [vmem:[#allocation25 + $0x740] ss:$28 sps:$4 sm:$0xff]  }
 0x69e   :  { %6587 = vmatprep.subr.bf16.mxu1 %v8562_v4  ;;  %6751 = vmatprep.subr.bf16.mxu0 %v8565_v35  ;;  %v8586_v35 = vld [vmem:[#allocation25 + $0x774] ss:$28 sps:$4 sm:$0xff]  }
 0x6a1   :  { %6588 = vmatpush1.bf16.msra.mxu1 %v8560_v8  ;;  %6752 = vmatpush1.bf16.msra.mxu0 %v8563_v9 }
 0x6a2   :  { %6589 = vmatprep.subr.bf16.mxu1 %v8568_v12  ;;  %6753 = vmatprep.subr.bf16.mxu0 %v8571_v11 }
 0x6a3   :  { %v3228_v20 = vpop.f32.mrb[8].mxu1 }
 0x6a4   :  { %v10075_v31 = vadd.f32 %v3228_v20, %v1688_v13  ;;  %v10077_v57 = vpop.f32.mrb[20].mxu0  ;;  %v3230_v37 = vpop.f32.mrb[9].mxu1  ;;  %v8587_v20 = vld [vmem:[#allocation25 + $0x778] ss:$28 sps:$4 sm:$0xff]  }
 0x6a5   :  { %v10079_v39 = vadd.f32 %v3230_v37, %v1692_v14  ;;  %v3312_v15 = vpop.f32.mrb[21].mxu0  ;;  %v3232_v45 = vpop.f32.mrb[10].mxu1  ;;  %6590 = vmatpush1.bf16.msra.mxu1 %v8566_v25  ;;  %6754 = vmatpush1.bf16.msra.mxu0 %v8569_v17  ;;  %v8592_v37 = vld [vmem:[#allocation25 + $0x7ac] ss:$28 sps:$4 sm:$0xff]  }
 0x6a6   :  { %v3343_v40 = vrot.slane %v10075_v31, 4  ;;  %v3379_v42 = vmul.f32 %v10075_v31, %v10075_v31  ;;  %v10084_v43 = vadd.f32 %v3312_v15, %v1700_v18  ;;  %v3314_v48 = vpop.f32.mrb[22].mxu0  ;;  %v3233_v49 = vpop.f32.mrb[11].mxu1  ;;  %6600 = vmatprep.subr.bf16.mxu1 %v8574_v22  ;;  %6764 = vmatprep.subr.bf16.mxu0 %v8577_v23  ;;  %v8584_v18 = vld [vmem:[#allocation25 + $0x770] ss:$28 sps:$4 sm:$0xff]  }
 0x6a7   :  { %v3349_v28 = vrot.slane %v10079_v39, 4  ;;  %v3380_v29 = vmul.f32 %v10079_v39, %v10079_v39  ;;  %v3315_v30 = vpop.f32.mrb[23].mxu0  ;;  %v8595_v15 = vld [vmem:[#allocation25 + $0x7b4] ss:$28 sps:$4 sm:$0xff]  }
 0x6a8   :  { %v3344_v53 = vadd.f32 %v10075_v31, %v3343_v40  ;;  %v3407_v54 = vrot.slane %v3379_v42, 4  ;;  %v3361_v27 = vrot.slane %v10084_v43, 4  ;;  %v3382_v56 = vmul.f32 %v10084_v43, %v10084_v43  ;;  %6592 = vmatmul.mubr.bf16.vlgmr.msra.gmra.mrb[12].mxu1 %v10089_v32  ;;  %6756 = vmatmul.mubr.bf16.vlgmr.msra.gmra.mrb[24].mxu0 %v10089_v32 }
 0x6a9   :  { %v3350_v52 = vadd.f32 %v10079_v39, %v3349_v28  ;;  %v3413_v58 = vrot.slane %v3380_v29, 4  ;;  %6601 = vmatpush1.bf16.msra.mxu1 %v8572_v46  ;;  %6765 = vmatpush1.bf16.msra.mxu0 %v8575_v24 }
 0x6aa   :  { %v3345_v59 = vrot.slane %v3344_v53, 2  ;;  %v3408_v60 = vadd.f32 %v3407_v54, %v3379_v42  ;;  %v3362_v61 = vadd.f32 %v10084_v43, %v3361_v27  ;;  %v3425_v62 = vrot.slane %v3382_v56, 4  ;;  %6602 = vmatprep.subr.bf16.mxu1 %v8580_v33  ;;  %6766 = vmatprep.subr.bf16.mxu0 %v8583_v34  ;;  %v8598_v54 = vld [vmem:[#allocation25 + $0x7e4] ss:$28 sps:$4 sm:$0xff]  }
 0x6ab   :  { %v3351_v3 = vrot.slane %v3350_v52, 2  ;;  %v3414_v4 = vadd.f32 %v3413_v58, %v3380_v29 }
 0x6ac   :  { %v3346_v8 = vadd.f32 %v3345_v59, %v3344_v53  ;;  %v3409_v9 = vrot.slane %v3408_v60, 2  ;;  %v3363_v12 = vrot.slane %v3362_v61, 2  ;;  %v3426_v11 = vadd.f32 %v3425_v62, %v3382_v56  ;;  %v8593_v53 = vld [vmem:[#allocation25 + $0x7b0] ss:$28 sps:$4 sm:$0xff]  }
 0x6ad   :  { %v3352_v41 = vadd.f32 %v3351_v3, %v3350_v52  ;;  %v3415_v13 = vrot.slane %v3414_v4, 2  ;;  %6603 = vmatpush1.bf16.msra.mxu1 %v8578_v2  ;;  %6767 = vmatpush1.bf16.msra.mxu0 %v8581_v26  ;;  %v1696_v52 = vrot.slane %v9980_v19, %v10100_v21  ;;  %v8601_v59 = vld [vmem:[#allocation25 + $0x7ec] ss:$28 sps:$4 sm:$0xff]   ;;  %v8596_v26 = vld [vmem:[#allocation25 + $0x7e0] ss:$28 sps:$4 sm:$0xff]  }
 0x6ae   :  { %v3347_v14 = vrot.slane %v3346_v8, 1  ;;  %v3410_v16 = vadd.f32 %v3409_v9, %v3408_v60  ;;  %v3364_v25 = vadd.f32 %v3363_v12, %v3362_v61  ;;  %v3427_v17 = vrot.slane %v3426_v11, 2  ;;  %6604 = vmatprep.subr.bf16.mxu1 %v8586_v35  ;;  %6768 = vmatprep.subr.bf16.mxu0 %v8589_v5  ;;  %v8604_v35 = vld [vmem:[#allocation25 + $0x81c] ss:$28 sps:$4 sm:$0xff]   ;;  %v8607_v12 = vld [vmem:[#allocation25 + $0x824] ss:$28 sps:$4 sm:$0xff]  }
 0x6af   :  { %v3353_v22 = vrot.slane %v3352_v41, 1  ;;  %v3416_v23 = vadd.f32 %v3415_v13, %v3414_v4  ;;  %v8599_v4 = vld [vmem:[#allocation25 + $0x7e8] ss:$28 sps:$4 sm:$0xff]   ;;  %v10117_v19 = vadd.f32 %v10077_v57, %v1696_v52  ;;  %v8602_v13 = vld [vmem:[#allocation25 + $0x818] ss:$28 sps:$4 sm:$0xff]  }
 0x6b0   :  { %v3348_v45 = vadd.f32 %v3347_v14, %v3346_v8  ;;  %v3411_v46 = vrot.slane %v3410_v16, 1  ;;  %v3365_v40 = vrot.slane %v3364_v25, 1  ;;  %v3428_v42 = vadd.f32 %v3427_v17, %v3426_v11  ;;  %v8605_v14 = vld [vmem:[#allocation25 + $0x820] ss:$28 sps:$4 sm:$0xff]  }
 0x6b1   :  { %v3354_v48 = vadd.f32 %v3353_v22, %v3352_v41  ;;  %v3417_v49 = vrot.slane %v3416_v23, 1  ;;  %6605 = vmatpush1.bf16.msra.mxu1 %v8584_v18  ;;  %6769 = vmatpush1.bf16.msra.mxu0 %v8587_v20  ;;  %v8613_v57 = vld [vmem:[#allocation25 + $0x85c] ss:$28 sps:$4 sm:$0xff]   ;;  %v3381_v18 = vmul.f32 %v10117_v19, %v10117_v19  ;;  %v8608_v20 = vld [vmem:[#allocation25 + $0x850] ss:$28 sps:$4 sm:$0xff]  }
 0x6b2   :  { %v10102_v24 = vmul.f32 0.125, %v3348_v45  ;;  %v3412_v28 = vadd.f32 %v3411_v46, %v3410_v16  ;;  %v3366_v29 = vadd.f32 %v3365_v40, %v3364_v25  ;;  %v3429_v30 = vrot.slane %v3428_v42, 1  ;;  %6606 = vmatprep.subr.bf16.mxu1 %v8592_v37  ;;  %6770 = vmatprep.subr.bf16.mxu0 %v8595_v15  ;;  %v8610_v16 = vld [vmem:[#allocation25 + $0x854] ss:$28 sps:$4 sm:$0xff]   ;;  %v8614_v46 = vld [vmem:[#allocation25 + $0x888] ss:$28 sps:$4 sm:$0xff]  }
 0x6b3   :  { %v10104_v33 = vmul.f32 0.125, %v3354_v48  ;;  %v3418_v34 = vadd.f32 %v3417_v49, %v3416_v23  ;;  %v3355_v25 = vrot.slane %v10117_v19, 4  ;;  %v8611_v22 = vld [vmem:[#allocation25 + $0x858] ss:$28 sps:$4 sm:$0xff]   ;;  %v8616_v23 = vld [vmem:[#allocation25 + $0x88c] ss:$28 sps:$4 sm:$0xff]  }
 0x6b4   :  { %v3435_v27 = vmul.f32 0.125, %v3412_v28  ;;  %v3443_v56 = vmul.f32 %v10102_v24, %v10102_v24  ;;  %v10110_v58 = vmul.f32 0.125, %v3366_v29  ;;  %v3430_v2 = vadd.f32 %v3429_v30, %v3428_v42  ;;  %v8619_v15 = vld [vmem:[#allocation25 + $0x894] ss:$28 sps:$4 sm:$0xff]   ;;  %v8622_v49 = vld [vmem:[#allocation25 + $0x8c4] ss:$28 sps:$4 sm:$0xff]  }
 0x6b5   :  { %v3436_v60 = vmul.f32 0.125, %v3418_v34  ;;  %v3444_v62 = vmul.f32 %v10104_v33, %v10104_v33  ;;  %6607 = vmatpush1.bf16.msra.mxu1 %v8590_v63  ;;  %6771 = vmatpush1.bf16.msra.mxu0 %v8593_v53  ;;  %v3356_v37 = vadd.f32 %v10117_v19, %v3355_v25  ;;  %v3419_v45 = vrot.slane %v3381_v18, 4  ;;  %v8617_v48 = vld [vmem:[#allocation25 + $0x890] ss:$28 sps:$4 sm:$0xff]   ;;  %v8620_v52 = vld [vmem:[#allocation25 + $0x8c0] ss:$28 sps:$4 sm:$0xff]  }
 0x6b6   :  { %v3451_v61 = vsub.f32 %v3435_v27, %v3443_v56  ;;  %v3446_v3 = vmul.f32 %v10110_v58, %v10110_v58  ;;  %6608 = vmatprep.subr.bf16.mxu1 %v8598_v54  ;;  %v3438_v9 = vmul.f32 0.125, %v3430_v2  ;;  %6772 = vmatprep.subr.bf16.mxu0 %v8601_v59  ;;  %v3459_v40 = vsub.f32 %v10075_v31, %v10102_v24  ;;  %v8625_v63 = vld [vmem:[#allocation25 + $0x8cc] ss:$28 sps:$4 sm:$0xff]  }
 0x6b7   :  { %v3452_v8 = vsub.f32 %v3436_v60, %v3444_v62  ;;  %v3507_v42 = vrot.slane %v10016_v44, %v10060_v6  ;;  %v3556_v29 = vrot.slane %v10018_v47, %v10060_v6  ;;  %v3357_v30 = vrot.slane %v3356_v37, 2  ;;  %v8632_v25 = vld [vmem:[#allocation25 + $0x930] ss:$28 sps:$4 sm:$0xff]  }
 0x6b8   :  { %v3467_v5 = vadd.f32 0.8, %v3451_v61  ;;  %v3454_v41 = vsub.f32 %v3438_v9, %v3446_v3  ;;  %v3420_v53 = vadd.f32 %v3419_v45, %v3381_v18  ;;  %v3460_v54 = vsub.f32 %v10079_v39, %v10104_v33  ;;  %v8623_v39 = vld [vmem:[#allocation25 + $0x8c8] ss:$28 sps:$4 sm:$0xff]   ;;  %v8628_v33 = vld [vmem:[#allocation25 + $0x8fc] ss:$28 sps:$4 sm:$0xff]  }
 0x6b9   :  { %v3468_v11 = vadd.f32 0.8, %v3452_v8  ;;  %6609 = vmatpush1.bf16.msra.mxu1 %v8596_v26  ;;  %6773 = vmatpush1.bf16.msra.mxu0 %v8599_v4  ;;  %v3511_v31 = vrot.slane %v10016_v44, %v10063_v7  ;;  %v3560_v27 = vrot.slane %v10018_v47, %v10063_v7  ;;  %v3519_v56 = vrot.slane %v10016_v44, %v10066_v10  ;;  %v8631_v3 = vld [vmem:[#allocation25 + $0x904] ss:$28 sps:$4 sm:$0xff]   ;;  %v8626_v8 = vld [vmem:[#allocation25 + $0x8f8] ss:$28 sps:$4 sm:$0xff]  }
 0x6ba   :  { %9062 = vrsqrt.f32 %v3467_v5  ;;  %6610 = vmatprep.subr.bf16.mxu1 %v8604_v35  ;;  %v3470_v17 = vadd.f32 0.8, %v3454_v41  ;;  %6774 = vmatprep.subr.bf16.mxu0 %v8607_v12  ;;  %v3462_v61 = vsub.f32 %v10084_v43, %v10110_v58  ;;  %v3358_v2 = vadd.f32 %v3357_v30, %v3356_v37  ;;  %v8629_v58 = vld [vmem:[#allocation25 + $0x900] ss:$28 sps:$4 sm:$0xff]   ;;  %v8634_v12 = vld [vmem:[#allocation25 + $0x934] ss:$28 sps:$4 sm:$0xff]  }
 0x6bb   :  { %9064 = vrsqrt.f32 %v3468_v11  ;;  %v3568_v26 = vrot.slane %v10018_v47, %v10066_v10  ;;  %v3421_v44 = vrot.slane %v3420_v53, 2  ;;  %v8637_v47 = vld [vmem:[#allocation25 + $0x93c] ss:$28 sps:$4 sm:$0xff]   ;;  %v8643_v37 = vld [vmem:[#allocation25 + $0x974] ss:$28 sps:$4 sm:$0xff]  }
 0x6bc   :  { %9066 = vrsqrt.f32 %v3470_v17  ;;  %v3359_v41 = vrot.slane %v3358_v2, 1  ;;  %v8635_v17 = vld [vmem:[#allocation25 + $0x938] ss:$28 sps:$4 sm:$0xff]  }
 0x6bd   :  { %6611 = vmatpush1.bf16.msra.mxu1 %v8602_v13  ;;  %6775 = vmatpush1.bf16.msra.mxu0 %v8605_v14  ;;  %v3422_v10 = vadd.f32 %v3421_v44, %v3420_v53 }
 0x6be   :  { %6612 = vmatprep.subr.bf16.mxu1 %v8610_v16  ;;  %6776 = vmatprep.subr.bf16.mxu0 %v8613_v57  ;;  %v8640_v57 = vld [vmem:[#allocation25 + $0x96c] ss:$28 sps:$4 sm:$0xff]  }
 0x6c1   :  { %6613 = vmatpush1.bf16.msra.mxu1 %v8608_v20  ;;  %6777 = vmatpush1.bf16.msra.mxu0 %v8611_v22 }
 0x6c2   :  { %6614 = vmatprep.subr.bf16.mxu1 %v8616_v23  ;;  %6778 = vmatprep.subr.bf16.mxu0 %v8619_v15  ;;  %v3360_v23 = vadd.f32 %v3359_v41, %v3358_v2  ;;  %v3423_v15 = vrot.slane %v3422_v10, 1  ;;  %v8661_v2 = vld [vmem:[#allocation25 + $0xa1c] ss:$28 sps:$4 sm:$0xff]   ;;  %v8662_v41 = vld [vmem:[#allocation25 + $0xa48] ss:$28 sps:$4 sm:$0xff]  }
 0x6c4   :  { %v9063_v28 = vpop.eup %9062  ;;  %v3424_v53 = vadd.f32 %v3423_v15, %v3422_v10 }
 0x6c5   :  { %v3483_v34 = vmul.f32 %v9063_v28, %v3459_v40  ;;  %v9065_v24 = vpop.eup %9064  ;;  %6615 = vmatpush1.bf16.msra.mxu1 %v8614_v46  ;;  %6779 = vmatpush1.bf16.msra.mxu0 %v8617_v48  ;;  %v8641_v48 = vld [vmem:[#allocation25 + $0x970] ss:$28 sps:$4 sm:$0xff]  }
 0x6c6   :  { %v3484_v60 = vmul.f32 %v9065_v24, %v3460_v54  ;;  %6616 = vmatprep.subr.bf16.mxu1 %v8622_v49  ;;  %v9067_v62 = vpop.eup %9066  ;;  %6780 = vmatprep.subr.bf16.mxu0 %v8625_v63  ;;  %v8646_v49 = vld [vmem:[#allocation25 + $0x9a4] ss:$28 sps:$4 sm:$0xff]   ;;  %v10158_v63 = vmul.f32 0.125, %v3360_v23 }
 0x6c7   :  { %v3532_v59 = vmul.f32 %v3507_v42, %v3483_v34  ;;  %v3486_v5 = vmul.f32 %v9067_v62, %v3462_v61  ;;  %v8638_v42 = vld [vmem:[#allocation25 + $0x968] ss:$28 sps:$4 sm:$0xff]   ;;  %v8644_v24 = vld [vmem:[#allocation25 + $0x9a0] ss:$28 sps:$4 sm:$0xff]   ;;  %v8658_v62 = vld [vmem:[#allocation25 + $0xa14] ss:$28 sps:$4 sm:$0xff]  }
 0x6c8   :  { %v3533_v35 = vmul.f32 %v3511_v31, %v3484_v60  ;;  %v8649_v34 = vld [vmem:[#allocation25 + $0x9ac] ss:$28 sps:$4 sm:$0xff]   ;;  %v3437_v60 = vmul.f32 0.125, %v3424_v53  ;;  %v3445_v61 = vmul.f32 %v10158_v63, %v10158_v63  ;;  %v8668_v23 = vld [vmem:[#allocation25 + $0xa80] ss:$28 sps:$4 sm:$0xff]   ;;  %v3461_v53 = vsub.f32 %v10117_v19, %v10158_v63 }
 0x6c9   :  { %v10141_v4 = vadd.f32 %v3556_v29, %v3532_v59  ;;  %6617 = vmatpush1.bf16.msra.mxu1 %v8620_v52  ;;  %v3535_v43 = vmul.f32 %v3519_v56, %v3486_v5  ;;  %6781 = vmatpush1.bf16.msra.mxu0 %v8623_v39  ;;  %v8652_v56 = vld [vmem:[#allocation25 + $0x9dc] ss:$28 sps:$4 sm:$0xff]   ;;  %v8655_v59 = vld [vmem:[#allocation25 + $0x9e4] ss:$28 sps:$4 sm:$0xff]   ;;  %v8664_v5 = vld [vmem:[#allocation25 + $0xa4c] ss:$28 sps:$4 sm:$0xff]  }
 0x6ca   :  { %v10143_v9 = vadd.f32 %v3560_v27, %v3533_v35  ;;  %6618 = vmatprep.subr.bf16.mxu1 %v8628_v33  ;;  %6782 = vmatprep.subr.bf16.mxu0 %v8631_v3  ;;  %v8647_v27 = vld [vmem:[#allocation25 + $0x9a8] ss:$28 sps:$4 sm:$0xff]   ;;  %v8650_v39 = vld [vmem:[#allocation25 + $0x9d8] ss:$28 sps:$4 sm:$0xff]   ;;  %v8653_v33 = vld [vmem:[#allocation25 + $0x9e0] ss:$28 sps:$4 sm:$0xff]  }
 0x6cb   :  { %v3597_v11 = vmul.f32 0.044715, %v10141_v4  ;;  %v10146_v13 = vadd.f32 %v3568_v26, %v3535_v43  ;;  %v3453_v26 = vsub.f32 %v3437_v60, %v3445_v61  ;;  %v8656_v3 = vld [vmem:[#allocation25 + $0xa10] ss:$28 sps:$4 sm:$0xff]   ;;  %v8659_v35 = vld [vmem:[#allocation25 + $0xa18] ss:$28 sps:$4 sm:$0xff]  }
 0x6cc   :  { %v3598_v14 = vmul.f32 0.044715, %v10143_v9  ;;  %v8697_v60 = vld [vmem:[#allocation25 + $0xb6c] ss:$28 sps:$4 sm:$0xff]   ;;  %v8692_v19 = vld [vmem:[#allocation25 + $0xb60] ss:$28 sps:$4 sm:$0xff]  }
 0x6cd   :  { %v3605_v16 = vmul.f32 %v3597_v11, %v10141_v4  ;;  %6619 = vmatpush1.bf16.msra.mxu1 %v8626_v8  ;;  %6783 = vmatpush1.bf16.msra.mxu0 %v8629_v58  ;;  %v3600_v22 = vmul.f32 0.044715, %v10146_v13  ;;  %v8667_v8 = vld [vmem:[#allocation25 + $0xa54] ss:$28 sps:$4 sm:$0xff]   ;;  %v3589_v11 = vmul.f32 0.5, %v10141_v4 }
 0x6ce   :  { %6620 = vmatprep.subr.bf16.mxu1 %v8634_v12  ;;  %v3606_v18 = vmul.f32 %v3598_v14, %v10143_v9  ;;  %6784 = vmatprep.subr.bf16.mxu0 %v8637_v47  ;;  %v3469_v12 = vadd.f32 0.8, %v3453_v26  ;;  %v3590_v47 = vmul.f32 0.5, %v10143_v9  ;;  %v8695_v63 = vld [vmem:[#allocation25 + $0xb68] ss:$28 sps:$4 sm:$0xff]  }
 0x6cf   :  { %v3613_v20 = vmul.f32 %v3605_v16, %v10141_v4  ;;  %v3608_v40 = vmul.f32 %v3600_v22, %v10146_v13  ;;  %v8665_v16 = vld [vmem:[#allocation25 + $0xa50] ss:$28 sps:$4 sm:$0xff]  }
 0x6d0   :  { %v3614_v45 = vmul.f32 %v3606_v18, %v10143_v9  ;;  %v3592_v18 = vmul.f32 0.5, %v10146_v13  ;;  %v8673_v22 = vld [vmem:[#allocation25 + $0xa8c] ss:$28 sps:$4 sm:$0xff]  }
 0x6d1   :  { %v3621_v46 = vadd.f32 %v3613_v20, %v10141_v4  ;;  %6621 = vmatpush1.bf16.msra.mxu1 %v8632_v25  ;;  %6785 = vmatpush1.bf16.msra.mxu0 %v8635_v17  ;;  %v3616_v30 = vmul.f32 %v3608_v40, %v10146_v13  ;;  %v8670_v25 = vld [vmem:[#allocation25 + $0xa84] ss:$28 sps:$4 sm:$0xff]   ;;  %v8674_v40 = vld [vmem:[#allocation25 + $0xab8] ss:$28 sps:$4 sm:$0xff]  }
 0x6d2   :  { %6622 = vmatprep.subr.bf16.mxu1 %v8640_v57  ;;  %v3622_v28 = vadd.f32 %v3614_v45, %v10143_v9  ;;  %6786 = vmatprep.subr.bf16.mxu0 %v8643_v37  ;;  %v8671_v9 = vld [vmem:[#allocation25 + $0xa88] ss:$28 sps:$4 sm:$0xff]   ;;  %v8676_v45 = vld [vmem:[#allocation25 + $0xabc] ss:$28 sps:$4 sm:$0xff]  }
 0x6d3   :  { %v3629_v29 = vmul.f32 0.7978846, %v3621_v46  ;;  %v3624_v31 = vadd.f32 %v3616_v30, %v10146_v13  ;;  %v8679_v46 = vld [vmem:[#allocation25 + $0xac4] ss:$28 sps:$4 sm:$0xff]   ;;  %v8683_v30 = vld [vmem:[#allocation25 + $0xaf8] ss:$28 sps:$4 sm:$0xff]  }
 0x6d4   :  { %v3630_v54 = vmul.f32 0.7978846, %v3622_v28  ;;  %v8680_v28 = vld [vmem:[#allocation25 + $0xaf0] ss:$28 sps:$4 sm:$0xff]  }
 0x6d5   :  { %9068 = vtanh.f32 %v3629_v29  ;;  %6623 = vmatpush1.bf16.msra.mxu1 %v8638_v42  ;;  %6787 = vmatpush1.bf16.msra.mxu0 %v8641_v48  ;;  %v3632_v52 = vmul.f32 0.7978846, %v3624_v31  ;;  %v8677_v42 = vld [vmem:[#allocation25 + $0xac0] ss:$28 sps:$4 sm:$0xff]   ;;  %v8682_v48 = vld [vmem:[#allocation25 + $0xaf4] ss:$28 sps:$4 sm:$0xff]  }
 0x6d6   :  { %6624 = vmatprep.subr.bf16.mxu1 %v8646_v49  ;;  %9070 = vtanh.f32 %v3630_v54  ;;  %6788 = vmatprep.subr.bf16.mxu0 %v8649_v34  ;;  %v8685_v49 = vld [vmem:[#allocation25 + $0xafc] ss:$28 sps:$4 sm:$0xff]   ;;  %v8688_v34 = vld [vmem:[#allocation25 + $0xb2c] ss:$28 sps:$4 sm:$0xff]   ;;  %v8691_v54 = vld [vmem:[#allocation25 + $0xb34] ss:$28 sps:$4 sm:$0xff]  }
 0x6d7   :  { %9072 = vtanh.f32 %v3632_v52  ;;  %v8689_v52 = vld [vmem:[#allocation25 + $0xb30] ss:$28 sps:$4 sm:$0xff]  }
 0x6d8   :  { %9074 = vrsqrt.f32 %v3469_v12  ;;  %v8712_v12 = vld [vmem:[#allocation25 + $0xc0c] ss:$28 sps:$4 sm:$0xff]  }
 0x6d9   :  { %6625 = vmatpush1.bf16.msra.mxu1 %v8644_v24  ;;  %6789 = vmatpush1.bf16.msra.mxu0 %v8647_v27  ;;  %v9092_v24 = vld [vmem:[#allocation22] sm:$0xff] }
 0x6da   :  { %6626 = vmatprep.subr.bf16.mxu1 %v8652_v56  ;;  %6790 = vmatprep.subr.bf16.mxu0 %v8655_v59  ;;  %v3515_v27 = vrot.slane %v9092_v24, %v10100_v21  ;;  %v8686_v56 = vld [vmem:[#allocation25 + $0xb28] ss:$28 sps:$4 sm:$0xff]  }
 0x6db   :  { %v8694_v59 = vld [vmem:[#allocation25 + $0xb64] ss:$28 sps:$4 sm:$0xff]  }
 0x6dc   :  { %v8751_v24 = vld [vmem:[#allocation25 + $0xd64] ss:$28 sps:$4 sm:$0xff]  }
 0x6dd   :  { %6627 = vmatpush1.bf16.msra.mxu1 %v8650_v39  ;;  %6791 = vmatpush1.bf16.msra.mxu0 %v8653_v33  ;;  %v9093_v39 = vld [vmem:[#allocation24] sm:$0xff] }
 0x6de   :  { %6628 = vmatprep.subr.bf16.mxu1 %v8658_v62  ;;  %6792 = vmatprep.subr.bf16.mxu0 %v8661_v2  ;;  %v3564_v33 = vrot.slane %v9093_v39, %v10100_v21  ;;  %v8700_v62 = vld [vmem:[#allocation25 + $0xb9c] ss:$28 sps:$4 sm:$0xff]   ;;  %v8703_v2 = vld [vmem:[#allocation25 + $0xba4] ss:$28 sps:$4 sm:$0xff]  }
 0x6df   :  { %v9069_v44 = vpop.eup %9068  ;;  %v8755_v39 = vld [vmem:[#allocation25 + $0xd98] ss:$28 sps:$4 sm:$0xff]  }
 0x6e0   :  { %v3645_v43 = vadd.f32 1.0, %v9069_v44  ;;  %v9071_v58 = vpop.eup %9070  ;;  %v8701_v44 = vld [vmem:[#allocation25 + $0xba0] ss:$28 sps:$4 sm:$0xff]  }
 0x6e1   :  { %6629 = vmatpush1.bf16.msra.mxu1 %v8656_v3  ;;  %v3646_v10 = vadd.f32 1.0, %v9071_v58  ;;  %v9073_v14 = vpop.eup %9072  ;;  %6793 = vmatpush1.bf16.msra.mxu0 %v8659_v35  ;;  %v8698_v3 = vld [vmem:[#allocation25 + $0xb98] ss:$28 sps:$4 sm:$0xff]  }
 0x6e2   :  { %6630 = vmatprep.subr.bf16.mxu1 %v8664_v5  ;;  %v3653_v17 = vmul.f32 %v3645_v43, %v3589_v11  ;;  %6794 = vmatprep.subr.bf16.mxu0 %v8667_v8  ;;  %v3648_v20 = vadd.f32 1.0, %v9073_v14  ;;  %v9075_v29 = vpop.eup %9074  ;;  %v8706_v35 = vld [vmem:[#allocation25 + $0xbd4] ss:$28 sps:$4 sm:$0xff]   ;;  %v8709_v5 = vld [vmem:[#allocation25 + $0xbdc] ss:$28 sps:$4 sm:$0xff]  }
 0x6e3   :  { %v3654_v57 = vmul.f32 %v3646_v10, %v3590_v47  ;;  %v3485_v31 = vmul.f32 %v9075_v29, %v3461_v53  ;;  %v8704_v8 = vld [vmem:[#allocation25 + $0xbd0] ss:$28 sps:$4 sm:$0xff]   ;;  %v8707_v58 = vld [vmem:[#allocation25 + $0xbd8] ss:$28 sps:$4 sm:$0xff]   ;;  %v8718_v14 = vld [vmem:[#allocation25 + $0xc44] ss:$28 sps:$4 sm:$0xff]  }
 0x6e4   :  { %v3656_v37 = vmul.f32 %v3648_v20, %v3592_v18  ;;  %v10168_v15 = vpack.c.bf16 %v3653_v17, %v3653_v17  ;;  %v8715_v11 = vld [vmem:[#allocation25 + $0xc14] ss:$28 sps:$4 sm:$0xff]   ;;  %v8724_v18 = vld [vmem:[#allocation25 + $0xc7c] ss:$28 sps:$4 sm:$0xff]   ;;  %v8727_v20 = vld [vmem:[#allocation25 + $0xc84] ss:$28 sps:$4 sm:$0xff]  }
 0x6e5   :  { %6631 = vmatpush1.bf16.msra.mxu1 %v8662_v41  ;;  %v10166_v4 = vpack.c.bf16 %v3654_v57, %v3654_v57  ;;  %6795 = vmatpush1.bf16.msra.mxu0 %v8665_v16  ;;  %v3534_v61 = vmul.f32 %v3515_v27, %v3485_v31  ;;  %v8710_v41 = vld [vmem:[#allocation25 + $0xc08] ss:$28 sps:$4 sm:$0xff]   ;;  %v8713_v10 = vld [vmem:[#allocation25 + $0xc10] ss:$28 sps:$4 sm:$0xff]   ;;  %v8740_v53 = vld [vmem:[#allocation25 + $0xd20] ss:$28 sps:$4 sm:$0xff]  }
 0x6e6   :  { %6641 = vmatprep.subr.bf16.mxu1 %v8670_v25  ;;  %6805 = vmatprep.subr.bf16.mxu0 %v8673_v22  ;;  %v10173_v13 = vpack.c.bf16 %v3656_v37, %v3656_v37  ;;  %v8721_v16 = vld [vmem:[#allocation25 + $0xc4c] ss:$28 sps:$4 sm:$0xff]   ;;  %v8716_v25 = vld [vmem:[#allocation25 + $0xc40] ss:$28 sps:$4 sm:$0xff]   ;;  %v8722_v22 = vld [vmem:[#allocation25 + $0xc78] ss:$28 sps:$4 sm:$0xff]  }
 0x6e7   :  { %6632 = vmatprep.mubr.bf16.mxu1 %v10166_v4  ;;  %6796 = vmatprep.mubr.bf16.mxu0 %v10166_v4  ;;  %v10182_v26 = vadd.f32 %v3564_v33, %v3534_v61  ;;  %v8719_v57 = vld [vmem:[#allocation25 + $0xc48] ss:$28 sps:$4 sm:$0xff]   ;;  %v8725_v37 = vld [vmem:[#allocation25 + $0xc80] ss:$28 sps:$4 sm:$0xff]   ;;  %v8737_v29 = vld [vmem:[#allocation25 + $0xcf0] ss:$28 sps:$4 sm:$0xff]  }
 0x6e8   :  { %6633 = vmatmul.mubr.bf16.vlgmr.msra.gmra.mrb[12].mxu1 %v10168_v15  ;;  %6797 = vmatmul.mubr.bf16.vlgmr.msra.gmra.mrb[24].mxu0 %v10168_v15  ;;  %v8748_v31 = vld [vmem:[#allocation25 + $0xd5c] ss:$28 sps:$4 sm:$0xff]   ;;  %v8752_v61 = vld [vmem:[#allocation25 + $0xd90] ss:$28 sps:$4 sm:$0xff]  }
 0x6e9   :  { %6642 = vmatpush1.bf16.msra.mxu1 %v8668_v23  ;;  %6806 = vmatpush1.bf16.msra.mxu0 %v8671_v9  ;;  %v3599_v43 = vmul.f32 0.044715, %v10182_v26  ;;  %v8730_v9 = vld [vmem:[#allocation25 + $0xcb4] ss:$28 sps:$4 sm:$0xff]   ;;  %v8760_v33 = vld [vmem:[#allocation25 + $0xdcc] ss:$28 sps:$4 sm:$0xff]  }
 0x6ea   :  { %6673 = vmatprep.mubr.bf16.mxu1 %v10173_v13  ;;  %6837 = vmatprep.mubr.bf16.mxu0 %v10173_v13  ;;  %v8746_v27 = vld [vmem:[#allocation25 + $0xd58] ss:$28 sps:$4 sm:$0xff]  }
 0x6eb   :  { %6643 = vmatprep.subr.bf16.mxu1 %v8676_v45  ;;  %6807 = vmatprep.subr.bf16.mxu0 %v8679_v46  ;;  %v3607_v47 = vmul.f32 %v3599_v43, %v10182_v26  ;;  %v8733_v45 = vld [vmem:[#allocation25 + $0xcbc] ss:$28 sps:$4 sm:$0xff]   ;;  %v8728_v46 = vld [vmem:[#allocation25 + $0xcb0] ss:$28 sps:$4 sm:$0xff]  }
 0x6ed   :  { %6644 = vmatpush1.bf16.msra.mxu1 %v8674_v40  ;;  %6808 = vmatpush1.bf16.msra.mxu0 %v8677_v42  ;;  %v3615_v17 = vmul.f32 %v3607_v47, %v10182_v26  ;;  %v8731_v42 = vld [vmem:[#allocation25 + $0xcb8] ss:$28 sps:$4 sm:$0xff]   ;;  %v8776_v47 = vld [vmem:[#allocation25 + $0x84] ss:$28 sps:$4 sm:$0xff]  }
 0x6ee   :  { %6645 = vmatprep.subr.bf16.mxu1 %v8682_v48  ;;  %6809 = vmatprep.subr.bf16.mxu0 %v8685_v49  ;;  %v8736_v48 = vld [vmem:[#allocation25 + $0xcec] ss:$28 sps:$4 sm:$0xff]   ;;  %v8739_v49 = vld [vmem:[#allocation25 + $0xcf4] ss:$28 sps:$4 sm:$0xff]  }
 0x6ef   :  { %v3623_v23 = vadd.f32 %v3615_v17, %v10182_v26  ;;  %v8782_v17 = vld [vmem:[#allocation25 + $0x280] ss:$28 sps:$4 sm:$0xff]  }
 0x6f1   :  { %6646 = vmatpush1.bf16.msra.mxu1 %v8680_v28  ;;  %6810 = vmatpush1.bf16.msra.mxu0 %v8683_v30  ;;  %v3631_v40 = vmul.f32 0.7978846, %v3623_v23  ;;  %v8734_v28 = vld [vmem:[#allocation25 + $0xce8] ss:$28 sps:$4 sm:$0xff]   ;;  %v8788_v23 = vld [vmem:[#allocation25 + $0xf8] ss:$28 sps:$4 sm:$0xff]  }
 0x6f2   :  { %6647 = vmatprep.subr.bf16.mxu1 %v8688_v34  ;;  %6811 = vmatprep.subr.bf16.mxu0 %v8691_v54  ;;  %v8742_v30 = vld [vmem:[#allocation25 + $0xd24] ss:$28 sps:$4 sm:$0xff]   ;;  %v8745_v34 = vld [vmem:[#allocation25 + $0xd2c] ss:$28 sps:$4 sm:$0xff]  }
 0x6f3   :  { %9076 = vtanh.f32 %v3631_v40  ;;  %v8743_v54 = vld [vmem:[#allocation25 + $0xd28] ss:$28 sps:$4 sm:$0xff]  }
 0x6f4   :  { %v8796_v40 = vld [vmem:[#allocation25 + $0x164] ss:$28 sps:$4 sm:$0xff]  }
 0x6f5   :  { %6648 = vmatpush1.bf16.msra.mxu1 %v8686_v56  ;;  %6812 = vmatpush1.bf16.msra.mxu0 %v8689_v52  ;;  %v8749_v56 = vld [vmem:[#allocation25 + $0xd60] ss:$28 sps:$4 sm:$0xff]   ;;  %v8754_v52 = vld [vmem:[#allocation25 + $0xd94] ss:$28 sps:$4 sm:$0xff]  }
 0x6f6   :  { %6649 = vmatprep.subr.bf16.mxu1 %v8694_v59  ;;  %6813 = vmatprep.subr.bf16.mxu0 %v8697_v60  ;;  %v8757_v60 = vld [vmem:[#allocation25 + $0xd9c] ss:$28 sps:$4 sm:$0xff]  }
 0x6f9   :  { %6650 = vmatpush1.bf16.msra.mxu1 %v8692_v19  ;;  %6814 = vmatpush1.bf16.msra.mxu0 %v8695_v63  ;;  %v8763_v63 = vld [vmem:[#allocation25 + $0xdd4] ss:$28 sps:$4 sm:$0xff]  }
 0x6fa   :  { %6651 = vmatprep.subr.bf16.mxu1 %v8700_v62  ;;  %6815 = vmatprep.subr.bf16.mxu0 %v8703_v2  ;;  %v3591_v62 = vmul.f32 0.5, %v10182_v26  ;;  %v8758_v2 = vld [vmem:[#allocation25 + $0xdc8] ss:$28 sps:$4 sm:$0xff]   ;;  %v8772_v26 = vld [vmem:[#allocation25 + $0x210] ss:$28 sps:$4 sm:$0xff]  }
 0x6fd   :  { %6652 = vmatpush1.bf16.msra.mxu1 %v8698_v3  ;;  %6816 = vmatpush1.bf16.msra.mxu0 %v8701_v44  ;;  %v9077_v59 = vpop.eup %9076  ;;  %v8761_v3 = vld [vmem:[#allocation25 + $0xdd0] ss:$28 sps:$4 sm:$0xff]  }
 0x6fe   :  { %6653 = vmatprep.subr.bf16.mxu1 %v8706_v35  ;;  %6817 = vmatprep.subr.bf16.mxu0 %v8709_v5  ;;  %v3647_v19 = vadd.f32 1.0, %v9077_v59  ;;  %v8766_v35 = vld [vmem:[#allocation25 + $0x14] ss:$28 sps:$4 sm:$0xff]  }
 0x6ff   :  { %v8767_v5 = vld [vmem:[#allocation25 + $0x1d8] ss:$28 sps:$4 sm:$0xff]   ;;  %v8813_v59 = vld [vmem:[#allocation25 + $0x3d0] ss:$28 sps:$4 sm:$0xff]  }
 0x700   :  { %v3655_v44 = vmul.f32 %v3647_v19, %v3591_v62  ;;  %v8821_v19 = vld [vmem:[#allocation25 + $0x27c] ss:$28 sps:$4 sm:$0xff]  }
 0x701   :  { %6654 = vmatpush1.bf16.msra.mxu1 %v8704_v8  ;;  %6818 = vmatpush1.bf16.msra.mxu0 %v8707_v58  ;;  %v8764_v8 = vld [vmem:[#allocation25 + $0x10] ss:$28 sps:$4 sm:$0xff]   ;;  %v8768_v58 = vld [vmem:[#allocation25 + $0x18] ss:$28 sps:$4 sm:$0xff]  }
 0x702   :  { %6655 = vmatprep.subr.bf16.mxu1 %v8712_v12  ;;  %6819 = vmatprep.subr.bf16.mxu0 %v8715_v11  ;;  %v10189_v43 = vpack.c.bf16 %v3655_v44, %v3655_v44  ;;  %v8771_v12 = vld [vmem:[#allocation25 + $0x4c] ss:$28 sps:$4 sm:$0xff]   ;;  %v8819_v62 = vld [vmem:[#allocation25 + $0x278] ss:$28 sps:$4 sm:$0xff]  }
 0x703   :  { %v8769_v11 = vld [vmem:[#allocation25 + $0x48] ss:$28 sps:$4 sm:$0xff]   ;;  %v8827_v44 = vld [vmem:[#allocation25 + $0x638] ss:$28 sps:$4 sm:$0xff]  }
 0x705   :  { %6656 = vmatpush1.bf16.msra.mxu1 %v8710_v41  ;;  %6820 = vmatpush1.bf16.msra.mxu0 %v8713_v10  ;;  %v8773_v41 = vld [vmem:[#allocation25 + $0x50] ss:$28 sps:$4 sm:$0xff]   ;;  %v8777_v10 = vld [vmem:[#allocation25 + $0x248] ss:$28 sps:$4 sm:$0xff]  }
 0x706   :  { %6657 = vmatprep.subr.bf16.mxu1 %v8718_v14  ;;  %6821 = vmatprep.subr.bf16.mxu0 %v8721_v16  ;;  %v8774_v14 = vld [vmem:[#allocation25 + $0x80] ss:$28 sps:$4 sm:$0xff]   ;;  %v8778_v16 = vld [vmem:[#allocation25 + $0x88] ss:$28 sps:$4 sm:$0xff]  }
 0x709   :  { %6658 = vmatpush1.bf16.msra.mxu1 %v8716_v25  ;;  %6822 = vmatpush1.bf16.msra.mxu0 %v8719_v57  ;;  %v8781_v25 = vld [vmem:[#allocation25 + $0xbc] ss:$28 sps:$4 sm:$0xff]  }
 0x70a   :  { %6659 = vmatprep.subr.bf16.mxu1 %v8724_v18  ;;  %6823 = vmatprep.subr.bf16.mxu0 %v8727_v20  ;;  %v8779_v57 = vld [vmem:[#allocation25 + $0xb8] ss:$28 sps:$4 sm:$0xff]   ;;  %v8783_v18 = vld [vmem:[#allocation25 + $0xc0] ss:$28 sps:$4 sm:$0xff]  }
 0x70b   :  { %v8786_v20 = vld [vmem:[#allocation25 + $0xf4] ss:$28 sps:$4 sm:$0xff]  }
 0x70d   :  { %6660 = vmatpush1.bf16.msra.mxu1 %v8722_v22  ;;  %6824 = vmatpush1.bf16.msra.mxu0 %v8725_v37  ;;  %v8787_v22 = vld [vmem:[#allocation25 + $0x2b8] ss:$28 sps:$4 sm:$0xff]   ;;  %v8791_v37 = vld [vmem:[#allocation25 + $0x12c] ss:$28 sps:$4 sm:$0xff]  }
 0x70e   :  { %6661 = vmatprep.subr.bf16.mxu1 %v8730_v9  ;;  %6825 = vmatprep.subr.bf16.mxu0 %v8733_v45  ;;  %v8792_v9 = vld [vmem:[#allocation25 + $0x2f0] ss:$28 sps:$4 sm:$0xff]   ;;  %v8789_v45 = vld [vmem:[#allocation25 + $0x128] ss:$28 sps:$4 sm:$0xff]  }
 0x711   :  { %6662 = vmatpush1.bf16.msra.mxu1 %v8728_v46  ;;  %6826 = vmatpush1.bf16.msra.mxu0 %v8731_v42  ;;  %v8793_v46 = vld [vmem:[#allocation25 + $0x130] ss:$28 sps:$4 sm:$0xff]   ;;  %v8797_v42 = vld [vmem:[#allocation25 + $0x328] ss:$28 sps:$4 sm:$0xff]  }
 0x712   :  { %6663 = vmatprep.subr.bf16.mxu1 %v8736_v48  ;;  %6827 = vmatprep.subr.bf16.mxu0 %v8739_v49  ;;  %v8794_v48 = vld [vmem:[#allocation25 + $0x160] ss:$28 sps:$4 sm:$0xff]   ;;  %v8798_v49 = vld [vmem:[#allocation25 + $0x168] ss:$28 sps:$4 sm:$0xff]  }
 0x715   :  { %6664 = vmatpush1.bf16.msra.mxu1 %v8734_v28  ;;  %6828 = vmatpush1.bf16.msra.mxu0 %v8737_v29  ;;  %v8801_v28 = vld [vmem:[#allocation25 + $0x19c] ss:$28 sps:$4 sm:$0xff]  }
 0x716   :  { %6665 = vmatprep.subr.bf16.mxu1 %v8742_v30  ;;  %6829 = vmatprep.subr.bf16.mxu0 %v8745_v34  ;;  %v8802_v29 = vld [vmem:[#allocation25 + $0x360] ss:$28 sps:$4 sm:$0xff]   ;;  %v8799_v30 = vld [vmem:[#allocation25 + $0x198] ss:$28 sps:$4 sm:$0xff]  }
 0x717   :  { %v8803_v34 = vld [vmem:[#allocation25 + $0x1a0] ss:$28 sps:$4 sm:$0xff]  }
 0x719   :  { %6666 = vmatpush1.bf16.msra.mxu1 %v8740_v53  ;;  %6830 = vmatpush1.bf16.msra.mxu0 %v8743_v54  ;;  %v8806_v53 = vld [vmem:[#allocation25 + $0x1d4] ss:$28 sps:$4 sm:$0xff]  }
 0x71a   :  { %6667 = vmatprep.subr.bf16.mxu1 %v8748_v31  ;;  %6831 = vmatprep.subr.bf16.mxu0 %v8751_v24  ;;  %v8807_v54 = vld [vmem:[#allocation25 + $0x558] ss:$28 sps:$4 sm:$0xff]   ;;  %v8804_v31 = vld [vmem:[#allocation25 + $0x1d0] ss:$28 sps:$4 sm:$0xff]  }
 0x71b   :  { %v8808_v24 = vld [vmem:[#allocation25 + $0x398] ss:$28 sps:$4 sm:$0xff]  }
 0x71d   :  { %6668 = vmatpush1.bf16.msra.mxu1 %v8746_v27  ;;  %6832 = vmatpush1.bf16.msra.mxu0 %v8749_v56  ;;  %v8811_v27 = vld [vmem:[#allocation25 + $0x20c] ss:$28 sps:$4 sm:$0xff]  }
 0x71e   :  { %6669 = vmatprep.subr.bf16.mxu1 %v8754_v52  ;;  %6833 = vmatprep.subr.bf16.mxu0 %v8757_v60  ;;  %v8812_v56 = vld [vmem:[#allocation25 + $0x590] ss:$28 sps:$4 sm:$0xff]   ;;  %v8809_v52 = vld [vmem:[#allocation25 + $0x208] ss:$28 sps:$4 sm:$0xff]  }
 0x71f   :  { %v8816_v60 = vld [vmem:[#allocation25 + $0x244] ss:$28 sps:$4 sm:$0xff]  }
 0x721   :  { %6670 = vmatpush1.bf16.msra.mxu1 %v8752_v61  ;;  %6834 = vmatpush1.bf16.msra.mxu0 %v8755_v39  ;;  %v8817_v61 = vld [vmem:[#allocation25 + $0x5c8] ss:$28 sps:$4 sm:$0xff]   ;;  %v8814_v39 = vld [vmem:[#allocation25 + $0x240] ss:$28 sps:$4 sm:$0xff]  }
 0x722   :  { %6671 = vmatprep.subr.bf16.mxu1 %v8760_v33  ;;  %6835 = vmatprep.subr.bf16.mxu0 %v8763_v63  ;;  %v8818_v33 = vld [vmem:[#allocation25 + $0x408] ss:$28 sps:$4 sm:$0xff]   ;;  %v8822_v63 = vld [vmem:[#allocation25 + $0x600] ss:$28 sps:$4 sm:$0xff]  }
 0x725   :  { %6672 = vmatpush1.bf16.msra.mxu1 %v8758_v2  ;;  %6836 = vmatpush1.bf16.msra.mxu0 %v8761_v3  ;;  %v8823_v2 = vld [vmem:[#allocation25 + $0x440] ss:$28 sps:$4 sm:$0xff]   ;;  %v8826_v3 = vld [vmem:[#allocation25 + $0x2b4] ss:$28 sps:$4 sm:$0xff]  }
 0x726   :  { %6846 = vmatprep.subr.bf16.mxu1 %v8766_v35  ;;  %8018 = vmatprep.subr.bf16.mxu0 %v8767_v5  ;;  %v8824_v35 = vld [vmem:[#allocation25 + $0x2b0] ss:$28 sps:$4 sm:$0xff]   ;;  %v8828_v5 = vld [vmem:[#allocation25 + $0x478] ss:$28 sps:$4 sm:$0xff]  }
 0x728   :  { %6674 = vmatmul.mubr.bf16.vlgmr.msra.gmra.mrb[12].mxu1 %v10189_v43  ;;  %6838 = vmatmul.mubr.bf16.vlgmr.msra.gmra.mrb[24].mxu0 %v10189_v43 }
 0x729   :  { %6847 = vmatpush1.bf16.msra.mxu1 %v8764_v8  ;;  %6878 = vmatprep.mubr.bf16.mxu1 %v10036_v51  ;;  %v8831_v8 = vld [vmem:[#allocation25 + $0x2ec] ss:$28 sps:$4 sm:$0xff]  }
 0x72a   :  { %8019 = vmatpush3.bf16.msra.mxu0 %v8768_v58  ;;  %7042 = vmatprep.mubr.bf16.mxu0 %v10036_v51  ;;  %v8784_v51 = vld [vmem:[#allocation25 + $0xf0] ss:$28 sps:$4 sm:$0xff]  }
 0x72b   :  { %6848 = vmatprep.subr.bf16.mxu1 %v8771_v12  ;;  %8020 = vmatprep.subr.bf16.mxu0 %v8772_v26  ;;  %v8832_v58 = vld [vmem:[#allocation25 + $0x670] ss:$28 sps:$4 sm:$0xff]   ;;  %v8829_v12 = vld [vmem:[#allocation25 + $0x2e8] ss:$28 sps:$4 sm:$0xff]  }
 0x72c   :  { %v8833_v26 = vld [vmem:[#allocation25 + $0x4b0] ss:$28 sps:$4 sm:$0xff]  }
 0x72d   :  { %6849 = vmatpush1.bf16.msra.mxu1 %v8769_v11  ;;  %v8836_v11 = vld [vmem:[#allocation25 + $0x324] ss:$28 sps:$4 sm:$0xff]  }
 0x72e   :  { %8021 = vmatpush3.bf16.msra.mxu0 %v8773_v41  ;;  %6850 = vmatprep.subr.bf16.mxu1 %v8776_v47  ;;  %v8837_v41 = vld [vmem:[#allocation25 + $0x6a8] ss:$28 sps:$4 sm:$0xff]   ;;  %v8834_v47 = vld [vmem:[#allocation25 + $0x320] ss:$28 sps:$4 sm:$0xff]  }
 0x72f   :  { %8022 = vmatprep.subr.bf16.mxu0 %v8777_v10  ;;  %v8838_v10 = vld [vmem:[#allocation25 + $0x4e8] ss:$28 sps:$4 sm:$0xff]  }
 0x731   :  { %6851 = vmatpush1.bf16.msra.mxu1 %v8774_v14  ;;  %v8841_v14 = vld [vmem:[#allocation25 + $0x35c] ss:$28 sps:$4 sm:$0xff]  }
 0x732   :  { %8023 = vmatpush3.bf16.msra.mxu0 %v8778_v16  ;;  %6852 = vmatprep.subr.bf16.mxu1 %v8781_v25  ;;  %v8842_v16 = vld [vmem:[#allocation25 + $0x6e0] ss:$28 sps:$4 sm:$0xff]   ;;  %v8839_v25 = vld [vmem:[#allocation25 + $0x358] ss:$28 sps:$4 sm:$0xff]  }
 0x733   :  { %8024 = vmatprep.subr.bf16.mxu0 %v8782_v17  ;;  %v8843_v17 = vld [vmem:[#allocation25 + $0x520] ss:$28 sps:$4 sm:$0xff]  }
 0x735   :  { %6853 = vmatpush1.bf16.msra.mxu1 %v8779_v57  ;;  %v8846_v57 = vld [vmem:[#allocation25 + $0x394] ss:$28 sps:$4 sm:$0xff]  }
 0x736   :  { %8025 = vmatpush3.bf16.msra.mxu0 %v8783_v18  ;;  %6854 = vmatprep.subr.bf16.mxu1 %v8786_v20  ;;  %v8847_v18 = vld [vmem:[#allocation25 + $0x8d8] ss:$28 sps:$4 sm:$0xff]   ;;  %v8844_v20 = vld [vmem:[#allocation25 + $0x390] ss:$28 sps:$4 sm:$0xff]  }
 0x737   :  { %8026 = vmatprep.subr.bf16.mxu0 %v8787_v22  ;;  %v8848_v22 = vld [vmem:[#allocation25 + $0x718] ss:$28 sps:$4 sm:$0xff]  }
 0x739   :  { %6855 = vmatpush1.bf16.msra.mxu1 %v8784_v51  ;;  %v8851_v51 = vld [vmem:[#allocation25 + $0x3cc] ss:$28 sps:$4 sm:$0xff]  }
 0x73a   :  { %8027 = vmatpush3.bf16.msra.mxu0 %v8788_v23  ;;  %6856 = vmatprep.subr.bf16.mxu1 %v8791_v37  ;;  %v8852_v23 = vld [vmem:[#allocation25 + $0x910] ss:$28 sps:$4 sm:$0xff]   ;;  %v8849_v37 = vld [vmem:[#allocation25 + $0x3c8] ss:$28 sps:$4 sm:$0xff]  }
 0x73b   :  { %8028 = vmatprep.subr.bf16.mxu0 %v8792_v9  ;;  %v8853_v9 = vld [vmem:[#allocation25 + $0x750] ss:$28 sps:$4 sm:$0xff]  }
 0x73d   :  { %6857 = vmatpush1.bf16.msra.mxu1 %v8789_v45  ;;  %v8856_v45 = vld [vmem:[#allocation25 + $0x404] ss:$28 sps:$4 sm:$0xff]  }
 0x73e   :  { %8029 = vmatpush3.bf16.msra.mxu0 %v8793_v46  ;;  %6858 = vmatprep.subr.bf16.mxu1 %v8796_v40  ;;  %v8857_v46 = vld [vmem:[#allocation25 + $0x948] ss:$28 sps:$4 sm:$0xff]   ;;  %v8854_v40 = vld [vmem:[#allocation25 + $0x400] ss:$28 sps:$4 sm:$0xff]  }
 0x73f   :  { %8030 = vmatprep.subr.bf16.mxu0 %v8797_v42  ;;  %v8861_v42 = vld [vmem:[#allocation25 + $0x43c] ss:$28 sps:$4 sm:$0xff]  }
 0x741   :  { %6859 = vmatpush1.bf16.msra.mxu1 %v8794_v48  ;;  %v8862_v48 = vld [vmem:[#allocation25 + $0x980] ss:$28 sps:$4 sm:$0xff]  }
 0x742   :  { %8031 = vmatpush3.bf16.msra.mxu0 %v8798_v49  ;;  %6860 = vmatprep.subr.bf16.mxu1 %v8801_v28  ;;  %v8859_v49 = vld [vmem:[#allocation25 + $0x438] ss:$28 sps:$4 sm:$0xff]  }
 0x743   :  { %8032 = vmatprep.subr.bf16.mxu0 %v8802_v29  ;;  %v8866_v28 = vld [vmem:[#allocation25 + $0x474] ss:$28 sps:$4 sm:$0xff]  }
 0x744   :  { %v8867_v29 = vld [vmem:[#allocation25 + $0x9b8] ss:$28 sps:$4 sm:$0xff]  }
 0x745   :  { %6861 = vmatpush1.bf16.msra.mxu1 %v8799_v30  ;;  %v8864_v30 = vld [vmem:[#allocation25 + $0x470] ss:$28 sps:$4 sm:$0xff]  }
 0x746   :  { %8033 = vmatpush3.bf16.msra.mxu0 %v8803_v34  ;;  %6862 = vmatprep.subr.bf16.mxu1 %v8806_v53  ;;  %v8868_v34 = vld [vmem:[#allocation25 + $0x7f8] ss:$28 sps:$4 sm:$0xff]   ;;  %v8871_v53 = vld [vmem:[#allocation25 + $0x4ac] ss:$28 sps:$4 sm:$0xff]  }
 0x747   :  { %8040 = vmatprep.subr.bf16.mxu0 %v8807_v54  ;;  %v8872_v54 = vld [vmem:[#allocation25 + $0x9f0] ss:$28 sps:$4 sm:$0xff]  }
 0x749   :  { %7043 = vmatmul.mubr.bf16.vlgmr.msra.gmra.mrb[28].mxu0 %v10038_v55  ;;  %6863 = vmatpush1.bf16.msra.mxu1 %v8804_v31  ;;  %v8869_v31 = vld [vmem:[#allocation25 + $0x4a8] ss:$28 sps:$4 sm:$0xff]  }
 0x74a   :  { %8041 = vmatpush3.bf16.msra.mxu0 %v8808_v24  ;;  %7082 = vmatprep.mubr.bf16.mxu0 %v10044_v50  ;;  %v8873_v24 = vld [vmem:[#allocation25 + $0x830] ss:$28 sps:$4 sm:$0xff]  }
 0x74b   :  { %6864 = vmatprep.subr.bf16.mxu1 %v8811_v27  ;;  %8042 = vmatprep.subr.bf16.mxu0 %v8812_v56  ;;  %v8876_v27 = vld [vmem:[#allocation25 + $0x4e4] ss:$28 sps:$4 sm:$0xff]  }
 0x74c   :  { %v8877_v56 = vld [vmem:[#allocation25 + $0xa28] ss:$28 sps:$4 sm:$0xff]  }
 0x74d   :  { %6865 = vmatpush1.bf16.msra.mxu1 %v8809_v52  ;;  %v8874_v52 = vld [vmem:[#allocation25 + $0x4e0] ss:$28 sps:$4 sm:$0xff]  }
 0x74e   :  { %8043 = vmatpush3.bf16.msra.mxu0 %v8813_v59  ;;  %6866 = vmatprep.subr.bf16.mxu1 %v8816_v60  ;;  %v8878_v59 = vld [vmem:[#allocation25 + $0x868] ss:$28 sps:$4 sm:$0xff]   ;;  %v8881_v60 = vld [vmem:[#allocation25 + $0x51c] ss:$28 sps:$4 sm:$0xff]  }
 0x74f   :  { %8044 = vmatprep.subr.bf16.mxu0 %v8817_v61  ;;  %v8882_v61 = vld [vmem:[#allocation25 + $0xa60] ss:$28 sps:$4 sm:$0xff]  }
 0x751   :  { %6867 = vmatpush1.bf16.msra.mxu1 %v8814_v39  ;;  %v8879_v39 = vld [vmem:[#allocation25 + $0x518] ss:$28 sps:$4 sm:$0xff]  }
 0x752   :  { %8045 = vmatpush3.bf16.msra.mxu0 %v8818_v33  ;;  %6868 = vmatprep.subr.bf16.mxu1 %v8821_v19  ;;  %v8883_v33 = vld [vmem:[#allocation25 + $0x8a0] ss:$28 sps:$4 sm:$0xff]   ;;  %v8886_v19 = vld [vmem:[#allocation25 + $0x554] ss:$28 sps:$4 sm:$0xff]  }
 0x753   :  { %8046 = vmatprep.subr.bf16.mxu0 %v8822_v63  ;;  %v8887_v63 = vld [vmem:[#allocation25 + $0xc58] ss:$28 sps:$4 sm:$0xff]  }
 0x755   :  { %6869 = vmatpush1.bf16.msra.mxu1 %v8819_v62  ;;  %v8884_v62 = vld [vmem:[#allocation25 + $0x550] ss:$28 sps:$4 sm:$0xff]  }
 0x756   :  { %8047 = vmatpush3.bf16.msra.mxu0 %v8823_v2  ;;  %6870 = vmatprep.subr.bf16.mxu1 %v8826_v3  ;;  %v8888_v2 = vld [vmem:[#allocation25 + $0xa98] ss:$28 sps:$4 sm:$0xff]   ;;  %v8891_v3 = vld [vmem:[#allocation25 + $0x58c] ss:$28 sps:$4 sm:$0xff]  }
 0x757   :  { %8048 = vmatprep.subr.bf16.mxu0 %v8827_v44  ;;  %v8892_v44 = vld [vmem:[#allocation25 + $0xc90] ss:$28 sps:$4 sm:$0xff]  }
 0x759   :  { %6871 = vmatpush1.bf16.msra.mxu1 %v8824_v35  ;;  %v8889_v35 = vld [vmem:[#allocation25 + $0x588] ss:$28 sps:$4 sm:$0xff]  }
 0x75a   :  { %8049 = vmatpush3.bf16.msra.mxu0 %v8828_v5  ;;  %6872 = vmatprep.subr.bf16.mxu1 %v8831_v8  ;;  %v8893_v5 = vld [vmem:[#allocation25 + $0xad0] ss:$28 sps:$4 sm:$0xff]   ;;  %v8896_v8 = vld [vmem:[#allocation25 + $0x5c4] ss:$28 sps:$4 sm:$0xff]  }
 0x75b   :  { %8050 = vmatprep.subr.bf16.mxu0 %v8832_v58  ;;  %v8897_v58 = vld [vmem:[#allocation25 + $0xcc8] ss:$28 sps:$4 sm:$0xff]  }
 0x75d   :  { %6873 = vmatpush1.bf16.msra.mxu1 %v8829_v12  ;;  %v8894_v12 = vld [vmem:[#allocation25 + $0x5c0] ss:$28 sps:$4 sm:$0xff]  }
 0x75e   :  { %8051 = vmatpush3.bf16.msra.mxu0 %v8833_v26  ;;  %6874 = vmatprep.subr.bf16.mxu1 %v8836_v11  ;;  %v8898_v26 = vld [vmem:[#allocation25 + $0xb08] ss:$28 sps:$4 sm:$0xff]   ;;  %v8901_v11 = vld [vmem:[#allocation25 + $0x5fc] ss:$28 sps:$4 sm:$0xff]  }
 0x75f   :  { %8052 = vmatprep.subr.bf16.mxu0 %v8837_v41  ;;  %v8902_v41 = vld [vmem:[#allocation25 + $0xd00] ss:$28 sps:$4 sm:$0xff]  }
 0x761   :  { %6875 = vmatpush1.bf16.msra.mxu1 %v8834_v47  ;;  %v8899_v47 = vld [vmem:[#allocation25 + $0x5f8] ss:$28 sps:$4 sm:$0xff]  }
 0x762   :  { %8053 = vmatpush3.bf16.msra.mxu0 %v8838_v10  ;;  %6876 = vmatprep.subr.bf16.mxu1 %v8841_v14  ;;  %v8903_v10 = vld [vmem:[#allocation25 + $0xb40] ss:$28 sps:$4 sm:$0xff]   ;;  %v8906_v14 = vld [vmem:[#allocation25 + $0x634] ss:$28 sps:$4 sm:$0xff]  }
 0x763   :  { %8054 = vmatprep.subr.bf16.mxu0 %v8842_v16  ;;  %v8907_v16 = vld [vmem:[#allocation25 + $0xd38] ss:$28 sps:$4 sm:$0xff]  }
 0x765   :  { %6877 = vmatpush1.bf16.msra.mxu1 %v8839_v25  ;;  %v8904_v25 = vld [vmem:[#allocation25 + $0x630] ss:$28 sps:$4 sm:$0xff]  }
 0x766   :  { %8055 = vmatpush3.bf16.msra.mxu0 %v8843_v17  ;;  %6887 = vmatprep.subr.bf16.mxu1 %v8846_v57  ;;  %v8908_v17 = vld [vmem:[#allocation25 + $0xb78] ss:$28 sps:$4 sm:$0xff]   ;;  %v8911_v57 = vld [vmem:[#allocation25 + $0x66c] ss:$28 sps:$4 sm:$0xff]  }
 0x767   :  { %8062 = vmatprep.subr.bf16.mxu0 %v8847_v18  ;;  %v8912_v18 = vld [vmem:[#allocation25 + $0xd70] ss:$28 sps:$4 sm:$0xff]  }
 0x768   :  { %6879 = vmatmul.mubr.bf16.vlgmr.msra.gmra.mrb[16].mxu1 %v10038_v55  ;;  %v8858_v55 = vld [vmem:[#allocation25 + $0x788] ss:$28 sps:$4 sm:$0xff]  }
 0x769   :  { %7083 = vmatmul.mubr.bf16.vlgmr.msra.gmra.mrb[32].mxu0 %v10089_v32  ;;  %6888 = vmatpush1.bf16.msra.mxu1 %v8844_v20  ;;  %v8909_v20 = vld [vmem:[#allocation25 + $0x668] ss:$28 sps:$4 sm:$0xff]  }
 0x76a   :  { %6919 = vmatprep.mubr.bf16.mxu1 %v10044_v50  ;;  %8063 = vmatpush3.bf16.msra.mxu0 %v8848_v22  ;;  %v8863_v50 = vld [vmem:[#allocation25 + $0x7c0] ss:$28 sps:$4 sm:$0xff]   ;;  %v8913_v22 = vld [vmem:[#allocation25 + $0xbb0] ss:$28 sps:$4 sm:$0xff]  }
 0x76b   :  { %7122 = vmatprep.mubr.bf16.mxu0 %v10166_v4  ;;  %6889 = vmatprep.subr.bf16.mxu1 %v8851_v51  ;;  %v8916_v51 = vld [vmem:[#allocation25 + $0x6a4] ss:$28 sps:$4 sm:$0xff]  }
 0x76c   :  { %8064 = vmatprep.subr.bf16.mxu0 %v8852_v23  ;;  %v8917_v23 = vld [vmem:[#allocation25 + $0xda8] ss:$28 sps:$4 sm:$0xff]  }
 0x76d   :  { %6890 = vmatpush1.bf16.msra.mxu1 %v8849_v37  ;;  %v8914_v37 = vld [vmem:[#allocation25 + $0x6a0] ss:$28 sps:$4 sm:$0xff]  }
 0x76e   :  { %8065 = vmatpush3.bf16.msra.mxu0 %v8853_v9  ;;  %6891 = vmatprep.subr.bf16.mxu1 %v8856_v45  ;;  %v8918_v9 = vld [vmem:[#allocation25 + $0xbe8] ss:$28 sps:$4 sm:$0xff]   ;;  %v8921_v45 = vld [vmem:[#allocation25 + $0x6dc] ss:$28 sps:$4 sm:$0xff]  }
 0x76f   :  { %8066 = vmatprep.subr.bf16.mxu0 %v8857_v46  ;;  %v8922_v46 = vld [vmem:[#allocation25 + $0xde0] ss:$28 sps:$4 sm:$0xff]  }
 0x771   :  { %6892 = vmatpush1.bf16.msra.mxu1 %v8854_v40  ;;  %v8919_v40 = vld [vmem:[#allocation25 + $0x6d8] ss:$28 sps:$4 sm:$0xff]  }
 0x772   :  { %8067 = vmatpush3.bf16.msra.mxu0 %v8858_v55  ;;  %6893 = vmatprep.subr.bf16.mxu1 %v8861_v42  ;;  %v8923_v55 = vld [vmem:[#allocation25 + $0xc20] ss:$28 sps:$4 sm:$0xff]   ;;  %v8926_v42 = vld [vmem:[#allocation25 + $0x714] ss:$28 sps:$4 sm:$0xff]  }
 0x773   :  { %8068 = vmatprep.subr.bf16.mxu0 %v8862_v48  ;;  %v8924_v48 = vld [vmem:[#allocation25 + $0x710] ss:$28 sps:$4 sm:$0xff]  }
 0x775   :  { %6894 = vmatpush1.bf16.msra.mxu1 %v8859_v49  ;;  %v8929_v49 = vld [vmem:[#allocation25 + $0x74c] ss:$28 sps:$4 sm:$0xff]  }
 0x776   :  { %8069 = vmatpush3.bf16.msra.mxu0 %v8863_v50  ;;  %6895 = vmatprep.subr.bf16.mxu1 %v8866_v28  ;;  %v8927_v50 = vld [vmem:[#allocation25 + $0x748] ss:$28 sps:$4 sm:$0xff]  }
 0x777   :  { %8070 = vmatprep.subr.bf16.mxu0 %v8867_v29  ;;  %v8932_v28 = vld [vmem:[#allocation25 + $0x784] ss:$28 sps:$4 sm:$0xff]  }
 0x778   :  { %v8930_v29 = vld [vmem:[#allocation25 + $0x780] ss:$28 sps:$4 sm:$0xff]  }
 0x779   :  { %6896 = vmatpush1.bf16.msra.mxu1 %v8864_v30  ;;  %v8935_v30 = vld [vmem:[#allocation25 + $0x7bc] ss:$28 sps:$4 sm:$0xff]  }
 0x77a   :  { %8071 = vmatpush3.bf16.msra.mxu0 %v8868_v34  ;;  %6897 = vmatprep.subr.bf16.mxu1 %v8871_v53  ;;  %v8933_v34 = vld [vmem:[#allocation25 + $0x7b8] ss:$28 sps:$4 sm:$0xff]  }
 0x77b   :  { %8072 = vmatprep.subr.bf16.mxu0 %v8872_v54  ;;  %v8938_v53 = vld [vmem:[#allocation25 + $0x7f4] ss:$28 sps:$4 sm:$0xff]  }
 0x77c   :  { %v8936_v54 = vld [vmem:[#allocation25 + $0x7f0] ss:$28 sps:$4 sm:$0xff]  }
 0x77d   :  { %6898 = vmatpush1.bf16.msra.mxu1 %v8869_v31  ;;  %v8939_v31 = vld [vmem:[#allocation25 + $0x828] ss:$28 sps:$4 sm:$0xff]  }
 0x77e   :  { %8073 = vmatpush3.bf16.msra.mxu0 %v8873_v24  ;;  %6899 = vmatprep.subr.bf16.mxu1 %v8876_v27  ;;  %v8944_v24 = vld [vmem:[#allocation25 + $0x864] ss:$28 sps:$4 sm:$0xff]   ;;  %v8947_v27 = vld [vmem:[#allocation25 + $0x89c] ss:$28 sps:$4 sm:$0xff]  }
 0x77f   :  { %8074 = vmatprep.subr.bf16.mxu0 %v8877_v56  ;;  %v8945_v56 = vld [vmem:[#allocation25 + $0x898] ss:$28 sps:$4 sm:$0xff]  }
 0x781   :  { %6900 = vmatpush1.bf16.msra.mxu1 %v8874_v52  ;;  %v8950_v52 = vld [vmem:[#allocation25 + $0x8d4] ss:$28 sps:$4 sm:$0xff]  }
 0x782   :  { %8075 = vmatpush3.bf16.msra.mxu0 %v8878_v59  ;;  %6901 = vmatprep.subr.bf16.mxu1 %v8881_v60  ;;  %v8948_v59 = vld [vmem:[#allocation25 + $0x8d0] ss:$28 sps:$4 sm:$0xff]  }
 0x783   :  { %8076 = vmatprep.subr.bf16.mxu0 %v8882_v61  ;;  %v8953_v60 = vld [vmem:[#allocation25 + $0x90c] ss:$28 sps:$4 sm:$0xff]  }
 0x784   :  { %v8951_v61 = vld [vmem:[#allocation25 + $0x908] ss:$28 sps:$4 sm:$0xff]  }
 0x785   :  { %6902 = vmatpush1.bf16.msra.mxu1 %v8879_v39  ;;  %v8956_v39 = vld [vmem:[#allocation25 + $0x944] ss:$28 sps:$4 sm:$0xff]  }
 0x786   :  { %8077 = vmatpush3.bf16.msra.mxu0 %v8883_v33  ;;  %6903 = vmatprep.subr.bf16.mxu1 %v8886_v19  ;;  %v8954_v33 = vld [vmem:[#allocation25 + $0x940] ss:$28 sps:$4 sm:$0xff]  }
 0x787   :  { %8084 = vmatprep.subr.bf16.mxu0 %v8887_v63  ;;  %v8959_v19 = vld [vmem:[#allocation25 + $0x97c] ss:$28 sps:$4 sm:$0xff]  }
 0x788   :  { %v8957_v63 = vld [vmem:[#allocation25 + $0x978] ss:$28 sps:$4 sm:$0xff]  }
 0x789   :  { %7123 = vmatmul.mubr.bf16.vlgmr.msra.gmra.mrb[36].mxu0 %v10168_v15  ;;  %6904 = vmatpush1.bf16.msra.mxu1 %v8884_v62  ;;  %v8962_v62 = vld [vmem:[#allocation25 + $0x9b4] ss:$28 sps:$4 sm:$0xff]  }
 0x78a   :  { %8085 = vmatpush3.bf16.msra.mxu0 %v8888_v2  ;;  %7162 = vmatprep.mubr.bf16.mxu0 %v10173_v13  ;;  %v8960_v2 = vld [vmem:[#allocation25 + $0x9b0] ss:$28 sps:$4 sm:$0xff]  }
 0x78b   :  { %6905 = vmatprep.subr.bf16.mxu1 %v8891_v3  ;;  %8086 = vmatprep.subr.bf16.mxu0 %v8892_v44  ;;  %v8965_v3 = vld [vmem:[#allocation25 + $0x9ec] ss:$28 sps:$4 sm:$0xff]  }
 0x78c   :  { %v8963_v44 = vld [vmem:[#allocation25 + $0x9e8] ss:$28 sps:$4 sm:$0xff]  }
 0x78d   :  { %6906 = vmatpush1.bf16.msra.mxu1 %v8889_v35  ;;  %v8968_v35 = vld [vmem:[#allocation25 + $0xa24] ss:$28 sps:$4 sm:$0xff]  }
 0x78e   :  { %8087 = vmatpush3.bf16.msra.mxu0 %v8893_v5  ;;  %6907 = vmatprep.subr.bf16.mxu1 %v8896_v8  ;;  %v8966_v5 = vld [vmem:[#allocation25 + $0xa20] ss:$28 sps:$4 sm:$0xff]  }
 0x78f   :  { %8088 = vmatprep.subr.bf16.mxu0 %v8897_v58  ;;  %v8971_v8 = vld [vmem:[#allocation25 + $0xa5c] ss:$28 sps:$4 sm:$0xff]  }
 0x790   :  { %v8969_v58 = vld [vmem:[#allocation25 + $0xa58] ss:$28 sps:$4 sm:$0xff]  }
 0x791   :  { %6908 = vmatpush1.bf16.msra.mxu1 %v8894_v12  ;;  %v8974_v12 = vld [vmem:[#allocation25 + $0xa94] ss:$28 sps:$4 sm:$0xff]  }
 0x792   :  { %8089 = vmatpush3.bf16.msra.mxu0 %v8898_v26  ;;  %6909 = vmatprep.subr.bf16.mxu1 %v8901_v11  ;;  %v8972_v26 = vld [vmem:[#allocation25 + $0xa90] ss:$28 sps:$4 sm:$0xff]  }
 0x793   :  { %8090 = vmatprep.subr.bf16.mxu0 %v8902_v41  ;;  %v8977_v11 = vld [vmem:[#allocation25 + $0xacc] ss:$28 sps:$4 sm:$0xff]  }
 0x794   :  { %v8975_v41 = vld [vmem:[#allocation25 + $0xac8] ss:$28 sps:$4 sm:$0xff]  }
 0x795   :  { %6910 = vmatpush1.bf16.msra.mxu1 %v8899_v47  ;;  %v8980_v47 = vld [vmem:[#allocation25 + $0xb04] ss:$28 sps:$4 sm:$0xff]  }
 0x796   :  { %8091 = vmatpush3.bf16.msra.mxu0 %v8903_v10  ;;  %6911 = vmatprep.subr.bf16.mxu1 %v8906_v14  ;;  %v8978_v10 = vld [vmem:[#allocation25 + $0xb00] ss:$28 sps:$4 sm:$0xff]  }
 0x797   :  { %8092 = vmatprep.subr.bf16.mxu0 %v8907_v16  ;;  %v8983_v14 = vld [vmem:[#allocation25 + $0xb3c] ss:$28 sps:$4 sm:$0xff]  }
 0x798   :  { %v8981_v16 = vld [vmem:[#allocation25 + $0xb38] ss:$28 sps:$4 sm:$0xff]  }
 0x799   :  { %6912 = vmatpush1.bf16.msra.mxu1 %v8904_v25  ;;  %v8986_v25 = vld [vmem:[#allocation25 + $0xb74] ss:$28 sps:$4 sm:$0xff]  }
 0x79a   :  { %8093 = vmatpush3.bf16.msra.mxu0 %v8908_v17  ;;  %6913 = vmatprep.subr.bf16.mxu1 %v8911_v57  ;;  %v8984_v17 = vld [vmem:[#allocation25 + $0xb70] ss:$28 sps:$4 sm:$0xff]   ;;  %v10208_v57 = vld [vmem:[#allocation27] sm:$0xff] }
 0x79b   :  { %8094 = vmatprep.subr.bf16.mxu0 %v8912_v18  ;;  %v4190_v18 = vrot.slane %v10208_v57, %v9898_v36 }
 0x79d   :  { %6914 = vmatpush1.bf16.msra.mxu1 %v8909_v20  ;;  %v4186_v20 = vrot.slane %v10208_v57, %v9873_v1 }
 0x79e   :  { %8095 = vmatpush3.bf16.msra.mxu0 %v8913_v22  ;;  %6915 = vmatprep.subr.bf16.mxu1 %v8916_v51  ;;  %v8987_v22 = vld [vmem:[#allocation25 + $0xba8] ss:$28 sps:$4 sm:$0xff]   ;;  %v4194_v51 = vrot.slane %v10208_v57, %v9901_v38 }
 0x79f   :  { %8096 = vmatprep.subr.bf16.mxu0 %v8917_v23  ;;  %v8992_v23 = vld [vmem:[#allocation25 + $0xbe4] ss:$28 sps:$4 sm:$0xff]  }
 0x7a1   :  { %6916 = vmatpush1.bf16.msra.mxu1 %v8914_v37 }
 0x7a2   :  { %8097 = vmatpush3.bf16.msra.mxu0 %v8918_v9  ;;  %6917 = vmatprep.subr.bf16.mxu1 %v8921_v45 }
 0x7a3   :  { %8098 = vmatprep.subr.bf16.mxu0 %v8922_v46 }
 0x7a5   :  { %6918 = vmatpush1.bf16.msra.mxu1 %v8919_v40 }
 0x7a6   :  { %8099 = vmatpush3.bf16.msra.mxu0 %v8923_v55  ;;  %6928 = vmatprep.subr.bf16.mxu1 %v8926_v42 }
 0x7a8   :  { %6920 = vmatmul.mubr.bf16.vlgmr.msra.gmra.mrb[16].mxu1 %v10089_v32  ;;  %v8941_v32 = vld [vmem:[#allocation25 + $0x82c] ss:$28 sps:$4 sm:$0xff]  }
 0x7a9   :  { %7163 = vmatmul.mubr.bf16.vlgmr.msra.gmra.mrb[40].mxu0 %v10189_v43  ;;  %6929 = vmatpush1.bf16.msra.mxu1 %v8924_v48  ;;  %v8990_v48 = vld [vmem:[#allocation25 + $0xbe0] ss:$28 sps:$4 sm:$0xff]  }
 0x7aa   :  { %6960 = vmatprep.mubr.bf16.mxu1 %v10166_v4  ;;  %6930 = vmatprep.subr.bf16.mxu1 %v8929_v49  ;;  %v8942_v4 = vld [vmem:[#allocation25 + $0x860] ss:$28 sps:$4 sm:$0xff]  }
 0x7ad   :  { %6931 = vmatpush1.bf16.msra.mxu1 %v8927_v50  ;;  %v8995_v50 = vld [vmem:[#allocation25 + $0xc1c] ss:$28 sps:$4 sm:$0xff]  }
 0x7ae   :  { %6932 = vmatprep.subr.bf16.mxu1 %v8932_v28  ;;  %v8993_v28 = vld [vmem:[#allocation25 + $0xc18] ss:$28 sps:$4 sm:$0xff]  }
 0x7b1   :  { %6933 = vmatpush1.bf16.msra.mxu1 %v8930_v29  ;;  %v8998_v29 = vld [vmem:[#allocation25 + $0xc54] ss:$28 sps:$4 sm:$0xff]  }
 0x7b2   :  { %6934 = vmatprep.subr.bf16.mxu1 %v8935_v30  ;;  %v8996_v30 = vld [vmem:[#allocation25 + $0xc50] ss:$28 sps:$4 sm:$0xff]  }
 0x7b5   :  { %6935 = vmatpush1.bf16.msra.mxu1 %v8933_v34  ;;  %v9001_v34 = vld [vmem:[#allocation25 + $0xc8c] ss:$28 sps:$4 sm:$0xff]  }
 0x7b6   :  { %6936 = vmatprep.subr.bf16.mxu1 %v8938_v53 }
 0x7b9   :  { %6937 = vmatpush1.bf16.msra.mxu1 %v8936_v54 }
 0x7ba   :  { %6938 = vmatprep.subr.bf16.mxu1 %v8941_v32  ;;  %v8999_v32 = vld [vmem:[#allocation25 + $0xc88] ss:$28 sps:$4 sm:$0xff]  }
 0x7bd   :  { %6939 = vmatpush1.bf16.msra.mxu1 %v8939_v31 }
 0x7be   :  { %6940 = vmatprep.subr.bf16.mxu1 %v8944_v24  ;;  %v9004_v24 = vld [vmem:[#allocation25 + $0xcc4] ss:$28 sps:$4 sm:$0xff]  }
 0x7c1   :  { %6941 = vmatpush1.bf16.msra.mxu1 %v8942_v4 }
 0x7c2   :  { %6942 = vmatprep.subr.bf16.mxu1 %v8947_v27  ;;  %v9002_v27 = vld [vmem:[#allocation25 + $0xcc0] ss:$28 sps:$4 sm:$0xff]  }
 0x7c5   :  { %6943 = vmatpush1.bf16.msra.mxu1 %v8945_v56  ;;  %v9007_v56 = vld [vmem:[#allocation25 + $0xcfc] ss:$28 sps:$4 sm:$0xff]  }
 0x7c6   :  { %6944 = vmatprep.subr.bf16.mxu1 %v8950_v52  ;;  %v9005_v52 = vld [vmem:[#allocation25 + $0xcf8] ss:$28 sps:$4 sm:$0xff]  }
 0x7c9   :  { %6945 = vmatpush1.bf16.msra.mxu1 %v8948_v59  ;;  %v9010_v59 = vld [vmem:[#allocation25 + $0xd34] ss:$28 sps:$4 sm:$0xff]  }
 0x7ca   :  { %6946 = vmatprep.subr.bf16.mxu1 %v8953_v60  ;;  %v9008_v60 = vld [vmem:[#allocation25 + $0xd30] ss:$28 sps:$4 sm:$0xff]  }
 0x7cd   :  { %6947 = vmatpush1.bf16.msra.mxu1 %v8951_v61  ;;  %v9013_v61 = vld [vmem:[#allocation25 + $0xd6c] ss:$28 sps:$4 sm:$0xff]  }
 0x7ce   :  { %6948 = vmatprep.subr.bf16.mxu1 %v8956_v39  ;;  %v9011_v39 = vld [vmem:[#allocation25 + $0xd68] ss:$28 sps:$4 sm:$0xff]  }
 0x7d1   :  { %6949 = vmatpush1.bf16.msra.mxu1 %v8954_v33  ;;  %v9016_v33 = vld [vmem:[#allocation25 + $0xda4] ss:$28 sps:$4 sm:$0xff]  }
 0x7d2   :  { %6950 = vmatprep.subr.bf16.mxu1 %v8959_v19 }
 0x7d5   :  { %6951 = vmatpush1.bf16.msra.mxu1 %v8957_v63 }
 0x7d6   :  { %6952 = vmatprep.subr.bf16.mxu1 %v8962_v62  ;;  %v9014_v62 = vld [vmem:[#allocation25 + $0xda0] ss:$28 sps:$4 sm:$0xff]  }
 0x7d9   :  { %6953 = vmatpush1.bf16.msra.mxu1 %v8960_v2 }
 0x7da   :  { %6954 = vmatprep.subr.bf16.mxu1 %v8965_v3 }
 0x7dd   :  { %6955 = vmatpush1.bf16.msra.mxu1 %v8963_v44  ;;  %v9019_v44 = vld [vmem:[#allocation25 + $0xddc] ss:$28 sps:$4 sm:$0xff]  }
 0x7de   :  { %6956 = vmatprep.subr.bf16.mxu1 %v8968_v35 }
 0x7e1   :  { %6957 = vmatpush1.bf16.msra.mxu1 %v8966_v5  ;;  %v9017_v5 = vld [vmem:[#allocation25 + $0xdd8] ss:$28 sps:$4 sm:$0xff]  }
 0x7e2   :  { %6958 = vmatprep.subr.bf16.mxu1 %v8971_v8  ;;  %v4206_v8 = vrot.slane %v10208_v57, %v10100_v21 }
 0x7e5   :  { %6959 = vmatpush1.bf16.msra.mxu1 %v8969_v58 }
 0x7e6   :  { %6969 = vmatprep.subr.bf16.mxu1 %v8974_v12 }
 0x7e8   :  { %6961 = vmatmul.mubr.bf16.vlgmr.msra.gmra.mrb[16].mxu1 %v10168_v15  ;;  %v8989_v15 = vld [vmem:[#allocation25 + $0xbac] ss:$28 sps:$4 sm:$0xff]  }
 0x7e9   :  { %6970 = vmatpush1.bf16.msra.mxu1 %v8972_v26  ;;  %7001 = vmatprep.mubr.bf16.mxu1 %v10173_v13  ;;  %v4182_v13 = vrot.slane %v10208_v57, %v9870_v0 }
 0x7ea   :  { %6971 = vmatprep.subr.bf16.mxu1 %v8977_v11 }
 0x7ed   :  { %6972 = vmatpush1.bf16.msra.mxu1 %v8975_v41 }
 0x7ee   :  { %6973 = vmatprep.subr.bf16.mxu1 %v8980_v47 }
 0x7f1   :  { %6974 = vmatpush1.bf16.msra.mxu1 %v8978_v10 }
 0x7f2   :  { %6975 = vmatprep.subr.bf16.mxu1 %v8983_v14 }
 0x7f5   :  { %6976 = vmatpush1.bf16.msra.mxu1 %v8981_v16 }
 0x7f6   :  { %6977 = vmatprep.subr.bf16.mxu1 %v8986_v25 }
 0x7f9   :  { %6978 = vmatpush1.bf16.msra.mxu1 %v8984_v17 }
 0x7fa   :  { %6979 = vmatprep.subr.bf16.mxu1 %v8989_v15 }
 0x7fb   :  { %v6675_v37 = vpop.f32.mrb[12].mxu1  ;;  %v6839_v45 = vpop.f32.mrb[24].mxu0 }
 0x7fc   :  { %v8154_v9 = vadd.f32 %v6675_v37, %v4182_v13  ;;  %v6677_v46 = vpop.f32.mrb[13].mxu1  ;;  %v8156_v40 = vadd.f32 %v6839_v45, %v4190_v18  ;;  %v6841_v0 = vpop.f32.mrb[25].mxu0  ;;  %v4198_v37 = vrot.slane %v10208_v57, %v10060_v6 }
 0x7fd   :  { %v8155_v55 = vadd.f32 %v6677_v46, %v4186_v20  ;;  %v6679_v42 = vpop.f32.mrb[14].mxu1  ;;  %6980 = vmatpush1.bf16.msra.mxu1 %v8987_v22  ;;  %v8157_v36 = vadd.f32 %v6841_v0, %v4194_v51  ;;  %v6843_v49 = vpop.f32.mrb[26].mxu0 }
 0x7fe   :  { %9078 = vtanh.f32 %v8154_v9  ;;  %v6680_v1 = vpop.f32.mrb[15].mxu1  ;;  %6981 = vmatprep.subr.bf16.mxu1 %v8992_v23  ;;  %v6844_v38 = vpop.f32.mrb[27].mxu0  ;;  %v4202_v9 = vrot.slane %v10208_v57, %v10063_v7 }
 0x7ff   :  { %9080 = vtanh.f32 %v8156_v40 }
 0x800   :  { %9082 = vtanh.f32 %v8155_v55 }
 0x801   :  { %9084 = vtanh.f32 %v8157_v36  ;;  %6982 = vmatpush1.bf16.msra.mxu1 %v8990_v48 }
 0x802   :  { %6983 = vmatprep.subr.bf16.mxu1 %v8995_v50 }
 0x805   :  { %6984 = vmatpush1.bf16.msra.mxu1 %v8993_v28 }
 0x806   :  { %6985 = vmatprep.subr.bf16.mxu1 %v8998_v29 }
 0x808   :  { %v9079_v53 = vpop.eup %9078 }
 0x809   :  { %v9081_v54 = vpop.eup %9080  ;;  %7177 = vst [vmem:[%s10282_s2] sm:$0xff] %v9079_v53  ;;  %6986 = vmatpush1.bf16.msra.mxu1 %v8996_v30 }
 0x80a   :  { %v9083_v31 = vpop.eup %9082  ;;  %7179 = vst [vmem:[%s10282_s2 + $0x10] sm:$0xff] %v9081_v54  ;;  %6987 = vmatprep.subr.bf16.mxu1 %v9001_v34 }
 0x80b   :  { %v9085_v4 = vpop.eup %9084  ;;  %7178 = vst [vmem:[%s10282_s2 + $0x8] sm:$0xff] %v9083_v31 }
 0x80c   :  { %7180 = vst [vmem:[%s10282_s2 + $0x18] sm:$0xff] %v9085_v4 }
 0x80d   :  { %6988 = vmatpush1.bf16.msra.mxu1 %v8999_v32 }
 0x80e   :  { %6989 = vmatprep.subr.bf16.mxu1 %v9004_v24 }
 0x811   :  { %6990 = vmatpush1.bf16.msra.mxu1 %v9002_v27 }
 0x812   :  { %6991 = vmatprep.subr.bf16.mxu1 %v9007_v56 }
 0x815   :  { %6992 = vmatpush1.bf16.msra.mxu1 %v9005_v52 }
 0x816   :  { %6993 = vmatprep.subr.bf16.mxu1 %v9010_v59 }
 0x819   :  { %6994 = vmatpush1.bf16.msra.mxu1 %v9008_v60 }
 0x81a   :  { %6995 = vmatprep.subr.bf16.mxu1 %v9013_v61 }
 0x81c   :  { %v8034_v19 = vpop.f32.mrb[28].mxu0 }
 0x81d   :  { %v8035_v63 = vpop.f32.mrb[29].mxu0  ;;  %6996 = vmatpush1.bf16.msra.mxu1 %v9011_v39 }
 0x81e   :  { %v8036_v2 = vadd.f32 %v8035_v63, %v8034_v19  ;;  %v8037_v3 = vpop.f32.mrb[30].mxu0  ;;  %6997 = vmatprep.subr.bf16.mxu1 %v9016_v33 }
 0x81f   :  { %v8038_v35 = vpop.f32.mrb[31].mxu0 }
 0x820   :  { %v7045_v26 = vadd.f32 %v8036_v2, %v4206_v8 }
 0x821   :  { %6998 = vmatpush1.bf16.msra.mxu1 %v9014_v62 }
 0x822   :  { %6999 = vmatprep.subr.bf16.mxu1 %v9019_v44 }
 0x825   :  { %7000 = vmatpush1.bf16.msra.mxu1 %v9017_v5 }
 0x828   :  { %7002 = vmatmul.mubr.bf16.vlgmr.msra.gmra.mrb[16].mxu1 %v10189_v43 }
 0x83c   :  { %v8056_v58 = vpop.f32.mrb[32].mxu0 }
 0x83d   :  { %v8057_v12 = vpop.f32.mrb[33].mxu0 }
 0x83e   :  { %v8058_v11 = vadd.f32 %v8057_v12, %v8056_v58  ;;  %v8059_v41 = vpop.f32.mrb[34].mxu0 }
 0x83f   :  { %v8060_v47 = vpop.f32.mrb[35].mxu0 }
 0x840   :  { %v7085_v10 = vadd.f32 %v8058_v11, %v7045_v26 }
 0x85c   :  { %v8078_v14 = vpop.f32.mrb[36].mxu0 }
 0x85d   :  { %v8079_v16 = vpop.f32.mrb[37].mxu0 }
 0x85e   :  { %v8080_v25 = vadd.f32 %v8079_v16, %v8078_v14  ;;  %v8081_v17 = vpop.f32.mrb[38].mxu0 }
 0x85f   :  { %v8082_v15 = vpop.f32.mrb[39].mxu0 }
 0x860   :  { %v7125_v13 = vadd.f32 %v8080_v25, %v7085_v10 }
 0x87c   :  { %v8100_v18 = vpop.f32.mrb[40].mxu0 }
 0x87d   :  { %v8101_v20 = vpop.f32.mrb[41].mxu0 }
 0x87e   :  { %v8102_v22 = vadd.f32 %v8101_v20, %v8100_v18  ;;  %v8103_v43 = vpop.f32.mrb[42].mxu0 }
 0x87f   :  { %v8104_v51 = vpop.f32.mrb[43].mxu0 }
 0x880   :  { %v7165_v23 = vadd.f32 %v8102_v22, %v7125_v13 }
 0x882   :  { %9086 = vtanh.f32 %v7165_v23 }
 0x88c   :  { %v9087_v21 = vpop.eup %9086 }
 0x88d   :  { %7183 = vst [vmem:[%s10282_s2 + $0x30] sm:$0xff] %v9087_v21 }
 0x8fb   :  { %v7003_v45 = vpop.f32.mrb[16].mxu1 }
 0x8fc   :  { %v8158_v46 = vadd.f32 %v7003_v45, %v4198_v37  ;;  %v7005_v40 = vpop.f32.mrb[17].mxu1 }
 0x8fd   :  { %v8159_v55 = vadd.f32 %v7005_v40, %v4202_v9  ;;  %v7007_v0 = vpop.f32.mrb[18].mxu1 }
 0x8fe   :  { %9088 = vtanh.f32 %v8158_v46  ;;  %v7008_v42 = vpop.f32.mrb[19].mxu1 }
 0x8ff   :  { %9090 = vtanh.f32 %v8159_v55 }
 0x908   :  { %v9089_v48 = vpop.eup %9088 }
 0x909   :  { %v9091_v36 = vpop.eup %9090  ;;  %7181 = vst [vmem:[%s10282_s2 + $0x20] sm:$0xff] %v9089_v48 }
 0x90a   :  { %7182 = vst [vmem:[%s10282_s2 + $0x28] sm:$0xff] %v9091_v36 }
 0x90b   :  { %7188 = vsyncpa [#allocation3], 1 }
 0x90c   :  { %7189 = vsyncpa [#allocation5], 1 }
 0x90d   :  { %7190 = vsyncpa [#allocation8], 1 }
 0x90e   :  { %7191 = vsyncpa [#allocation11], 1 }
 0x90f   :  { %7192 = vsyncpa [#allocation14], 1 }
 0x910   :  { %7193 = vsyncpa [#allocation17], 1 }
 0x911   :  { %7194 = vsyncpa [#allocation20], 1 }
 0x912   :  { %7195 = vsyncpa [#allocation23], 1 }
 0x913   :  { %7196 = vsyncpa [#allocation26], 1 }

</bundles_post_ra>
